<compile_context>
chip_gen: v7x
topology: tpu7x:2x2x1
jax: 0.10.0
libtpu: 0.0.40
codegen_flags: <defaults>
</compile_context>

<pallas_src>
import functools
import numpy as np
import jax
import jax.numpy as jnp
from jax.experimental import pallas as pl
from jax.experimental.pallas import tpu as pltpu


# ----------------------------------------------------------------------------
# Pallas kernel: fused residual bottleneck block for a block of batch elements
# ----------------------------------------------------------------------------
def _res_block_kernel(x_ref,
                      wa_ref, sa_ref, ba_ref,
                      wb_ref, sb_ref, bb_ref,
                      w1_ref, b1_ref, w2_ref, b2_ref,
                      wc_ref, sc_ref, bc_ref,
                      wp_ref, sp_ref, bp_ref,
                      o_ref, apad_ref,
                      *, stride, proj_block, use_se):
    # x_ref: [Nb, P, Ho, Wo, C_in] -- space-to-depth phases, P = stride**2,
    #        phase q = pr*stride + pc holds x[:, pr::stride, pc::stride, :]
    Nb, P, Ho, Wo, Cin = x_ref.shape
    Cb = wb_ref.shape[1]
    Cout = wc_ref.shape[1]
    M = Nb * P * Ho * Wo            # == Nb * H * W
    Mo = Nb * Ho * Wo
    f32, bf16 = jnp.float32, jnp.bfloat16

    # --- f.a : 1x1 conv (no bias) + BN + ReLU --- one big MXU matmul over all pixels
    xf = x_ref[...].reshape(M, Cin).astype(bf16)
    a = jnp.dot(xf, wa_ref[...], preferred_element_type=f32)       # [M, C_b]
    a = jnp.maximum(a * sa_ref[...] + ba_ref[...], 0.0)

    # --- stage `a` into a zero-padded VMEM scratch so every 3x3 tap is a contiguous slice
    apad_ref[...] = jnp.zeros(apad_ref.shape, apad_ref.dtype)
    apad_ref[:, :, 1:Ho + 1, 1:Wo + 1, :] = a.reshape(Nb, P, Ho, Wo, Cb)

    # --- f.b : 3x3 grouped conv, stride s, pad 1 (block-diag dense tap weights) + BN + ReLU
    def tap(k):
        ky, kx = k // 3, k % 3
        qr, pr = divmod(ky - 1, stride)        # phase / whole-pixel shift for rows
        qc, pc = divmod(kx - 1, stride)        # phase / whole-pixel shift for cols
        q = pr * stride + pc
        t = apad_ref[:, q, 1 + qr:1 + qr + Ho, 1 + qc:1 + qc + Wo, :]   # [Nb,Ho,Wo,Cb]
        return jnp.dot(t.reshape(Mo, Cb).astype(bf16), wb_ref[k],
                       preferred_element_type=f32)

    bacc = tap(0)                               # init from first tap (no zeros+add)
    for k in range(1, 9):
        bacc = bacc + tap(k)
    b = jnp.maximum(bacc * sb_ref[...] + bb_ref[...], 0.0)          # [Mo, C_b]

    # --- f.se : squeeze-and-excitation (per sample) ---
    if use_se:
        b3 = b.reshape(Nb, Ho * Wo, Cb)
        m = jnp.mean(b3, axis=1)                                    # [Nb, C_b]
        s = jnp.dot(m, w1_ref[...], preferred_element_type=f32) + b1_ref[...]
        s = jnp.maximum(s, 0.0)
        s = jnp.dot(s, w2_ref[...], preferred_element_type=f32) + b2_ref[...]
        s = jax.nn.sigmoid(s)                                       # [Nb, C_b]
        b = (b3 * s[:, None, :]).reshape(Mo, Cb)

    # --- f.c : 1x1 conv (no bias) + BN ---
    c = jnp.dot(b.astype(bf16), wc_ref[...], preferred_element_type=f32)
    c = c * sc_ref[...] + bc_ref[...]                               # [Mo, C_out]

    # --- skip path: phase (0,0) of the split == x[:, ::s, ::s, :] ---
    x0 = x_ref[:, 0].reshape(Mo, Cin)
    if proj_block:
        skip = jnp.dot(x0.astype(bf16), wp_ref[...], preferred_element_type=f32)
        skip = skip * sp_ref[...] + bp_ref[...]
    else:
        skip = x0                       # stride==1 and C_in==C_out (asserted in wrapper)

    o_ref[...] = jnp.maximum(skip + c, 0.0).reshape(Nb, Ho, Wo, Cout)


# ----------------------------------------------------------------------------
# Host-side wrapper
# ----------------------------------------------------------------------------
def res_bottleneck_block(x_nchw, p, *, stride, proj_block=True, use_se=True, block_n=None):
    N, C_in, H, W = x_nchw.shape
    C_b = p['wb'].shape[1]
    C_out = p['wc'].shape[1]
    assert H % stride == 0 and W % stride == 0, "spatial dims must be divisible by stride"
    Ho, Wo = H // stride, W // stride
    if not proj_block:
        assert stride == 1 and C_in == C_out, "identity skip requires stride==1 and w_in==w_out"
    if block_n is None:
        block_n = N if N <= 8 else 8
    assert N % block_n == 0, "batch must be divisible by block_n"
    P = stride * stride

    # NCHW -> NHWC -> space-to-depth phases [N, P, Ho, Wo, C_in]  (pure host-side indexing)
    x_nhwc = jnp.transpose(x_nchw, (0, 2, 3, 1))
    x_s2d = (x_nhwc.reshape(N, Ho, stride, Wo, stride, C_in)
             .transpose(0, 2, 4, 1, 3, 5)
             .reshape(N, P, Ho, Wo, C_in))

    weight_args = (p['wa'], p['sa'], p['ba'],
                   p['wb'], p['sb'], p['bb'],
                   p['w1'], p['b1'], p['w2'], p['b2'],
                   p['wc'], p['sc'], p['bc'],
                   p['wp'], p['sp'], p['bp'])

    def const_spec(a):
        return pl.BlockSpec(a.shape, lambda n, nd=a.ndim: (0,) * nd)

    in_specs = ([pl.BlockSpec((block_n, P, Ho, Wo, C_in), lambda n: (n, 0, 0, 0, 0))]
                + [const_spec(a) for a in weight_args])
    out_spec = pl.BlockSpec((block_n, Ho, Wo, C_out), lambda n: (n, 0, 0, 0))

    kernel = functools.partial(_res_block_kernel, stride=stride,
                               proj_block=proj_block, use_se=use_se)
    out = pl.pallas_call(
        kernel,
        out_shape=jax.ShapeDtypeStruct((N, Ho, Wo, C_out), jnp.float32),
        grid_spec=pltpu.PrefetchScalarGridSpec(
            num_scalar_prefetch=0,
            grid=(N // block_n,),
            in_specs=in_specs,
            out_specs=out_spec,
            scratch_shapes=[pltpu.VMEM((block_n, P, Ho + 2, Wo + 2, C_b), jnp.float32)]),
        compiler_params=pltpu.CompilerParams(
            dimension_semantics=("parallel",),          # batch blocks are independent
            vmem_limit_bytes=32 * 1024 * 1024),
    )(x_s2d, *weight_args)

    return jnp.transpose(out, (0, 3, 1, 2))             # NHWC -> NCHW


# ----------------------------------------------------------------------------
# Parameter construction (PyTorch-shaped raw weights + kernel-ready transforms)
# ----------------------------------------------------------------------------
def init_params(key, w_in, w_out, bm, gw, se_r):
    w_b = int(round(w_out * bm))
    assert w_b % gw == 0, "w_b must be divisible by the group width gw"
    num_gs = w_b // gw
    gs = w_b // num_gs                      # channels per group
    w_se = int(round(w_in * se_r)) if se_r else 1

    keys = jax.random.split(key, 12)

    def wrand(k, shape, scale=0.1):
        return jax.random.normal(k, shape, jnp.float32) * scale

    # PyTorch-shaped weights (OIHW)
    wa_t = wrand(keys[0], (w_b, w_in, 1, 1))
    wb_t = wrand(keys[1], (w_b, gs, 3, 3))
    wc_t = wrand(keys[2], (w_out, w_b, 1, 1))
    wp_t = wrand(keys[3], (w_out, w_in, 1, 1))
    w1_t = wrand(keys[4], (w_se, w_b, 1, 1))
    b1_t = wrand(keys[5], (w_se,))
    w2_t = wrand(keys[6], (w_b, w_se, 1, 1))
    b2_t = wrand(keys[7], (w_b,))

    def bn_stats(k, c):
        k1, k2, k3, k4 = jax.random.split(k, 4)
        return dict(gamma=jax.random.normal(k1, (c,), jnp.float32) * 0.1 + 1.0,
                    beta=jax.random.normal(k2, (c,), jnp.float32) * 0.1,
                    mean=jax.random.normal(k3, (c,), jnp.float32) * 0.1,
                    var=jax.random.uniform(k4, (c,), jnp.float32, minval=0.5, maxval=1.5))

    bn_a, bn_b = bn_stats(keys[8], w_b), bn_stats(keys[9], w_b)
    bn_c, bn_p = bn_stats(keys[10], w_out), bn_stats(keys[11], w_out)
    eps = 1e-5

    def fold(s):
        sc = s['gamma'] / jnp.sqrt(s['var'] + eps)
        return sc.reshape(1, -1), (s['beta'] - s['mean'] * sc).reshape(1, -1)

    sa, ba = fold(bn_a)
    sb, bb = fold(bn_b)
    scc, bc = fold(bn_c)
    sp, bp = fold(bn_p)

    # dense block-diagonal grouped-conv weight: one [C_b_in, C_b_out] matrix per 3x3 tap
    wb_np = np.asarray(wb_t)
    wb_dense = np.zeros((9, w_b, w_b), np.float32)
    for cout in range(w_b):
        g = cout // gs
        for ci in range(gs):
            wb_dense[:, g * gs + ci, cout] = wb_np[cout, ci].reshape(9)

    bf16 = jnp.bfloat16
    kernel_params = dict(
        wa=wa_t[:, :, 0, 0].T.astype(bf16), sa=sa, ba=ba,
        wb=jnp.asarray(wb_dense).astype(bf16), sb=sb, bb=bb,
        w1=w1_t[:, :, 0, 0].T, b1=b1_t.reshape(1, -1),
        w2=w2_t[:, :, 0, 0].T, b2=b2_t.reshape(1, -1),
        wc=wc_t[:, :, 0, 0].T.astype(bf16), sc=scc, bc=bc,
        wp=wp_t[:, :, 0, 0].T.astype(bf16), sp=sp, bp=bp)
    raw = dict(wa_t=wa_t, wb_t=wb_t, wc_t=wc_t, wp_t=wp_t,
               w1_t=w1_t, b1_t=b1_t, w2_t=w2_t, b2_t=b2_t,
               bn_a=bn_a, bn_b=bn_b, bn_c=bn_c, bn_p=bn_p)
    return kernel_params, raw, num_gs


# ----------------------------------------------------------------------------
# Pure-JAX reference (mirrors the PyTorch module, eval-mode BN)
# ----------------------------------------------------------------------------
def reference(x, raw, *, stride, num_gs, proj_block=True, use_se=True, eps=1e-5):
    def bn(y, s):
        sc = s['gamma'] / jnp.sqrt(s['var'] + eps)
        return (y - s['mean'][None, :, None, None]) * sc[None, :, None, None] \
            + s['beta'][None, :, None, None]

    def conv(y, w, stride=1, padding=0, groups=1):
        return jax.lax.conv_general_dilated(
            y, w, window_strides=(stride, stride),
            padding=[(padding, padding), (padding, padding)],
            feature_group_count=groups,
            dimension_numbers=('NCHW', 'OIHW', 'NCHW'))

    a = jax.nn.relu(bn(conv(x, raw['wa_t']), raw['bn_a']))
    b = jax.nn.relu(bn(conv(a, raw['wb_t'], stride=stride, padding=1, groups=num_gs),
                       raw['bn_b']))
    if use_se:
        m = jnp.mean(b, axis=(2, 3), keepdims=True)
        s = jax.nn.relu(conv(m, raw['w1_t']) + raw['b1_t'][None, :, None, None])
        s = jax.nn.sigmoid(conv(s, raw['w2_t']) + raw['b2_t'][None, :, None, None])
        b = b * s
    c = bn(conv(b, raw['wc_t']), raw['bn_c'])
    skip = bn(conv(x, raw['wp_t'], stride=stride), raw['bn_p']) if proj_block else x
    return jax.nn.relu(skip + c)


if __name__ == "__main__":
    key = jax.random.PRNGKey(0)
    kx, kp1, kp2 = jax.random.split(key, 3)

    # AnyStage-like config: block 1 = ResBottleneckBlock(16->32, stride 2, proj, SE),
    #                       block 2 = ResBottleneckBlock(32->32, stride 1, identity, SE)
    w_in, w_out, bm, gw, se_r = 16, 32, 1.0, 8, 0.25
    N, H, W = 4, 16, 16

    x = jax.random.normal(kx, (N, w_in, H, W), jnp.float32)        # NCHW, like PyTorch

    p1, raw1, ngs1 = init_params(kp1, w_in, w_out, bm, gw, se_r)
    p2, raw2, ngs2 = init_params(kp2, w_out, w_out, bm, gw, se_r)

    y1 = res_bottleneck_block(x, p1, stride=2, proj_block=True, use_se=True, block_n=2)
    y2 = res_bottleneck_block(y1, p2, stride=1, proj_block=False, use_se=True, block_n=2)
    y2 = jax.block_until_ready(y2)

    r1 = reference(x, raw1, stride=2, num_gs=ngs1, proj_block=True, use_se=True)
    r2 = reference(r1, raw2, stride=1, num_gs=ngs2, proj_block=False, use_se=True)

    np.testing.assert_allclose(np.asarray(y1), np.asarray(r1), rtol=5e-2, atol=5e-2)
    np.testing.assert_allclose(np.asarray(y2), np.asarray(r2), rtol=5e-2, atol=5e-2)
    print("KERNEL_OK")
</pallas_src>

<mosaic_0001>
module attributes {stable_mosaic.version = 11 : i64} {
  func.func @_res_block_kernel(%arg0: i32, %arg1: memref<2x4x8x8x16xf32, #tpu.memory_space<vmem>>, %arg2: memref<16x32xbf16, #tpu.memory_space<vmem>>, %arg3: memref<1x32xf32, #tpu.memory_space<vmem>>, %arg4: memref<1x32xf32, #tpu.memory_space<vmem>>, %arg5: memref<9x32x32xbf16, #tpu.memory_space<vmem>>, %arg6: memref<1x32xf32, #tpu.memory_space<vmem>>, %arg7: memref<1x32xf32, #tpu.memory_space<vmem>>, %arg8: memref<32x4xf32, #tpu.memory_space<vmem>>, %arg9: memref<1x4xf32, #tpu.memory_space<vmem>>, %arg10: memref<4x32xf32, #tpu.memory_space<vmem>>, %arg11: memref<1x32xf32, #tpu.memory_space<vmem>>, %arg12: memref<32x32xbf16, #tpu.memory_space<vmem>>, %arg13: memref<1x32xf32, #tpu.memory_space<vmem>>, %arg14: memref<1x32xf32, #tpu.memory_space<vmem>>, %arg15: memref<16x32xbf16, #tpu.memory_space<vmem>>, %arg16: memref<1x32xf32, #tpu.memory_space<vmem>>, %arg17: memref<1x32xf32, #tpu.memory_space<vmem>>, %arg18: memref<2x8x8x32xf32, #tpu.memory_space<vmem>>, %arg19: memref<2x4x10x10x32xf32, #tpu.memory_space<vmem>>) attributes {dimension_semantics = [#tpu.dimension_semantics<parallel>], iteration_bounds = array<i64: 2>, scalar_prefetch = 0 : i64, scratch_operands = 1 : i64, tpu.core_type = #tpu.core_type<tc>, window_params = [{transform_indices = @transform_0, window_bounds = array<i64: 2, 4, 8, 8, 16>}, {pipeline_mode = #tpu.pipeline_mode<synchronous>, transform_indices = @transform_1, window_bounds = array<i64: 16, 32>}, {pipeline_mode = #tpu.pipeline_mode<synchronous>, transform_indices = @transform_2, window_bounds = array<i64: 1, 32>}, {pipeline_mode = #tpu.pipeline_mode<synchronous>, transform_indices = @transform_3, window_bounds = array<i64: 1, 32>}, {pipeline_mode = #tpu.pipeline_mode<synchronous>, transform_indices = @transform_4, window_bounds = array<i64: 9, 32, 32>}, {pipeline_mode = #tpu.pipeline_mode<synchronous>, transform_indices = @transform_5, window_bounds = array<i64: 1, 32>}, {pipeline_mode = #tpu.pipeline_mode<synchronous>, transform_indices = @transform_6, window_bounds = array<i64: 1, 32>}, {pipeline_mode = #tpu.pipeline_mode<synchronous>, transform_indices = @transform_7, window_bounds = array<i64: 32, 4>}, {pipeline_mode = #tpu.pipeline_mode<synchronous>, transform_indices = @transform_8, window_bounds = array<i64: 1, 4>}, {pipeline_mode = #tpu.pipeline_mode<synchronous>, transform_indices = @transform_9, window_bounds = array<i64: 4, 32>}, {pipeline_mode = #tpu.pipeline_mode<synchronous>, transform_indices = @transform_10, window_bounds = array<i64: 1, 32>}, {pipeline_mode = #tpu.pipeline_mode<synchronous>, transform_indices = @transform_11, window_bounds = array<i64: 32, 32>}, {pipeline_mode = #tpu.pipeline_mode<synchronous>, transform_indices = @transform_12, window_bounds = array<i64: 1, 32>}, {pipeline_mode = #tpu.pipeline_mode<synchronous>, transform_indices = @transform_13, window_bounds = array<i64: 1, 32>}, {pipeline_mode = #tpu.pipeline_mode<synchronous>, transform_indices = @transform_14, window_bounds = array<i64: 16, 32>}, {pipeline_mode = #tpu.pipeline_mode<synchronous>, transform_indices = @transform_15, window_bounds = array<i64: 1, 32>}, {pipeline_mode = #tpu.pipeline_mode<synchronous>, transform_indices = @transform_16, window_bounds = array<i64: 1, 32>}, {transform_indices = @transform_17, window_bounds = array<i64: 2, 8, 8, 32>}]} {
    %c0 = arith.constant 0 : index
    %c0_0 = arith.constant 0 : index
    %c0_1 = arith.constant 0 : index
    %c0_2 = arith.constant 0 : index
    %c0_3 = arith.constant 0 : index
    %0 = vector.load %arg1[%c0, %c0_0, %c0_1, %c0_2, %c0_3] : memref<2x4x8x8x16xf32, #tpu.memory_space<vmem>>, vector<2x4x8x8x16xf32>
    %1 = vector.shape_cast %0 : vector<2x4x8x8x16xf32> to vector<512x16xf32>
    %2 = arith.truncf %1 : vector<512x16xf32> to vector<512x16xbf16>
    %c0_4 = arith.constant 0 : index
    %c0_5 = arith.constant 0 : index
    %3 = vector.load %arg2[%c0_4, %c0_5] : memref<16x32xbf16, #tpu.memory_space<vmem>>, vector<16x32xbf16>
    %cst = arith.constant dense<0.000000e+00> : vector<512x32xf32>
    %4 = tpu.matmul %2, %3, %cst {dimension_numbers = #tpu.dot_dimension_numbers<[1], [0], [0], [1], [0, 0, 1, 1], [], []>} : vector<512x16xbf16>, vector<16x32xbf16>, vector<512x32xf32> -> vector<512x32xf32>
    %c0_6 = arith.constant 0 : index
    %c0_7 = arith.constant 0 : index
    %5 = vector.load %arg3[%c0_6, %c0_7] : memref<1x32xf32, #tpu.memory_space<vmem>>, vector<1x32xf32>
    %6 = vector.broadcast %5 : vector<1x32xf32> to vector<512x32xf32>
    %7 = arith.mulf %4, %6 : vector<512x32xf32>
    %c0_8 = arith.constant 0 : index
    %c0_9 = arith.constant 0 : index
    %8 = vector.load %arg4[%c0_8, %c0_9] : memref<1x32xf32, #tpu.memory_space<vmem>>, vector<1x32xf32>
    %9 = vector.broadcast %8 : vector<1x32xf32> to vector<512x32xf32>
    %10 = arith.addf %7, %9 : vector<512x32xf32>
    %cst_10 = arith.constant 0.000000e+00 : f32
    %11 = vector.broadcast %cst_10 : f32 to vector<512x32xf32>
    %12 = arith.maximumf %10, %11 : vector<512x32xf32>
    %cst_11 = arith.constant 0.000000e+00 : f32
    %13 = vector.broadcast %cst_11 : f32 to vector<2x4x10x10x32xf32>
    %c0_12 = arith.constant 0 : index
    %c0_13 = arith.constant 0 : index
    %c0_14 = arith.constant 0 : index
    %c0_15 = arith.constant 0 : index
    %c0_16 = arith.constant 0 : index
    %14 = vector.load %arg19[%c0_12, %c0_13, %c0_14, %c0_15, %c0_16] : memref<2x4x10x10x32xf32, #tpu.memory_space<vmem>>, vector<2x4x10x10x32xf32>
    tpu.vector_store %arg19[%c0_12, %c0_13, %c0_14, %c0_15, %c0_16], %13 {strides = array<i32>} : memref<2x4x10x10x32xf32, #tpu.memory_space<vmem>>, vector<2x4x10x10x32xf32>,
    %15 = vector.shape_cast %12 : vector<512x32xf32> to vector<2x4x8x8x32xf32>
    %c0_17 = arith.constant 0 : index
    %c0_18 = arith.constant 0 : index
    %c1 = arith.constant 1 : index
    %c1_19 = arith.constant 1 : index
    %c0_20 = arith.constant 0 : index
    %16 = vector.load %arg19[%c0_17, %c0_18, %c1, %c1_19, %c0_20] : memref<2x4x10x10x32xf32, #tpu.memory_space<vmem>>, vector<2x4x8x8x32xf32>
    tpu.vector_store %arg19[%c0_17, %c0_18, %c1, %c1_19, %c0_20], %15 {strides = array<i32>} : memref<2x4x10x10x32xf32, #tpu.memory_space<vmem>>, vector<2x4x8x8x32xf32>,
    %c0_21 = arith.constant 0 : index
    %c3 = arith.constant 3 : index
    %c0_22 = arith.constant 0 : index
    %c0_23 = arith.constant 0 : index
    %c0_24 = arith.constant 0 : index
    %17 = vector.load %arg19[%c0_21, %c3, %c0_22, %c0_23, %c0_24] : memref<2x4x10x10x32xf32, #tpu.memory_space<vmem>>, vector<2x1x8x8x32xf32>
    %18 = vector.shape_cast %17 : vector<2x1x8x8x32xf32> to vector<2x8x8x32xf32>
    %19 = vector.shape_cast %18 : vector<2x8x8x32xf32> to vector<128x32xf32>
    %20 = arith.truncf %19 : vector<128x32xf32> to vector<128x32xbf16>
    %c0_25 = arith.constant 0 : index
    %c0_26 = arith.constant 0 : index
    %c0_27 = arith.constant 0 : index
    %21 = vector.load %arg5[%c0_25, %c0_26, %c0_27] : memref<9x32x32xbf16, #tpu.memory_space<vmem>>, vector<1x32x32xbf16>
    %22 = vector.shape_cast %21 : vector<1x32x32xbf16> to vector<32x32xbf16>
    %cst_28 = arith.constant dense<0.000000e+00> : vector<128x32xf32>
    %23 = tpu.matmul %20, %22, %cst_28 {dimension_numbers = #tpu.dot_dimension_numbers<[1], [0], [0], [1], [0, 0, 1, 1], [], []>} : vector<128x32xbf16>, vector<32x32xbf16>, vector<128x32xf32> -> vector<128x32xf32>
    %c0_29 = arith.constant 0 : index
    %c2 = arith.constant 2 : index
    %c0_30 = arith.constant 0 : index
    %c1_31 = arith.constant 1 : index
    %c0_32 = arith.constant 0 : index
    %24 = vector.load %arg19[%c0_29, %c2, %c0_30, %c1_31, %c0_32] : memref<2x4x10x10x32xf32, #tpu.memory_space<vmem>>, vector<2x1x8x8x32xf32>
    %25 = vector.shape_cast %24 : vector<2x1x8x8x32xf32> to vector<2x8x8x32xf32>
    %26 = vector.shape_cast %25 : vector<2x8x8x32xf32> to vector<128x32xf32>
    %27 = arith.truncf %26 : vector<128x32xf32> to vector<128x32xbf16>
    %c1_33 = arith.constant 1 : index
    %c0_34 = arith.constant 0 : index
    %c0_35 = arith.constant 0 : index
    %28 = vector.load %arg5[%c1_33, %c0_34, %c0_35] : memref<9x32x32xbf16, #tpu.memory_space<vmem>>, vector<1x32x32xbf16>
    %29 = vector.shape_cast %28 : vector<1x32x32xbf16> to vector<32x32xbf16>
    %cst_36 = arith.constant dense<0.000000e+00> : vector<128x32xf32>
    %30 = tpu.matmul %27, %29, %cst_36 {dimension_numbers = #tpu.dot_dimension_numbers<[1], [0], [0], [1], [0, 0, 1, 1], [], []>} : vector<128x32xbf16>, vector<32x32xbf16>, vector<128x32xf32> -> vector<128x32xf32>
    %31 = arith.addf %23, %30 : vector<128x32xf32>
    %c0_37 = arith.constant 0 : index
    %c3_38 = arith.constant 3 : index
    %c0_39 = arith.constant 0 : index
    %c1_40 = arith.constant 1 : index
    %c0_41 = arith.constant 0 : index
    %32 = vector.load %arg19[%c0_37, %c3_38, %c0_39, %c1_40, %c0_41] : memref<2x4x10x10x32xf32, #tpu.memory_space<vmem>>, vector<2x1x8x8x32xf32>
    %33 = vector.shape_cast %32 : vector<2x1x8x8x32xf32> to vector<2x8x8x32xf32>
    %34 = vector.shape_cast %33 : vector<2x8x8x32xf32> to vector<128x32xf32>
    %35 = arith.truncf %34 : vector<128x32xf32> to vector<128x32xbf16>
    %c2_42 = arith.constant 2 : index
    %c0_43 = arith.constant 0 : index
    %c0_44 = arith.constant 0 : index
    %36 = vector.load %arg5[%c2_42, %c0_43, %c0_44] : memref<9x32x32xbf16, #tpu.memory_space<vmem>>, vector<1x32x32xbf16>
    %37 = vector.shape_cast %36 : vector<1x32x32xbf16> to vector<32x32xbf16>
    %cst_45 = arith.constant dense<0.000000e+00> : vector<128x32xf32>
    %38 = tpu.matmul %35, %37, %cst_45 {dimension_numbers = #tpu.dot_dimension_numbers<[1], [0], [0], [1], [0, 0, 1, 1], [], []>} : vector<128x32xbf16>, vector<32x32xbf16>, vector<128x32xf32> -> vector<128x32xf32>
    %39 = arith.addf %31, %38 : vector<128x32xf32>
    %c0_46 = arith.constant 0 : index
    %c1_47 = arith.constant 1 : index
    %c1_48 = arith.constant 1 : index
    %c0_49 = arith.constant 0 : index
    %c0_50 = arith.constant 0 : index
    %40 = vector.load %arg19[%c0_46, %c1_47, %c1_48, %c0_49, %c0_50] : memref<2x4x10x10x32xf32, #tpu.memory_space<vmem>>, vector<2x1x8x8x32xf32>
    %41 = vector.shape_cast %40 : vector<2x1x8x8x32xf32> to vector<2x8x8x32xf32>
    %42 = vector.shape_cast %41 : vector<2x8x8x32xf32> to vector<128x32xf32>
    %43 = arith.truncf %42 : vector<128x32xf32> to vector<128x32xbf16>
    %c3_51 = arith.constant 3 : index
    %c0_52 = arith.constant 0 : index
    %c0_53 = arith.constant 0 : index
    %44 = vector.load %arg5[%c3_51, %c0_52, %c0_53] : memref<9x32x32xbf16, #tpu.memory_space<vmem>>, vector<1x32x32xbf16>
    %45 = vector.shape_cast %44 : vector<1x32x32xbf16> to vector<32x32xbf16>
    %cst_54 = arith.constant dense<0.000000e+00> : vector<128x32xf32>
    %46 = tpu.matmul %43, %45, %cst_54 {dimension_numbers = #tpu.dot_dimension_numbers<[1], [0], [0], [1], [0, 0, 1, 1], [], []>} : vector<128x32xbf16>, vector<32x32xbf16>, vector<128x32xf32> -> vector<128x32xf32>
    %47 = arith.addf %39, %46 : vector<128x32xf32>
    %c0_55 = arith.constant 0 : index
    %c0_56 = arith.constant 0 : index
    %c1_57 = arith.constant 1 : index
    %c1_58 = arith.constant 1 : index
    %c0_59 = arith.constant 0 : index
    %48 = vector.load %arg19[%c0_55, %c0_56, %c1_57, %c1_58, %c0_59] : memref<2x4x10x10x32xf32, #tpu.memory_space<vmem>>, vector<2x1x8x8x32xf32>
    %49 = vector.shape_cast %48 : vector<2x1x8x8x32xf32> to vector<2x8x8x32xf32>
    %50 = vector.shape_cast %49 : vector<2x8x8x32xf32> to vector<128x32xf32>
    %51 = arith.truncf %50 : vector<128x32xf32> to vector<128x32xbf16>
    %c4 = arith.constant 4 : index
    %c0_60 = arith.constant 0 : index
    %c0_61 = arith.constant 0 : index
    %52 = vector.load %arg5[%c4, %c0_60, %c0_61] : memref<9x32x32xbf16, #tpu.memory_space<vmem>>, vector<1x32x32xbf16>
    %53 = vector.shape_cast %52 : vector<1x32x32xbf16> to vector<32x32xbf16>
    %cst_62 = arith.constant dense<0.000000e+00> : vector<128x32xf32>
    %54 = tpu.matmul %51, %53, %cst_62 {dimension_numbers = #tpu.dot_dimension_numbers<[1], [0], [0], [1], [0, 0, 1, 1], [], []>} : vector<128x32xbf16>, vector<32x32xbf16>, vector<128x32xf32> -> vector<128x32xf32>
    %55 = arith.addf %47, %54 : vector<128x32xf32>
    %c0_63 = arith.constant 0 : index
    %c1_64 = arith.constant 1 : index
    %c1_65 = arith.constant 1 : index
    %c1_66 = arith.constant 1 : index
    %c0_67 = arith.constant 0 : index
    %56 = vector.load %arg19[%c0_63, %c1_64, %c1_65, %c1_66, %c0_67] : memref<2x4x10x10x32xf32, #tpu.memory_space<vmem>>, vector<2x1x8x8x32xf32>
    %57 = vector.shape_cast %56 : vector<2x1x8x8x32xf32> to vector<2x8x8x32xf32>
    %58 = vector.shape_cast %57 : vector<2x8x8x32xf32> to vector<128x32xf32>
    %59 = arith.truncf %58 : vector<128x32xf32> to vector<128x32xbf16>
    %c5 = arith.constant 5 : index
    %c0_68 = arith.constant 0 : index
    %c0_69 = arith.constant 0 : index
    %60 = vector.load %arg5[%c5, %c0_68, %c0_69] : memref<9x32x32xbf16, #tpu.memory_space<vmem>>, vector<1x32x32xbf16>
    %61 = vector.shape_cast %60 : vector<1x32x32xbf16> to vector<32x32xbf16>
    %cst_70 = arith.constant dense<0.000000e+00> : vector<128x32xf32>
    %62 = tpu.matmul %59, %61, %cst_70 {dimension_numbers = #tpu.dot_dimension_numbers<[1], [0], [0], [1], [0, 0, 1, 1], [], []>} : vector<128x32xbf16>, vector<32x32xbf16>, vector<128x32xf32> -> vector<128x32xf32>
    %63 = arith.addf %55, %62 : vector<128x32xf32>
    %c0_71 = arith.constant 0 : index
    %c3_72 = arith.constant 3 : index
    %c1_73 = arith.constant 1 : index
    %c0_74 = arith.constant 0 : index
    %c0_75 = arith.constant 0 : index
    %64 = vector.load %arg19[%c0_71, %c3_72, %c1_73, %c0_74, %c0_75] : memref<2x4x10x10x32xf32, #tpu.memory_space<vmem>>, vector<2x1x8x8x32xf32>
    %65 = vector.shape_cast %64 : vector<2x1x8x8x32xf32> to vector<2x8x8x32xf32>
    %66 = vector.shape_cast %65 : vector<2x8x8x32xf32> to vector<128x32xf32>
    %67 = arith.truncf %66 : vector<128x32xf32> to vector<128x32xbf16>
    %c6 = arith.constant 6 : index
    %c0_76 = arith.constant 0 : index
    %c0_77 = arith.constant 0 : index
    %68 = vector.load %arg5[%c6, %c0_76, %c0_77] : memref<9x32x32xbf16, #tpu.memory_space<vmem>>, vector<1x32x32xbf16>
    %69 = vector.shape_cast %68 : vector<1x32x32xbf16> to vector<32x32xbf16>
    %cst_78 = arith.constant dense<0.000000e+00> : vector<128x32xf32>
    %70 = tpu.matmul %67, %69, %cst_78 {dimension_numbers = #tpu.dot_dimension_numbers<[1], [0], [0], [1], [0, 0, 1, 1], [], []>} : vector<128x32xbf16>, vector<32x32xbf16>, vector<128x32xf32> -> vector<128x32xf32>
    %71 = arith.addf %63, %70 : vector<128x32xf32>
    %c0_79 = arith.constant 0 : index
    %c2_80 = arith.constant 2 : index
    %c1_81 = arith.constant 1 : index
    %c1_82 = arith.constant 1 : index
    %c0_83 = arith.constant 0 : index
    %72 = vector.load %arg19[%c0_79, %c2_80, %c1_81, %c1_82, %c0_83] : memref<2x4x10x10x32xf32, #tpu.memory_space<vmem>>, vector<2x1x8x8x32xf32>
    %73 = vector.shape_cast %72 : vector<2x1x8x8x32xf32> to vector<2x8x8x32xf32>
    %74 = vector.shape_cast %73 : vector<2x8x8x32xf32> to vector<128x32xf32>
    %75 = arith.truncf %74 : vector<128x32xf32> to vector<128x32xbf16>
    %c7 = arith.constant 7 : index
    %c0_84 = arith.constant 0 : index
    %c0_85 = arith.constant 0 : index
    %76 = vector.load %arg5[%c7, %c0_84, %c0_85] : memref<9x32x32xbf16, #tpu.memory_space<vmem>>, vector<1x32x32xbf16>
    %77 = vector.shape_cast %76 : vector<1x32x32xbf16> to vector<32x32xbf16>
    %cst_86 = arith.constant dense<0.000000e+00> : vector<128x32xf32>
    %78 = tpu.matmul %75, %77, %cst_86 {dimension_numbers = #tpu.dot_dimension_numbers<[1], [0], [0], [1], [0, 0, 1, 1], [], []>} : vector<128x32xbf16>, vector<32x32xbf16>, vector<128x32xf32> -> vector<128x32xf32>
    %79 = arith.addf %71, %78 : vector<128x32xf32>
    %c0_87 = arith.constant 0 : index
    %c3_88 = arith.constant 3 : index
    %c1_89 = arith.constant 1 : index
    %c1_90 = arith.constant 1 : index
    %c0_91 = arith.constant 0 : index
    %80 = vector.load %arg19[%c0_87, %c3_88, %c1_89, %c1_90, %c0_91] : memref<2x4x10x10x32xf32, #tpu.memory_space<vmem>>, vector<2x1x8x8x32xf32>
    %81 = vector.shape_cast %80 : vector<2x1x8x8x32xf32> to vector<2x8x8x32xf32>
    %82 = vector.shape_cast %81 : vector<2x8x8x32xf32> to vector<128x32xf32>
    %83 = arith.truncf %82 : vector<128x32xf32> to vector<128x32xbf16>
    %c8 = arith.constant 8 : index
    %c0_92 = arith.constant 0 : index
    %c0_93 = arith.constant 0 : index
    %84 = vector.load %arg5[%c8, %c0_92, %c0_93] : memref<9x32x32xbf16, #tpu.memory_space<vmem>>, vector<1x32x32xbf16>
    %85 = vector.shape_cast %84 : vector<1x32x32xbf16> to vector<32x32xbf16>
    %cst_94 = arith.constant dense<0.000000e+00> : vector<128x32xf32>
    %86 = tpu.matmul %83, %85, %cst_94 {dimension_numbers = #tpu.dot_dimension_numbers<[1], [0], [0], [1], [0, 0, 1, 1], [], []>} : vector<128x32xbf16>, vector<32x32xbf16>, vector<128x32xf32> -> vector<128x32xf32>
    %87 = arith.addf %79, %86 : vector<128x32xf32>
    %c0_95 = arith.constant 0 : index
    %c0_96 = arith.constant 0 : index
    %88 = vector.load %arg6[%c0_95, %c0_96] : memref<1x32xf32, #tpu.memory_space<vmem>>, vector<1x32xf32>
    %89 = vector.broadcast %88 : vector<1x32xf32> to vector<128x32xf32>
    %90 = arith.mulf %87, %89 : vector<128x32xf32>
    %c0_97 = arith.constant 0 : index
    %c0_98 = arith.constant 0 : index
    %91 = vector.load %arg7[%c0_97, %c0_98] : memref<1x32xf32, #tpu.memory_space<vmem>>, vector<1x32xf32>
    %92 = vector.broadcast %91 : vector<1x32xf32> to vector<128x32xf32>
    %93 = arith.addf %90, %92 : vector<128x32xf32>
    %cst_99 = arith.constant 0.000000e+00 : f32
    %94 = vector.broadcast %cst_99 : f32 to vector<128x32xf32>
    %95 = arith.maximumf %93, %94 : vector<128x32xf32>
    %96 = vector.shape_cast %95 : vector<128x32xf32> to vector<2x64x32xf32>
    %cst_100 = arith.constant dense<0.000000e+00> : vector<2x32xf32>
    %97 = vector.multi_reduction <add>, %96, %cst_100 [1] : vector<2x64x32xf32> to vector<2x32xf32>
    %cst_101 = arith.constant 6.400000e+01 : f32
    %98 = vector.broadcast %cst_101 : f32 to vector<2x32xf32>
    %99 = arith.divf %97, %98 : vector<2x32xf32>
    %c0_102 = arith.constant 0 : index
    %c0_103 = arith.constant 0 : index
    %100 = vector.load %arg8[%c0_102, %c0_103] : memref<32x4xf32, #tpu.memory_space<vmem>>, vector<32x4xf32>
    %cst_104 = arith.constant dense<0.000000e+00> : vector<2x4xf32>
    %101 = tpu.matmul %99, %100, %cst_104 {dimension_numbers = #tpu.dot_dimension_numbers<[1], [0], [0], [1], [0, 0, 1, 1], [], []>} : vector<2x32xf32>, vector<32x4xf32>, vector<2x4xf32> -> vector<2x4xf32>
    %c0_105 = arith.constant 0 : index
    %c0_106 = arith.constant 0 : index
    %102 = vector.load %arg9[%c0_105, %c0_106] : memref<1x4xf32, #tpu.memory_space<vmem>>, vector<1x4xf32>
    %103 = vector.broadcast %102 : vector<1x4xf32> to vector<2x4xf32>
    %104 = arith.addf %101, %103 : vector<2x4xf32>
    %cst_107 = arith.constant 0.000000e+00 : f32
    %105 = vector.broadcast %cst_107 : f32 to vector<2x4xf32>
    %106 = arith.maximumf %104, %105 : vector<2x4xf32>
    %c0_108 = arith.constant 0 : index
    %c0_109 = arith.constant 0 : index
    %107 = vector.load %arg10[%c0_108, %c0_109] : memref<4x32xf32, #tpu.memory_space<vmem>>, vector<4x32xf32>
    %cst_110 = arith.constant dense<0.000000e+00> : vector<2x32xf32>
    %108 = tpu.matmul %106, %107, %cst_110 {dimension_numbers = #tpu.dot_dimension_numbers<[1], [0], [0], [1], [0, 0, 1, 1], [], []>} : vector<2x4xf32>, vector<4x32xf32>, vector<2x32xf32> -> vector<2x32xf32>
    %c0_111 = arith.constant 0 : index
    %c0_112 = arith.constant 0 : index
    %109 = vector.load %arg11[%c0_111, %c0_112] : memref<1x32xf32, #tpu.memory_space<vmem>>, vector<1x32xf32>
    %110 = vector.broadcast %109 : vector<1x32xf32> to vector<2x32xf32>
    %111 = arith.addf %108, %110 : vector<2x32xf32>
    %112 = arith.negf %111 : vector<2x32xf32>
    %113 = math.exp %112 : vector<2x32xf32>
    %cst_113 = arith.constant 1.000000e+00 : f32
    %114 = vector.broadcast %cst_113 : f32 to vector<2x32xf32>
    %115 = arith.addf %114, %113 : vector<2x32xf32>
    %116 = arith.divf %114, %115 : vector<2x32xf32>
    %117 = vector.shape_cast %116 : vector<2x32xf32> to vector<2x1x32xf32>
    %118 = vector.broadcast %117 : vector<2x1x32xf32> to vector<2x64x32xf32>
    %119 = arith.mulf %96, %118 : vector<2x64x32xf32>
    %120 = vector.shape_cast %119 : vector<2x64x32xf32> to vector<128x32xf32>
    %121 = arith.truncf %120 : vector<128x32xf32> to vector<128x32xbf16>
    %c0_114 = arith.constant 0 : index
    %c0_115 = arith.constant 0 : index
    %122 = vector.load %arg12[%c0_114, %c0_115] : memref<32x32xbf16, #tpu.memory_space<vmem>>, vector<32x32xbf16>
    %cst_116 = arith.constant dense<0.000000e+00> : vector<128x32xf32>
    %123 = tpu.matmul %121, %122, %cst_116 {dimension_numbers = #tpu.dot_dimension_numbers<[1], [0], [0], [1], [0, 0, 1, 1], [], []>} : vector<128x32xbf16>, vector<32x32xbf16>, vector<128x32xf32> -> vector<128x32xf32>
    %c0_117 = arith.constant 0 : index
    %c0_118 = arith.constant 0 : index
    %124 = vector.load %arg13[%c0_117, %c0_118] : memref<1x32xf32, #tpu.memory_space<vmem>>, vector<1x32xf32>
    %125 = vector.broadcast %124 : vector<1x32xf32> to vector<128x32xf32>
    %126 = arith.mulf %123, %125 : vector<128x32xf32>
    %c0_119 = arith.constant 0 : index
    %c0_120 = arith.constant 0 : index
    %127 = vector.load %arg14[%c0_119, %c0_120] : memref<1x32xf32, #tpu.memory_space<vmem>>, vector<1x32xf32>
    %128 = vector.broadcast %127 : vector<1x32xf32> to vector<128x32xf32>
    %129 = arith.addf %126, %128 : vector<128x32xf32>
    %c0_121 = arith.constant 0 : index
    %c0_122 = arith.constant 0 : index
    %c0_123 = arith.constant 0 : index
    %c0_124 = arith.constant 0 : index
    %c0_125 = arith.constant 0 : index
    %130 = vector.load %arg1[%c0_121, %c0_122, %c0_123, %c0_124, %c0_125] : memref<2x4x8x8x16xf32, #tpu.memory_space<vmem>>, vector<2x1x8x8x16xf32>
    %131 = vector.shape_cast %130 : vector<2x1x8x8x16xf32> to vector<2x8x8x16xf32>
    %132 = vector.shape_cast %131 : vector<2x8x8x16xf32> to vector<128x16xf32>
    %133 = arith.truncf %132 : vector<128x16xf32> to vector<128x16xbf16>
    %c0_126 = arith.constant 0 : index
    %c0_127 = arith.constant 0 : index
    %134 = vector.load %arg15[%c0_126, %c0_127] : memref<16x32xbf16, #tpu.memory_space<vmem>>, vector<16x32xbf16>
    %cst_128 = arith.constant dense<0.000000e+00> : vector<128x32xf32>
    %135 = tpu.matmul %133, %134, %cst_128 {dimension_numbers = #tpu.dot_dimension_numbers<[1], [0], [0], [1], [0, 0, 1, 1], [], []>} : vector<128x16xbf16>, vector<16x32xbf16>, vector<128x32xf32> -> vector<128x32xf32>
    %c0_129 = arith.constant 0 : index
    %c0_130 = arith.constant 0 : index
    %136 = vector.load %arg16[%c0_129, %c0_130] : memref<1x32xf32, #tpu.memory_space<vmem>>, vector<1x32xf32>
    %137 = vector.broadcast %136 : vector<1x32xf32> to vector<128x32xf32>
    %138 = arith.mulf %135, %137 : vector<128x32xf32>
    %c0_131 = arith.constant 0 : index
    %c0_132 = arith.constant 0 : index
    %139 = vector.load %arg17[%c0_131, %c0_132] : memref<1x32xf32, #tpu.memory_space<vmem>>, vector<1x32xf32>
    %140 = vector.broadcast %139 : vector<1x32xf32> to vector<128x32xf32>
    %141 = arith.addf %138, %140 : vector<128x32xf32>
    %142 = arith.addf %141, %129 : vector<128x32xf32>
    %cst_133 = arith.constant 0.000000e+00 : f32
    %143 = vector.broadcast %cst_133 : f32 to vector<128x32xf32>
    %144 = arith.maximumf %142, %143 : vector<128x32xf32>
    %145 = vector.shape_cast %144 : vector<128x32xf32> to vector<2x8x8x32xf32>
    %c0_134 = arith.constant 0 : index
    %c0_135 = arith.constant 0 : index
    %c0_136 = arith.constant 0 : index
    %c0_137 = arith.constant 0 : index
    %146 = vector.load %arg18[%c0_134, %c0_135, %c0_136, %c0_137] : memref<2x8x8x32xf32, #tpu.memory_space<vmem>>, vector<2x8x8x32xf32>
    tpu.vector_store %arg18[%c0_134, %c0_135, %c0_136, %c0_137], %145 {strides = array<i32>} : memref<2x8x8x32xf32, #tpu.memory_space<vmem>>, vector<2x8x8x32xf32>,
    return
  }
  func.func @transform_0(%arg0: i32) -> (i32, i32, i32, i32, i32) {
    %c0_i32 = arith.constant 0 : i32
    %c0_i32_0 = arith.constant 0 : i32
    %c0_i32_1 = arith.constant 0 : i32
    %c0_i32_2 = arith.constant 0 : i32
    %c0_i32_3 = arith.constant 0 : i32
    return %arg0, %c0_i32, %c0_i32_0, %c0_i32_1, %c0_i32_2 : i32, i32, i32, i32, i32
  }
  func.func @transform_1(%arg0: i32) -> (i32, i32) {
    %c0_i32 = arith.constant 0 : i32
    %c0_i32_0 = arith.constant 0 : i32
    %c0_i32_1 = arith.constant 0 : i32
    return %c0_i32, %c0_i32_0 : i32, i32
  }
  func.func @transform_2(%arg0: i32) -> (i32, i32) {
    %c0_i32 = arith.constant 0 : i32
    %c0_i32_0 = arith.constant 0 : i32
    %c0_i32_1 = arith.constant 0 : i32
    return %c0_i32, %c0_i32_0 : i32, i32
  }
  func.func @transform_3(%arg0: i32) -> (i32, i32) {
    %c0_i32 = arith.constant 0 : i32
    %c0_i32_0 = arith.constant 0 : i32
    %c0_i32_1 = arith.constant 0 : i32
    return %c0_i32, %c0_i32_0 : i32, i32
  }
  func.func @transform_4(%arg0: i32) -> (i32, i32, i32) {
    %c0_i32 = arith.constant 0 : i32
    %c0_i32_0 = arith.constant 0 : i32
    %c0_i32_1 = arith.constant 0 : i32
    %c0_i32_2 = arith.constant 0 : i32
    return %c0_i32, %c0_i32_0, %c0_i32_1 : i32, i32, i32
  }
  func.func @transform_5(%arg0: i32) -> (i32, i32) {
    %c0_i32 = arith.constant 0 : i32
    %c0_i32_0 = arith.constant 0 : i32
    %c0_i32_1 = arith.constant 0 : i32
    return %c0_i32, %c0_i32_0 : i32, i32
  }
  func.func @transform_6(%arg0: i32) -> (i32, i32) {
    %c0_i32 = arith.constant 0 : i32
    %c0_i32_0 = arith.constant 0 : i32
    %c0_i32_1 = arith.constant 0 : i32
    return %c0_i32, %c0_i32_0 : i32, i32
  }
  func.func @transform_7(%arg0: i32) -> (i32, i32) {
    %c0_i32 = arith.constant 0 : i32
    %c0_i32_0 = arith.constant 0 : i32
    %c0_i32_1 = arith.constant 0 : i32
    return %c0_i32, %c0_i32_0 : i32, i32
  }
  func.func @transform_8(%arg0: i32) -> (i32, i32) {
    %c0_i32 = arith.constant 0 : i32
    %c0_i32_0 = arith.constant 0 : i32
    %c0_i32_1 = arith.constant 0 : i32
    return %c0_i32, %c0_i32_0 : i32, i32
  }
  func.func @transform_9(%arg0: i32) -> (i32, i32) {
    %c0_i32 = arith.constant 0 : i32
    %c0_i32_0 = arith.constant 0 : i32
    %c0_i32_1 = arith.constant 0 : i32
    return %c0_i32, %c0_i32_0 : i32, i32
  }
  func.func @transform_10(%arg0: i32) -> (i32, i32) {
    %c0_i32 = arith.constant 0 : i32
    %c0_i32_0 = arith.constant 0 : i32
    %c0_i32_1 = arith.constant 0 : i32
    return %c0_i32, %c0_i32_0 : i32, i32
  }
  func.func @transform_11(%arg0: i32) -> (i32, i32) {
    %c0_i32 = arith.constant 0 : i32
    %c0_i32_0 = arith.constant 0 : i32
    %c0_i32_1 = arith.constant 0 : i32
    return %c0_i32, %c0_i32_0 : i32, i32
  }
  func.func @transform_12(%arg0: i32) -> (i32, i32) {
    %c0_i32 = arith.constant 0 : i32
    %c0_i32_0 = arith.constant 0 : i32
    %c0_i32_1 = arith.constant 0 : i32
    return %c0_i32, %c0_i32_0 : i32, i32
  }
  func.func @transform_13(%arg0: i32) -> (i32, i32) {
    %c0_i32 = arith.constant 0 : i32
    %c0_i32_0 = arith.constant 0 : i32
    %c0_i32_1 = arith.constant 0 : i32
    return %c0_i32, %c0_i32_0 : i32, i32
  }
  func.func @transform_14(%arg0: i32) -> (i32, i32) {
    %c0_i32 = arith.constant 0 : i32
    %c0_i32_0 = arith.constant 0 : i32
    %c0_i32_1 = arith.constant 0 : i32
    return %c0_i32, %c0_i32_0 : i32, i32
  }
  func.func @transform_15(%arg0: i32) -> (i32, i32) {
    %c0_i32 = arith.constant 0 : i32
    %c0_i32_0 = arith.constant 0 : i32
    %c0_i32_1 = arith.constant 0 : i32
    return %c0_i32, %c0_i32_0 : i32, i32
  }
  func.func @transform_16(%arg0: i32) -> (i32, i32) {
    %c0_i32 = arith.constant 0 : i32
    %c0_i32_0 = arith.constant 0 : i32
    %c0_i32_1 = arith.constant 0 : i32
    return %c0_i32, %c0_i32_0 : i32, i32
  }
  func.func @transform_17(%arg0: i32) -> (i32, i32, i32, i32) {
    %c0_i32 = arith.constant 0 : i32
    %c0_i32_0 = arith.constant 0 : i32
    %c0_i32_1 = arith.constant 0 : i32
    %c0_i32_2 = arith.constant 0 : i32
    return %arg0, %c0_i32, %c0_i32_0, %c0_i32_1 : i32, i32, i32, i32
  }
}

</mosaic_0001>

<bundles_post_ra>
// kernel: tpu_custom_call.1
= control target key start
LH: loop header
LB: loop body
LE: loop exit
PB: predicated region body
PF: predicated region fallthrough
CT: control target
= control target key end

     0   :  { %s6554_s0 = inlined_call_operand.hbm [shape: f32[4,4,8,8,16], index: 0, kind: input, shape index: {}]   ;;  %s6555_s1 = inlined_call_operand.vmem [shape: bf16[16,32], index: 1, kind: input, shape index: {}]   ;;  %s6556_s2 = inlined_call_operand.vmem [shape: f32[1,32], index: 2, kind: input, shape index: {}]   ;;  %s6557_s3 = inlined_call_operand.vmem [shape: f32[1,32], index: 3, kind: input, shape index: {}]   ;;  %s6558_s4 = inlined_call_operand.hbm [shape: bf16[9,32,32], index: 4, kind: input, shape index: {}]   ;;  %s6559_s5 = inlined_call_operand.vmem [shape: f32[1,32], index: 5, kind: input, shape index: {}]   ;;  %s6560_s6 = inlined_call_operand.vmem [shape: f32[1,32], index: 6, kind: input, shape index: {}]   ;;  %s6561_s7 = inlined_call_operand.vmem [shape: f32[32,4], index: 7, kind: input, shape index: {}]   ;;  %s6562_s8 = inlined_call_operand.vmem [shape: f32[1,4], index: 8, kind: input, shape index: {}]   ;;  %s6563_s9 = inlined_call_operand.vmem [shape: f32[4,32], index: 9, kind: input, shape index: {}]   ;;  %s6564_s10 = inlined_call_operand.vmem [shape: f32[1,32], index: 10, kind: input, shape index: {}]   ;;  %s6565_s11 = inlined_call_operand.vmem [shape: bf16[32,32], index: 11, kind: input, shape index: {}]   ;;  %s6566_s12 = inlined_call_operand.vmem [shape: f32[1,32], index: 12, kind: input, shape index: {}]   ;;  %s6567_s13 = inlined_call_operand.vmem [shape: f32[1,32], index: 13, kind: input, shape index: {}]   ;;  %s6568_s14 = inlined_call_operand.vmem [shape: bf16[16,32], index: 14, kind: input, shape index: {}]   ;;  %s6569_s15 = inlined_call_operand.vmem [shape: f32[1,32], index: 15, kind: input, shape index: {}]   ;;  %s6570_s16 = inlined_call_operand.vmem [shape: f32[1,32], index: 16, kind: input, shape index: {}]   ;;  %s6571_s17 = inlined_call_operand.hbm [shape: f32[4,8,8,32], index: 17, kind: output, shape index: {}]  }
   0x1   :  { %6583 = sst [smem:[#allocation15_spill]] %s6554_s0 }
   0x2   :  { %6584 = sst [smem:[#allocation16_spill]] %s6555_s1 }
   0x3   :  { %6585 = sst [smem:[#allocation17_spill]] %s6564_s10 }
   0x4   :  { %6586 = sst [smem:[#allocation18_spill]] %s6566_s12 }
   0x5   :  { %6587 = sst [smem:[#allocation19_spill]] %s6567_s13 }
   0x6   :  { %6588 = sst [smem:[#allocation20_spill]] %s6569_s15 }
   0x7   :  { %6589 = sst [smem:[#allocation21_spill]] %s6570_s16 }
   0x8   :  { %6590 = sst [smem:[#allocation22_spill]] %s6571_s17 }
   0x9   :  { %22 = vsyncpa [#allocation4], 0 }
   0xa   :  { %24 = vsyncpa [#allocation4 + $0x1], 0 }
   0xb   :  { %25 = vsyncpa [#allocation7], 0 }
   0xc   :  { %26 = vsyncpa [#allocation5], 0 }
   0xd   :  { %28 = vsyncpa [#allocation5 + $0x1], 0  ;;  %s5046_s24 = smov 0   ;;  %s5048_s25 = smov 0  }
   0xe   :  { %s5050_s26 = smov 0   ;;  %s5052_s27 = smov 0  }
   0xf LB: > { %6591 = sst [smem:[#allocation12_spill]] %s4929_s24  ;;  %s5067_s28 = sadd.s32 4294967295, %s4941_s27   ;;  %s4941_s27 = sphi %s5052_s27, %s6630_s27   ;;  %s4937_s26 = sphi %s5050_s26, %s6633_s26   ;;  %s4933_s25 = sphi %s5048_s25, %s6632_s25   ;;  %s4929_s24 = sphi %s5046_s24, %s6631_s24  }
  0x10   : > { %s3955_s29 = sadd.s32 4294967294, %s4941_s27   ;;  %p54_p0 = scmp.ne.s32.totalorder %s4933_s25, %s4929_s24 }
  0x11   : > { %p6578_p1 = scmp.eq.s32.totalorder %s5067_s28, 0  ;;  %p420_p3 = scmp.eq.s32.totalorder %s3955_s29, 1 }
  0x12   : > { %p3956_p5 = scmp.ge.s32.totalorder %s4941_s27, 1  ;;  %p427_p7 = scmp.lt.s32.totalorder %s4941_s27, 3 }
  0x13   : > { %p5076_p4 = por %p6578_p1, %p54_p0  ;;  %p5081_p6 = por %p420_p3, %p54_p0 }
  0x14   : > { %p5086_p8 = pnand %p3956_p5, %p427_p7  ;;  %s4943_s19 = smov [#allocation6]  }
  0x15   : > { %s6592_s0 = scalar_select %p5076_p4, 1, 0 }
  0x16   : > { %s6593_s30 = scalar_select %p5081_p6, 1, 0 }
  0x17   : > { %s6595_s18 = scalar_select %p5086_p8, 1, 0 }
  0x18   : > { %6594 = sst [smem:[#allocation13_spill]] %s6593_s30  ;;  %s448_s1 = sshll.u32 %s4943_s19, 4  ;;  %s5090_s1 = int_to_ptr.vmem [resolvable:$true] %s448_s1 }
  0x19   : > { %p4728_p9 = pneg %p5086_p8  ;;  %s5102_s21 = sadd.s32 1, %s4941_s27  }
  0x1a   : > { %6597 = sst [smem:[#allocation14_spill]] %s5102_s21  ;;  %s41_s22 = sadd.s32 1, %s4937_s26 }
  0x1b   : > { %p5097_p11 = pnand %p4728_p9, %p6578_p1  ;;  %s38_s23 = ssub.s32 %s4941_s27, %s5102_s21 }
  0x1c   : > { %s4813_s19 = scalar_lea.hbm %s6558_s4, 2304 }
  0x1d   : > { %p4814_p12 = scmp.ne.s32.totalorder %s6558_s4, %s4813_s19  ;;  %p4815_p13 = pneg %p5097_p11 }
  0x1e   : > { %p4820_p5 = scmp.lt.u32.totalorder %s4813_s19, %s6558_s4 }
  0x1f   : > { %p4816_p0 = pnand %p4815_p13, %p4814_p12 }
  0x21   : > { %p4817_p3 = pneg %p4816_p0 }
  0x23   : > { %p4822_p7 = pnand %p4820_p5, %p4817_p3 }
  0x25   : > { %4825 = shalt.err (!%p4822_p7)
}
  0x26   : > { %s4826_s21 = scalar_lea.vmem %s5090_s1, 2304  ;;  %p4834_p2 = scmp.lt.s32.totalorder %s5090_s1, %s5090_s1 }
  0x27   : > { %p4827_p9 = scmp.ne.s32.totalorder %s5090_s1, %s4826_s21  ;;  %p4835_p6 = scmp.lt.s32.totalorder %s4826_s21, %s4826_s21 }
  0x29   : > { %p4829_p10 = pnand %p4827_p9, %p4815_p13  ;;  %p4836_p4 = por %p4835_p6, %p4834_p2 }
  0x2b   : > { %p4830_p1 = pneg %p4829_p10 }
  0x2d   : > { %p4837_p8 = pnand %p4836_p4, %p4830_p1 }
  0x2f   : > { %4840 = shalt.err (!%p4837_p8)
}
  0x30   : > { %s4944_s17 = smov 64   ;;  %s4945_s13 = smov 4  }
  0x31   : > { %4731 = dma.hbm_to_vmem [thread:$0]  (!%p5097_p11), %s6558_s4, 2304, %s5090_s1, [#allocation7], %s4944_s17, %s4944_s17, %s4945_s13  }
  0x32   : > { %p39_p2 = scmp.eq.s32.totalorder %s38_s23, 0  ;;  %p48_p1 = scmp.ne.s32.totalorder %s4937_s26, %s4933_s25 }
  0x33   : > { %p49_p4 = scmp.eq.s32.totalorder %s4941_s27, 0  ;;  %p4741_p6 = scmp.lt.s32.totalorder %s4941_s27, 2 }
  0x34   : > { %s5133_s30 = scalar_select %p39_p2, %s4937_s26, %s41_s22  }
  0x35   : > { %p50_p8 = por %p49_p4, %p48_p1  ;;  %p6598_p10 = scmp.eq.s32.totalorder %s5067_s28, 1 }
  0x36   : > { %s498_s29 = sand.u32 1, %s4937_s26   ;;  %s4130_s19 = sshll.u32 %s4941_s27, 13 }
  0x37   : > { %p5137_p12 = por %p6598_p10, %p48_p1  ;;  %s3959_s15 = sshll.u32 %s498_s29, 9 }
  0x38   : > { %s6600_s10 = sld [smem:[#allocation15_spill]]  ;;  %s502_s1 = scalar_lea.vmem [#allocation3], %s3959_s15 }
  0x39   : > { %s510_s22 = sshll.u32 %s502_s1, 4  ;;  %p5148_p11 = pnand %p4741_p6, %p50_p8  ;;  %s5152_s22 = int_to_ptr.vmem [resolvable:$true] %s510_s22 }
  0x3a   : > { %s5154_s17 = scalar_lea.sflag [#allocation4], %s498_s29 }
  0x3b   : > { %p4843_p0 = pneg %p5148_p11 }
  0x3e   : > { %s5146_s16 = scalar_lea.hbm %s6600_s10, %s4130_s19  ;;  %s4846_s24 = scalar_lea.hbm %s6600_s10, 16384 }
  0x3f   : > { %s4841_s13 = scalar_lea.hbm %s5146_s16, 8192  ;;  %p4847_p7 = scmp.lt.u32.totalorder %s5146_s16, %s6600_s10 }
  0x40   : > { %p4842_p13 = scmp.ne.s32.totalorder %s5146_s16, %s4841_s13  ;;  %p4848_p9 = scmp.lt.u32.totalorder %s4846_s24, %s4841_s13 }
  0x41   : > { %p4850_p1 = scmp.lt.u32.totalorder %s4841_s13, %s5146_s16 }
  0x42   : > { %p4844_p3 = pnand %p4843_p0, %p4842_p13  ;;  %p4849_p2 = por %p4848_p9, %p4847_p7 }
  0x44   : > { %p4845_p5 = pneg %p4844_p3  ;;  %p4851_p4 = por %p4850_p1, %p4849_p2 }
  0x46   : > { %p4852_p6 = pnand %p4851_p4, %p4845_p5 }
  0x48   : > { %4855 = shalt.err (!%p4852_p6)
}
  0x49   : > { %s4856_s29 = scalar_lea.vmem %s5152_s22, 8192  ;;  %s4946_s1 = smov [#allocation3]  }
  0x4a   : > { %p4857_p8 = scmp.ne.s32.totalorder %s5152_s22, %s4856_s29  ;;  %s4861_s12 = sshll.u32 %s4946_s1, 4  ;;  %s4862_s12 = int_to_ptr.vmem [resolvable:$false] %s4861_s12 }
  0x4b   : > { %s4863_s15 = scalar_lea.vmem %s4862_s12, 16384  ;;  %p4864_p3 = scmp.lt.s32.totalorder %s5152_s22, %s4862_s12 }
  0x4c   : > { %p4859_p10 = pnand %p4857_p8, %p4843_p0  ;;  %p4865_p7 = scmp.lt.s32.totalorder %s4863_s15, %s4856_s29 }
  0x4e   : > { %p4860_p13 = pneg %p4859_p10  ;;  %p4866_p9 = por %p4865_p7, %p4864_p3 }
  0x50   : > { %p4867_p2 = pnand %p4866_p9, %p4860_p13 }
  0x52   : > { %4870 = shalt.err (!%p4867_p2)
}
  0x53   : > { %s4947_s13 = smov 128   ;;  %s4948_s24 = smov 8  }
  0x54   : > { %4735 = dma.hbm_to_vmem [thread:$0]  (!%p5148_p11), %s5146_s16, 8192, %s5152_s22, %s5154_s17, %s4947_s13, %s4947_s13, %s4948_s24  }
  0x55   : > { %p6602_p0 = scmp.ne.s32.totalorder %s6595_s18, 0 }
  0x56   : > { %s5185_s19 = sand.u32 (!%p6602_p0), 1, %s4933_s25   ;;  %p6603_p5 = scmp.ne.s32.totalorder (!%p6602_p0), %s6592_s0, 0 }
  0x57   : > { %522 = sbr.rel (%p6602_p0) target bundleno = 1691 (0x69b), region = 88  ;;  %s3964_s20 = sshll.u32 (!%p6602_p0), %s5185_s19, 9 }
  0x58   : > { %s525_s29 = scalar_lea.sflag (!%p6602_p0), [#allocation4], %s5185_s19  ;;  %s5189_s1 = scalar_lea.vmem (!%p6602_p0), [#allocation3], %s3964_s20 }
  0x5e   : > { %4916 = dma.done.wait (%p6603_p5), %s525_s29, 8192  }
  0x5f   : > { %4918 = vsyncadd (%p6603_p5), %s525_s29, 4294959104  ;;  %p6604_p11 = scmp.eq.s32.totalorder %s5067_s28, 0 }
  0x61   : > { %4920 = dma.done.wait (%p6604_p11), [#allocation7], 2304   ;;  %p6605_p1 = pmov %p6604_p11 }
  0x62   : > { %vm1282_vm0 = vcmask 261120   ;;  %vm1284_vm1 = vcmask 254976   ;;  %v6581_v0 = vmov 0.0   ;;  %s6606_s16 = sld [smem:[#allocation16_spill]]  ;;  %v586_v2 = vld [vmem:[%s5189_s1] sm:$0xff]  ;;  %v587_v3 = vld [vmem:[%s5189_s1 + $0x8] sm:$0xff] }
  0x63   : > { %4922 = vsyncadd (%p6605_p1), [#allocation7], 4294964992  ;;  %1286 = vst.msk [vmem:[#allocation2 + $0x10] sm:$0xff] %vm1282_vm0, %v6581_v0  ;;  %vm690_vm2 = vcmask 130048   ;;  %v588_v4 = vld [vmem:[%s5189_s1 + $0x10] sm:$0xff]  ;;  %v650_v5 = vpack.c.bf16 %v587_v3, %v586_v2  ;;  %v589_v6 = vld [vmem:[%s5189_s1 + $0x18] sm:$0xff] }
  0x64   : > { %1287 = vst.msk [vmem:[#allocation2 + $0x18] sm:$0x3] %vm1284_vm1, %v6581_v0  ;;  %1289 = vst.msk [vmem:[#allocation2 + $0x28] sm:$0x3] %vm1284_vm1, %v6581_v0  ;;  %v590_v7 = vld [vmem:[%s5189_s1 + $0x20] sm:$0xff]  ;;  %v591_v8 = vld [vmem:[%s5189_s1 + $0x28] sm:$0xff]  ;;  %v651_v9 = vpack.c.bf16 %v589_v6, %v588_v4 }
  0x65   : > { %1288 = vst.msk [vmem:[#allocation2 + $0x20] sm:$0xff] %vm1282_vm0, %v6581_v0  ;;  %1290 = vst.msk [vmem:[#allocation2 + $0x30] sm:$0xff] %vm1282_vm0, %v6581_v0  ;;  %v652_v10 = vpack.c.bf16 %v591_v8, %v590_v7  ;;  %4284 = vmatprep.mubr.msk.bf16.mxu0 %vm690_vm2, %v650_v5  ;;  %v592_v11 = vld [vmem:[%s5189_s1 + $0x30] sm:$0xff]  ;;  %v593_v12 = vld [vmem:[%s5189_s1 + $0x38] sm:$0xff]  ;;  %vm4951_vm3 = vmmov 0   ;;  %vm3203_vm4 = vcmask 1041409  }
  0x66   : > { %1291 = vst.msk [vmem:[#allocation2 + $0x38] sm:$0x3] %vm1284_vm1, %v6581_v0  ;;  %1293 = vst.msk [vmem:[#allocation2 + $0x48] sm:$0x3] %vm1284_vm1, %v6581_v0  ;;  %v594_v13 = vld [vmem:[%s5189_s1 + $0x40] sm:$0xff]  ;;  %v595_v14 = vld [vmem:[%s5189_s1 + $0x48] sm:$0xff]  ;;  %v653_v15 = vpack.c.bf16 %v593_v12, %v592_v11 }
  0x67   : > { %1292 = vst.msk [vmem:[#allocation2 + $0x40] sm:$0xff] %vm1282_vm0, %v6581_v0  ;;  %1294 = vst.msk [vmem:[#allocation2 + $0x50] sm:$0xff] %vm1282_vm0, %v6581_v0  ;;  %v654_v16 = vpack.c.bf16 %v595_v14, %v594_v13  ;;  %v596_v17 = vld [vmem:[%s5189_s1 + $0x50] sm:$0xff]  ;;  %v597_v18 = vld [vmem:[%s5189_s1 + $0x58] sm:$0xff]  ;;  %vm3290_vm5 = vcmask 1043456   ;;  %vm3286_vm6 = vcmask 31744  }
  0x68   : > { %1295 = vst.msk [vmem:[#allocation2 + $0x58] sm:$0x3] %vm1284_vm1, %v6581_v0  ;;  %1297 = vst.msk [vmem:[#allocation2 + $0x68] sm:$0x3] %vm1284_vm1, %v6581_v0  ;;  %v4787_v1 = vld [vmem:[%s6606_s16] sm:$0xff]   ;;  %v599_v20 = vld [vmem:[%s5189_s1 + $0x68] sm:$0xff]  ;;  %v655_v21 = vpack.c.bf16 %v597_v18, %v596_v17 }
  0x69   : > { %1296 = vst.msk [vmem:[#allocation2 + $0x60] sm:$0xff] %vm1282_vm0, %v6581_v0  ;;  %1298 = vst.msk [vmem:[#allocation2 + $0x70] sm:$0xff] %vm1282_vm0, %v6581_v0  ;;  %4282 = vmatprep.subr.bf16.mxu0 %v4787_v1  ;;  %v598_v19 = vld [vmem:[%s5189_s1 + $0x60] sm:$0xff]  ;;  %v600_v23 = vld [vmem:[%s5189_s1 + $0x70] sm:$0xff]  ;;  %s6620_s15 = sld [smem:[#allocation17_spill]]  ;;  %s6621_s24 = sld [smem:[#allocation18_spill]] }
  0x6a   : > { %1299 = vst.msk [vmem:[#allocation2 + $0x78] sm:$0x3] %vm1284_vm1, %v6581_v0  ;;  %1301 = vst.msk [vmem:[#allocation2 + $0x88] sm:$0x3] %vm1284_vm1, %v6581_v0  ;;  %4283 = vmatpush3.bf16.msra.mxu0 %v4787_v1  ;;  %v656_v22 = vpack.c.bf16 %v599_v20, %v598_v19  ;;  %v601_v24 = vld [vmem:[%s5189_s1 + $0x78] sm:$0xff]  ;;  %v602_v25 = vld [vmem:[%s5189_s1 + $0x80] sm:$0xff] }
  0x6b   : > { %1300 = vst.msk [vmem:[#allocation2 + $0x80] sm:$0xff] %vm1282_vm0, %v6581_v0  ;;  %1306 = vst.msk [vmem:[#allocation2 + $0xb0] sm:$0xff] %vm1282_vm0, %v6581_v0  ;;  %v603_v26 = vld [vmem:[%s5189_s1 + $0x88] sm:$0xff]  ;;  %v657_v27 = vpack.c.bf16 %v601_v24, %v600_v23  ;;  %v604_v29 = vld [vmem:[%s5189_s1 + $0x90] sm:$0xff]  ;;  %s6622_s0 = sld [smem:[#allocation20_spill]]  ;;  %s6623_s22 = sld [smem:[#allocation19_spill]] }
  0x6c   : > { %1307 = vst.msk [vmem:[#allocation2 + $0xb8] sm:$0x3] %vm1284_vm1, %v6581_v0  ;;  %1309 = vst.msk [vmem:[#allocation2 + $0xc8] sm:$0x3] %vm1284_vm1, %v6581_v0  ;;  %v658_v28 = vpack.c.bf16 %v603_v26, %v602_v25  ;;  %v605_v30 = vld [vmem:[%s5189_s1 + $0x98] sm:$0xff]  ;;  %v606_v31 = vld [vmem:[%s5189_s1 + $0xa0] sm:$0xff] }
  0x6d   : > { %1308 = vst.msk [vmem:[#allocation2 + $0xc0] sm:$0xff] %vm1282_vm0, %v6581_v0  ;;  %1310 = vst.msk [vmem:[#allocation2 + $0xd0] sm:$0xff] %vm1282_vm0, %v6581_v0  ;;  %4285 = vmatmul.mubr.msk.bf16.vlgmr.msra.gmra.mrb[0].mxu0 %vm690_vm2, %v651_v9  ;;  %v607_v32 = vld [vmem:[%s5189_s1 + $0xa8] sm:$0xff]  ;;  %v659_v33 = vpack.c.bf16 %v605_v30, %v604_v29  ;;  %v608_v35 = vld [vmem:[%s5189_s1 + $0xb0] sm:$0xff]  ;;  %s6624_s12 = sld [smem:[#allocation21_spill]]  ;;  %s4132_s13 = sshll.u32 %s5067_s28, 11 }
  0x6e   : > { %1311 = vst.msk [vmem:[#allocation2 + $0xd8] sm:$0x3] %vm1284_vm1, %v6581_v0  ;;  %1313 = vst.msk [vmem:[#allocation2 + $0xe8] sm:$0x3] %vm1284_vm1, %v6581_v0  ;;  %4288 = vmatprep.mubr.msk.bf16.mxu0 %vm690_vm2, %v652_v10  ;;  %v660_v34 = vpack.c.bf16 %v607_v32, %v606_v31  ;;  %v609_v36 = vld [vmem:[%s5189_s1 + $0xb8] sm:$0xff]  ;;  %v610_v37 = vld [vmem:[%s5189_s1 + $0xc0] sm:$0xff] }
  0x6f   : > { %1312 = vst.msk [vmem:[#allocation2 + $0xe0] sm:$0xff] %vm1282_vm0, %v6581_v0  ;;  %1314 = vst.msk [vmem:[#allocation2 + $0xf0] sm:$0xff] %vm1282_vm0, %v6581_v0  ;;  %v611_v38 = vld [vmem:[%s5189_s1 + $0xc8] sm:$0xff]  ;;  %v661_v39 = vpack.c.bf16 %v609_v36, %v608_v35  ;;  %v612_v41 = vld [vmem:[%s5189_s1 + $0xd0] sm:$0xff]  ;;  %s3858_s28 = scalar_lea.sflag [#allocation5], %s5185_s19 }
  0x70   : > { %1315 = vst.msk [vmem:[#allocation2 + $0xf8] sm:$0x3] %vm1284_vm1, %v6581_v0  ;;  %1317 = vst.msk [vmem:[#allocation2 + $0x108] sm:$0x3] %vm1284_vm1, %v6581_v0  ;;  %v662_v40 = vpack.c.bf16 %v611_v38, %v610_v37  ;;  %v613_v42 = vld [vmem:[%s5189_s1 + $0xd8] sm:$0xff]  ;;  %v614_v43 = vld [vmem:[%s5189_s1 + $0xe0] sm:$0xff] }
  0x71   : > { %1316 = vst.msk [vmem:[#allocation2 + $0x100] sm:$0xff] %vm1282_vm0, %v6581_v0  ;;  %1318 = vst.msk [vmem:[#allocation2 + $0x110] sm:$0xff] %vm1282_vm0, %v6581_v0  ;;  %v615_v44 = vld [vmem:[%s5189_s1 + $0xe8] sm:$0xff]  ;;  %v663_v45 = vpack.c.bf16 %v613_v42, %v612_v41  ;;  %v616_v47 = vld [vmem:[%s5189_s1 + $0xf0] sm:$0xff] }
  0x72   : > { %1319 = vst.msk [vmem:[#allocation2 + $0x118] sm:$0x3] %vm1284_vm1, %v6581_v0  ;;  %1321 = vst.msk [vmem:[#allocation2 + $0x128] sm:$0x3] %vm1284_vm1, %v6581_v0  ;;  %v664_v46 = vpack.c.bf16 %v615_v44, %v614_v43  ;;  %v617_v48 = vld [vmem:[%s5189_s1 + $0xf8] sm:$0xff]  ;;  %v618_v49 = vld [vmem:[%s5189_s1 + $0x100] sm:$0xff] }
  0x73   : > { %1320 = vst.msk [vmem:[#allocation2 + $0x120] sm:$0xff] %vm1282_vm0, %v6581_v0  ;;  %1324 = vst.msk [vmem:[#allocation2 + $0x140] sm:$0xff] %vm1282_vm0, %v6581_v0  ;;  %v619_v50 = vld [vmem:[%s5189_s1 + $0x108] sm:$0xff]  ;;  %v665_v51 = vpack.c.bf16 %v617_v48, %v616_v47  ;;  %v620_v53 = vld [vmem:[%s5189_s1 + $0x110] sm:$0xff] }
  0x74   : > { %1325 = vst.msk [vmem:[#allocation2 + $0x148] sm:$0x3] %vm1284_vm1, %v6581_v0  ;;  %1327 = vst.msk [vmem:[#allocation2 + $0x158] sm:$0x3] %vm1284_vm1, %v6581_v0  ;;  %v666_v52 = vpack.c.bf16 %v619_v50, %v618_v49  ;;  %v621_v54 = vld [vmem:[%s5189_s1 + $0x118] sm:$0xff]  ;;  %v622_v55 = vld [vmem:[%s5189_s1 + $0x120] sm:$0xff] }
  0x75   : > { %1326 = vst.msk [vmem:[#allocation2 + $0x150] sm:$0xff] %vm1282_vm0, %v6581_v0  ;;  %1328 = vst.msk [vmem:[#allocation2 + $0x160] sm:$0xff] %vm1282_vm0, %v6581_v0  ;;  %4289 = vmatmul.mubr.msk.bf16.gmra.mrb[4].mxu0 %vm690_vm2, %v653_v15  ;;  %v623_v56 = vld [vmem:[%s5189_s1 + $0x128] sm:$0xff]  ;;  %v667_v57 = vpack.c.bf16 %v621_v54, %v620_v53  ;;  %v624_v59 = vld [vmem:[%s5189_s1 + $0x130] sm:$0xff] }
  0x76   : > { %1329 = vst.msk [vmem:[#allocation2 + $0x168] sm:$0x3] %vm1284_vm1, %v6581_v0  ;;  %1331 = vst.msk [vmem:[#allocation2 + $0x178] sm:$0x3] %vm1284_vm1, %v6581_v0  ;;  %4292 = vmatprep.mubr.msk.bf16.mxu0 %vm690_vm2, %v654_v16  ;;  %v668_v58 = vpack.c.bf16 %v623_v56, %v622_v55  ;;  %v625_v60 = vld [vmem:[%s5189_s1 + $0x138] sm:$0xff]  ;;  %v626_v61 = vld [vmem:[%s5189_s1 + $0x140] sm:$0xff] }
  0x77   : > { %1330 = vst.msk [vmem:[#allocation2 + $0x170] sm:$0xff] %vm1282_vm0, %v6581_v0  ;;  %1332 = vst.msk [vmem:[#allocation2 + $0x180] sm:$0xff] %vm1282_vm0, %v6581_v0  ;;  %v627_v62 = vld [vmem:[%s5189_s1 + $0x148] sm:$0xff]  ;;  %v669_v63 = vpack.c.bf16 %v625_v60, %v624_v59  ;;  %v628_v2 = vld [vmem:[%s5189_s1 + $0x150] sm:$0xff] }
  0x78   : > { %1333 = vst.msk [vmem:[#allocation2 + $0x188] sm:$0x3] %vm1284_vm1, %v6581_v0  ;;  %1335 = vst.msk [vmem:[#allocation2 + $0x198] sm:$0x3] %vm1284_vm1, %v6581_v0  ;;  %v670_v1 = vpack.c.bf16 %v627_v62, %v626_v61  ;;  %v629_v3 = vld [vmem:[%s5189_s1 + $0x158] sm:$0xff]  ;;  %v630_v4 = vld [vmem:[%s5189_s1 + $0x160] sm:$0xff] }
  0x79   : > { %1334 = vst.msk [vmem:[#allocation2 + $0x190] sm:$0xff] %vm1282_vm0, %v6581_v0  ;;  %1336 = vst.msk [vmem:[#allocation2 + $0x1a0] sm:$0xff] %vm1282_vm0, %v6581_v0  ;;  %v631_v5 = vld [vmem:[%s5189_s1 + $0x168] sm:$0xff]  ;;  %v671_v6 = vpack.c.bf16 %v629_v3, %v628_v2  ;;  %v632_v8 = vld [vmem:[%s5189_s1 + $0x170] sm:$0xff] }
  0x7a   : > { %1337 = vst.msk [vmem:[#allocation2 + $0x1a8] sm:$0x3] %vm1284_vm1, %v6581_v0  ;;  %1339 = vst.msk [vmem:[#allocation2 + $0x1b8] sm:$0x3] %vm1284_vm1, %v6581_v0  ;;  %v672_v7 = vpack.c.bf16 %v631_v5, %v630_v4  ;;  %v633_v9 = vld [vmem:[%s5189_s1 + $0x178] sm:$0xff]  ;;  %v634_v10 = vld [vmem:[%s5189_s1 + $0x180] sm:$0xff] }
  0x7b   : > { %1338 = vst.msk [vmem:[#allocation2 + $0x1b0] sm:$0xff] %vm1282_vm0, %v6581_v0  ;;  %1340 = vst.msk [vmem:[#allocation2 + $0x1c0] sm:$0xff] %vm1282_vm0, %v6581_v0  ;;  %v635_v11 = vld [vmem:[%s5189_s1 + $0x188] sm:$0xff]  ;;  %v673_v12 = vpack.c.bf16 %v633_v9, %v632_v8  ;;  %v636_v14 = vld [vmem:[%s5189_s1 + $0x190] sm:$0xff] }
  0x7c   : > { %1341 = vst.msk [vmem:[#allocation2 + $0x1c8] sm:$0x3] %vm1284_vm1, %v6581_v0  ;;  %1345 = vst.msk [vmem:[#allocation2 + $0x1e8] sm:$0x3] %vm1284_vm1, %v6581_v0  ;;  %v674_v13 = vpack.c.bf16 %v635_v11, %v634_v10  ;;  %v637_v15 = vld [vmem:[%s5189_s1 + $0x198] sm:$0xff]  ;;  %v638_v16 = vld [vmem:[%s5189_s1 + $0x1a0] sm:$0xff] }
  0x7d   : > { %1344 = vst.msk [vmem:[#allocation2 + $0x1e0] sm:$0xff] %vm1282_vm0, %v6581_v0  ;;  %1346 = vst.msk [vmem:[#allocation2 + $0x1f0] sm:$0xff] %vm1282_vm0, %v6581_v0  ;;  %4293 = vmatmul.mubr.msk.bf16.gmra.mrb[8].mxu0 %vm690_vm2, %v655_v21  ;;  %v639_v17 = vld [vmem:[%s5189_s1 + $0x1a8] sm:$0xff]  ;;  %v675_v18 = vpack.c.bf16 %v637_v15, %v636_v14  ;;  %v640_v20 = vld [vmem:[%s5189_s1 + $0x1b0] sm:$0xff] }
  0x7e   : > { %1347 = vst.msk [vmem:[#allocation2 + $0x1f8] sm:$0x3] %vm1284_vm1, %v6581_v0  ;;  %1349 = vst.msk [vmem:[#allocation2 + $0x208] sm:$0x3] %vm1284_vm1, %v6581_v0  ;;  %4296 = vmatprep.mubr.msk.bf16.mxu0 %vm690_vm2, %v656_v22  ;;  %v676_v19 = vpack.c.bf16 %v639_v17, %v638_v16  ;;  %v641_v21 = vld [vmem:[%s5189_s1 + $0x1b8] sm:$0xff]  ;;  %v642_v22 = vld [vmem:[%s5189_s1 + $0x1c0] sm:$0xff] }
  0x7f   : > { %1348 = vst.msk [vmem:[#allocation2 + $0x200] sm:$0xff] %vm1282_vm0, %v6581_v0  ;;  %1350 = vst.msk [vmem:[#allocation2 + $0x210] sm:$0xff] %vm1282_vm0, %v6581_v0  ;;  %v643_v23 = vld [vmem:[%s5189_s1 + $0x1c8] sm:$0xff]  ;;  %v677_v24 = vpack.c.bf16 %v641_v21, %v640_v20  ;;  %v644_v26 = vld [vmem:[%s5189_s1 + $0x1d0] sm:$0xff] }
  0x80   : > { %1351 = vst.msk [vmem:[#allocation2 + $0x218] sm:$0x3] %vm1284_vm1, %v6581_v0  ;;  %1353 = vst.msk [vmem:[#allocation2 + $0x228] sm:$0x3] %vm1284_vm1, %v6581_v0  ;;  %v678_v25 = vpack.c.bf16 %v643_v23, %v642_v22  ;;  %v647_v29 = vld [vmem:[%s5189_s1 + $0x1e8] sm:$0xff]  ;;  %v648_v32 = vld [vmem:[%s5189_s1 + $0x1f0] sm:$0xff] }
  0x81   : > { %1352 = vst.msk [vmem:[#allocation2 + $0x220] sm:$0xff] %vm1282_vm0, %v6581_v0  ;;  %1354 = vst.msk [vmem:[#allocation2 + $0x230] sm:$0xff] %vm1282_vm0, %v6581_v0  ;;  %v4788_v35 = vld [vmem:[#allocation6 + $0x10] sm:$0xff]   ;;  %v4789_v36 = vld [vmem:[#allocation6 + $0x18] sm:$0xff]  }
  0x82   : > { %1355 = vst.msk [vmem:[#allocation2 + $0x238] sm:$0x3] %vm1284_vm1, %v6581_v0  ;;  %1357 = vst.msk [vmem:[#allocation2 + $0x248] sm:$0x3] %vm1284_vm1, %v6581_v0  ;;  %4348 = vmatprep.subr.bf16.mxu0 %v4788_v35  ;;  %v5570_v37 = vld [vmem:[#allocation6] sm:$0xff]   ;;  %v5575_v38 = vld [vmem:[#allocation6 + $0x8] sm:$0xff]  }
  0x83   : > { %1356 = vst.msk [vmem:[#allocation2 + $0x240] sm:$0xff] %vm1282_vm0, %v6581_v0  ;;  %1358 = vst.msk [vmem:[#allocation2 + $0x250] sm:$0xff] %vm1282_vm0, %v6581_v0  ;;  %4349 = vmatpush3.bf16.msra.mxu0 %v4788_v35  ;;  %4588 = vmatprep.subr.bf16.mxu1 %v5570_v37  ;;  %v5587_v41 = vld [vmem:[%s6557_s3] ss:$0 sm:$0xff] }
  0x84   : > { %1359 = vst.msk [vmem:[#allocation2 + $0x258] sm:$0x3] %vm1284_vm1, %v6581_v0  ;;  %1361 = vst.msk [vmem:[#allocation2 + $0x268] sm:$0x3] %vm1284_vm1, %v6581_v0  ;;  %4350 = vmatprep.subr.bf16.mxu0 %v4789_v36  ;;  %4590 = vmatpush3.bf16.msra.mxu1 %v5570_v37 }
  0x85   : > { %1360 = vst.msk [vmem:[#allocation2 + $0x260] sm:$0xff] %vm1282_vm0, %v6581_v0  ;;  %1366 = vst.msk [vmem:[#allocation2 + $0x290] sm:$0xff] %vm1282_vm0, %v6581_v0  ;;  %4297 = vmatmul.mubr.msk.bf16.gmra.mrb[12].mxu0 %vm690_vm2, %v657_v27  ;;  %v645_v27 = vld [vmem:[%s5189_s1 + $0x1d8] sm:$0xff]  ;;  %4589 = vmatprep.subr.bf16.mxu1 %v5575_v38 }
  0x86   : > { %1367 = vst.msk [vmem:[#allocation2 + $0x298] sm:$0x3] %vm1284_vm1, %v6581_v0  ;;  %1369 = vst.msk [vmem:[#allocation2 + $0x2a8] sm:$0x3] %vm1284_vm1, %v6581_v0  ;;  %4300 = vmatprep.mubr.msk.bf16.mxu0 %vm690_vm2, %v658_v28  ;;  %v646_v28 = vld [vmem:[%s5189_s1 + $0x1e0] sm:$0xff]  ;;  %v679_v30 = vpack.c.bf16 %v645_v27, %v644_v26 }
  0x87   : > { %1368 = vst.msk [vmem:[#allocation2 + $0x2a0] sm:$0xff] %vm1282_vm0, %v6581_v0  ;;  %1370 = vst.msk [vmem:[#allocation2 + $0x2b0] sm:$0xff] %vm1282_vm0, %v6581_v0  ;;  %v680_v31 = vpack.c.bf16 %v647_v29, %v646_v28  ;;  %4351 = vmatpush3.bf16.msra.mxu0 %v4789_v36 }
  0x88   : > { %1371 = vst.msk [vmem:[#allocation2 + $0x2b8] sm:$0x3] %vm1284_vm1, %v6581_v0  ;;  %1373 = vst.msk [vmem:[#allocation2 + $0x2c8] sm:$0x3] %vm1284_vm1, %v6581_v0  ;;  %4368 = vmatprep.subr.bf16.mxu0 %v5570_v37  ;;  %4591 = vmatpush3.bf16.msra.mxu1 %v5575_v38 }
  0x89   : > { %1372 = vst.msk [vmem:[#allocation2 + $0x2c0] sm:$0xff] %vm1282_vm0, %v6581_v0  ;;  %1374 = vst.msk [vmem:[#allocation2 + $0x2d0] sm:$0xff] %vm1282_vm0, %v6581_v0 }
  0x8a   : > { %1375 = vst.msk [vmem:[#allocation2 + $0x2d8] sm:$0x3] %vm1284_vm1, %v6581_v0  ;;  %1377 = vst.msk [vmem:[#allocation2 + $0x2e8] sm:$0x3] %vm1284_vm1, %v6581_v0 }
  0x8b   : > { %1376 = vst.msk [vmem:[#allocation2 + $0x2e0] sm:$0xff] %vm1282_vm0, %v6581_v0  ;;  %1378 = vst.msk [vmem:[#allocation2 + $0x2f0] sm:$0xff] %vm1282_vm0, %v6581_v0 }
  0x8c   : > { %1379 = vst.msk [vmem:[#allocation2 + $0x2f8] sm:$0x3] %vm1284_vm1, %v6581_v0  ;;  %1381 = vst.msk [vmem:[#allocation2 + $0x308] sm:$0x3] %vm1284_vm1, %v6581_v0 }
  0x8d   : > { %1380 = vst.msk [vmem:[#allocation2 + $0x300] sm:$0xff] %vm1282_vm0, %v6581_v0  ;;  %1386 = vst.msk [vmem:[#allocation2 + $0x330] sm:$0xff] %vm1282_vm0, %v6581_v0  ;;  %4301 = vmatmul.mubr.msk.bf16.gmra.mrb[16].mxu0 %vm690_vm2, %v659_v33  ;;  %v649_v33 = vld [vmem:[%s5189_s1 + $0x1f8] sm:$0xff] }
  0x8e   : > { %1387 = vst.msk [vmem:[#allocation2 + $0x338] sm:$0x3] %vm1284_vm1, %v6581_v0  ;;  %1389 = vst.msk [vmem:[#allocation2 + $0x348] sm:$0x3] %vm1284_vm1, %v6581_v0  ;;  %4304 = vmatprep.mubr.msk.bf16.mxu0 %vm690_vm2, %v660_v34  ;;  %v681_v34 = vpack.c.bf16 %v649_v33, %v648_v32 }
  0x8f   : > { %1388 = vst.msk [vmem:[#allocation2 + $0x340] sm:$0xff] %vm1282_vm0, %v6581_v0  ;;  %1390 = vst.msk [vmem:[#allocation2 + $0x350] sm:$0xff] %vm1282_vm0, %v6581_v0 }
  0x90   : > { %1391 = vst.msk [vmem:[#allocation2 + $0x358] sm:$0x3] %vm1284_vm1, %v6581_v0  ;;  %1393 = vst.msk [vmem:[#allocation2 + $0x368] sm:$0x3] %vm1284_vm1, %v6581_v0 }
  0x91   : > { %1392 = vst.msk [vmem:[#allocation2 + $0x360] sm:$0xff] %vm1282_vm0, %v6581_v0  ;;  %1394 = vst.msk [vmem:[#allocation2 + $0x370] sm:$0xff] %vm1282_vm0, %v6581_v0 }
  0x92   : > { %1395 = vst.msk [vmem:[#allocation2 + $0x378] sm:$0x3] %vm1284_vm1, %v6581_v0  ;;  %1397 = vst.msk [vmem:[#allocation2 + $0x388] sm:$0x3] %vm1284_vm1, %v6581_v0 }
  0x93   : > { %1396 = vst.msk [vmem:[#allocation2 + $0x380] sm:$0xff] %vm1282_vm0, %v6581_v0  ;;  %1398 = vst.msk [vmem:[#allocation2 + $0x390] sm:$0xff] %vm1282_vm0, %v6581_v0 }
  0x94   : > { %1399 = vst.msk [vmem:[#allocation2 + $0x398] sm:$0x3] %vm1284_vm1, %v6581_v0  ;;  %1401 = vst.msk [vmem:[#allocation2 + $0x3a8] sm:$0x3] %vm1284_vm1, %v6581_v0 }
  0x95   : > { %1400 = vst.msk [vmem:[#allocation2 + $0x3a0] sm:$0xff] %vm1282_vm0, %v6581_v0  ;;  %1404 = vst.msk [vmem:[#allocation2 + $0x3c0] sm:$0xff] %vm1282_vm0, %v6581_v0  ;;  %4305 = vmatmul.mubr.msk.bf16.gmra.mrb[20].mxu0 %vm690_vm2, %v661_v39  ;;  %v5582_v39 = vld [vmem:[%s6556_s2] ss:$0 sm:$0xff] }
  0x96   : > { %1405 = vst.msk [vmem:[#allocation2 + $0x3c8] sm:$0x3] %vm1284_vm1, %v6581_v0  ;;  %1407 = vst.msk [vmem:[#allocation2 + $0x3d8] sm:$0x3] %vm1284_vm1, %v6581_v0  ;;  %4308 = vmatprep.mubr.msk.bf16.mxu0 %vm690_vm2, %v662_v40 }
  0x97   : > { %1406 = vst.msk [vmem:[#allocation2 + $0x3d0] sm:$0xff] %vm1282_vm0, %v6581_v0  ;;  %1408 = vst.msk [vmem:[#allocation2 + $0x3e0] sm:$0xff] %vm1282_vm0, %v6581_v0 }
  0x98   : > { %1409 = vst.msk [vmem:[#allocation2 + $0x3e8] sm:$0x3] %vm1284_vm1, %v6581_v0  ;;  %1411 = vst.msk [vmem:[#allocation2 + $0x3f8] sm:$0x3] %vm1284_vm1, %v6581_v0 }
  0x99   : > { %1410 = vst.msk [vmem:[#allocation2 + $0x3f0] sm:$0xff] %vm1282_vm0, %v6581_v0  ;;  %1412 = vst.msk [vmem:[#allocation2 + $0x400] sm:$0xff] %vm1282_vm0, %v6581_v0 }
  0x9a   : > { %1413 = vst.msk [vmem:[#allocation2 + $0x408] sm:$0x3] %vm1284_vm1, %v6581_v0  ;;  %1415 = vst.msk [vmem:[#allocation2 + $0x418] sm:$0x3] %vm1284_vm1, %v6581_v0 }
  0x9b   : > { %1414 = vst.msk [vmem:[#allocation2 + $0x410] sm:$0xff] %vm1282_vm0, %v6581_v0  ;;  %1416 = vst.msk [vmem:[#allocation2 + $0x420] sm:$0xff] %vm1282_vm0, %v6581_v0 }
  0x9c   : > { %1417 = vst.msk [vmem:[#allocation2 + $0x428] sm:$0x3] %vm1284_vm1, %v6581_v0  ;;  %1419 = vst.msk [vmem:[#allocation2 + $0x438] sm:$0x3] %vm1284_vm1, %v6581_v0 }
  0x9d   : > { %1418 = vst.msk [vmem:[#allocation2 + $0x430] sm:$0xff] %vm1282_vm0, %v6581_v0  ;;  %1420 = vst.msk [vmem:[#allocation2 + $0x440] sm:$0xff] %vm1282_vm0, %v6581_v0  ;;  %4309 = vmatmul.mubr.msk.bf16.gmra.mrb[24].mxu0 %vm690_vm2, %v663_v45 }
  0x9e   : > { %1421 = vst.msk [vmem:[#allocation2 + $0x448] sm:$0x3] %vm1284_vm1, %v6581_v0  ;;  %1425 = vst.msk [vmem:[#allocation2 + $0x468] sm:$0x3] %vm1284_vm1, %v6581_v0  ;;  %4312 = vmatprep.mubr.msk.bf16.mxu0 %vm690_vm2, %v664_v46  ;;  %v5591_v46 = vld [vmem:[#allocation6 + $0x20] sm:$0xff]  }
  0x9f   : > { %1424 = vst.msk [vmem:[#allocation2 + $0x460] sm:$0xff] %vm1282_vm0, %v6581_v0  ;;  %1426 = vst.msk [vmem:[#allocation2 + $0x470] sm:$0xff] %vm1282_vm0, %v6581_v0  ;;  %4388 = vmatprep.subr.bf16.mxu1 %v5591_v46 }
  0xa0   : > { %1427 = vst.msk [vmem:[#allocation2 + $0x478] sm:$0x3] %vm1284_vm1, %v6581_v0  ;;  %1429 = vst.msk [vmem:[#allocation2 + $0x488] sm:$0x3] %vm1284_vm1, %v6581_v0 }
  0xa1   : > { %1428 = vst.msk [vmem:[#allocation2 + $0x480] sm:$0xff] %vm1282_vm0, %v6581_v0  ;;  %1430 = vst.msk [vmem:[#allocation2 + $0x490] sm:$0xff] %vm1282_vm0, %v6581_v0 }
  0xa2   : > { %1431 = vst.msk [vmem:[#allocation2 + $0x498] sm:$0x3] %vm1284_vm1, %v6581_v0  ;;  %1433 = vst.msk [vmem:[#allocation2 + $0x4a8] sm:$0x3] %vm1284_vm1, %v6581_v0 }
  0xa3   : > { %1432 = vst.msk [vmem:[#allocation2 + $0x4a0] sm:$0xff] %vm1282_vm0, %v6581_v0  ;;  %1434 = vst.msk [vmem:[#allocation2 + $0x4b0] sm:$0xff] %vm1282_vm0, %v6581_v0 }
  0xa4   : > { %1435 = vst.msk [vmem:[#allocation2 + $0x4b8] sm:$0x3] %vm1284_vm1, %v6581_v0  ;;  %1437 = vst.msk [vmem:[#allocation2 + $0x4c8] sm:$0x3] %vm1284_vm1, %v6581_v0 }
  0xa5   : > { %1436 = vst.msk [vmem:[#allocation2 + $0x4c0] sm:$0xff] %vm1282_vm0, %v6581_v0  ;;  %1438 = vst.msk [vmem:[#allocation2 + $0x4d0] sm:$0xff] %vm1282_vm0, %v6581_v0  ;;  %4313 = vmatmul.mubr.msk.bf16.gmra.mrb[28].mxu0 %vm690_vm2, %v665_v51 }
  0xa6   : > { %1439 = vst.msk [vmem:[#allocation2 + $0x4d8] sm:$0x3] %vm1284_vm1, %v6581_v0  ;;  %1441 = vst.msk [vmem:[#allocation2 + $0x4e8] sm:$0x3] %vm1284_vm1, %v6581_v0  ;;  %4316 = vmatprep.mubr.msk.bf16.mxu0 %vm690_vm2, %v666_v52 }
  0xa7   : > { %1440 = vst.msk [vmem:[#allocation2 + $0x4e0] sm:$0xff] %vm1282_vm0, %v6581_v0 }
  0xad   : > { %4317 = vmatmul.mubr.msk.bf16.gmra.mrb[32].mxu0 %vm690_vm2, %v667_v57 }
  0xae   : > { %4320 = vmatprep.mubr.msk.bf16.mxu0 %vm690_vm2, %v668_v58 }
  0xb5   : > { %4321 = vmatmul.mubr.msk.bf16.gmra.mrb[36].mxu0 %vm690_vm2, %v669_v63 }
  0xb6   : > { %4324 = vmatprep.mubr.msk.bf16.mxu0 %vm690_vm2, %v670_v1 }
  0xbd   : > { %4325 = vmatmul.mubr.msk.bf16.gmra.mrb[40].mxu0 %vm690_vm2, %v671_v6 }
  0xbe   : > { %4328 = vmatprep.mubr.msk.bf16.mxu0 %vm690_vm2, %v672_v7 }
  0xc5   : > { %4329 = vmatmul.mubr.msk.bf16.gmra.mrb[44].mxu0 %vm690_vm2, %v673_v12 }
  0xc6   : > { %4332 = vmatprep.mubr.msk.bf16.mxu0 %vm690_vm2, %v674_v13 }
  0xcd   : > { %4333 = vmatmul.mubr.msk.bf16.gmra.mrb[48].mxu0 %vm690_vm2, %v675_v18 }
  0xce   : > { %4336 = vmatprep.mubr.msk.bf16.mxu0 %vm690_vm2, %v676_v19 }
  0xd5   : > { %4337 = vmatmul.mubr.msk.bf16.gmra.mrb[52].mxu0 %vm690_vm2, %v677_v24 }
  0xd6   : > { %4340 = vmatprep.mubr.msk.bf16.mxu0 %vm690_vm2, %v678_v25 }
  0xdd   : > { %4341 = vmatmul.mubr.msk.bf16.gmra.mrb[56].mxu0 %vm690_vm2, %v679_v30 }
  0xde   : > { %4344 = vmatprep.mubr.msk.bf16.mxu0 %vm690_vm2, %v680_v31 }
  0xe5   : > { %4345 = vmatmul.mubr.msk.bf16.gmra.mrb[60].mxu0 %vm690_vm2, %v681_v34 }
 0x140   : > { %v4286_v40 = vpop.f32.mrb[0].mxu0 }
 0x141   : > { %v1085_v42 = vmul.f32 %v4286_v40, %v5582_v39  ;;  %v821_v43 = vpop.f32.mrb[1].mxu0 }
 0x142   : > { %v1083_v44 = vmul.f32 %v5582_v39, %v821_v43  ;;  %v4287_v45 = vpop.f32.mrb[2].mxu0 }
 0x143   : > { %v1156_v47 = vadd.f32 %v5587_v41, %v1085_v42  ;;  %v1086_v48 = vmul.f32 %v4287_v45, %v5582_v39  ;;  %v824_v49 = vpop.f32.mrb[3].mxu0 }
 0x144   : > { %v1154_v50 = vadd.f32 %v5587_v41, %v1083_v44  ;;  %v1084_v51 = vmul.f32 %v5582_v39, %v824_v49 }
 0x145   : > { %v1220_v52 = vmax.f32 %v1156_v47, 0.0  ;;  %v1157_v53 = vadd.f32 %v5587_v41, %v1086_v48 }
 0x146   : > { %v1218_v54 = vmax.f32 %v1154_v50, 0.0  ;;  %v1155_v55 = vadd.f32 %v5587_v41, %v1084_v51 }
 0x147   : > { %1447 = vst.msk [vmem:[#allocation2 + $0x31] sm:$0xff] %vm1282_vm0, %v1220_v52  ;;  %v1221_v56 = vmax.f32 %v1157_v53, 0.0 }
 0x148   : > { %1445 = vst.msk [vmem:[#allocation2 + $0x11] sm:$0xff] %vm1282_vm0, %v1218_v54  ;;  %v1219_v57 = vmax.f32 %v1155_v55, 0.0  ;;  %v4290_v58 = vpop.f32.mrb[4].mxu0 }
 0x149   : > { %1448 = vst.msk [vmem:[#allocation2 + $0x41] sm:$0xff] %vm1282_vm0, %v1221_v56  ;;  %v1089_v59 = vmul.f32 %v4290_v58, %v5582_v39  ;;  %v837_v60 = vpop.f32.mrb[5].mxu0 }
 0x14a   : > { %1446 = vst.msk [vmem:[#allocation2 + $0x21] sm:$0xff] %vm1282_vm0, %v1219_v57  ;;  %v1087_v61 = vmul.f32 %v5582_v39, %v837_v60  ;;  %v4291_v62 = vpop.f32.mrb[6].mxu0 }
 0x14b   : > { %v1160_v63 = vadd.f32 %v5587_v41, %v1089_v59  ;;  %v1090_v1 = vmul.f32 %v4291_v62, %v5582_v39  ;;  %v840_v2 = vpop.f32.mrb[7].mxu0 }
 0x14c   : > { %v1158_v3 = vadd.f32 %v5587_v41, %v1087_v61  ;;  %v1088_v4 = vmul.f32 %v5582_v39, %v840_v2 }
 0x14d   : > { %v1224_v5 = vmax.f32 %v1160_v63, 0.0  ;;  %v1161_v6 = vadd.f32 %v5587_v41, %v1090_v1 }
 0x14e   : > { %v1222_v7 = vmax.f32 %v1158_v3, 0.0  ;;  %v1159_v8 = vadd.f32 %v5587_v41, %v1088_v4 }
 0x14f   : > { %1451 = vst.msk [vmem:[#allocation2 + $0x71] sm:$0xff] %vm1282_vm0, %v1224_v5  ;;  %v1225_v9 = vmax.f32 %v1161_v6, 0.0 }
 0x150   : > { %1449 = vst.msk [vmem:[#allocation2 + $0x51] sm:$0xff] %vm1282_vm0, %v1222_v7  ;;  %v1223_v10 = vmax.f32 %v1159_v8, 0.0  ;;  %v4294_v11 = vpop.f32.mrb[8].mxu0 }
 0x151   : > { %1452 = vst.msk [vmem:[#allocation2 + $0x81] sm:$0xff] %vm1282_vm0, %v1225_v9  ;;  %v1093_v12 = vmul.f32 %v4294_v11, %v5582_v39  ;;  %v853_v13 = vpop.f32.mrb[9].mxu0 }
 0x152   : > { %1450 = vst.msk [vmem:[#allocation2 + $0x61] sm:$0xff] %vm1282_vm0, %v1223_v10  ;;  %v1091_v14 = vmul.f32 %v5582_v39, %v853_v13  ;;  %v4295_v15 = vpop.f32.mrb[10].mxu0  ;;  %v1539_v13 = vld [vmem:[#allocation2 + $0x141] sm:$0xff] }
 0x153   : > { %v1164_v16 = vadd.f32 %v5587_v41, %v1093_v12  ;;  %v1094_v17 = vmul.f32 %v4295_v15, %v5582_v39  ;;  %v856_v18 = vpop.f32.mrb[11].mxu0 }
 0x154   : > { %v1162_v19 = vadd.f32 %v5587_v41, %v1091_v14  ;;  %v1092_v20 = vmul.f32 %v5582_v39, %v856_v18 }
 0x155   : > { %v1228_v21 = vmax.f32 %v1164_v16, 0.0  ;;  %v1165_v22 = vadd.f32 %v5587_v41, %v1094_v17 }
 0x156   : > { %v1226_v23 = vmax.f32 %v1162_v19, 0.0  ;;  %v1163_v24 = vadd.f32 %v5587_v41, %v1092_v20 }
 0x157   : > { %1455 = vst.msk [vmem:[#allocation2 + $0xd1] sm:$0xff] %vm1282_vm0, %v1228_v21  ;;  %v1229_v25 = vmax.f32 %v1165_v22, 0.0 }
 0x158   : > { %1453 = vst.msk [vmem:[#allocation2 + $0xb1] sm:$0xff] %vm1282_vm0, %v1226_v23  ;;  %v1227_v26 = vmax.f32 %v1163_v24, 0.0  ;;  %v4298_v27 = vpop.f32.mrb[12].mxu0 }
 0x159   : > { %1456 = vst.msk [vmem:[#allocation2 + $0xe1] sm:$0xff] %vm1282_vm0, %v1229_v25  ;;  %v1097_v28 = vmul.f32 %v4298_v27, %v5582_v39  ;;  %v869_v29 = vpop.f32.mrb[13].mxu0 }
 0x15a   : > { %1454 = vst.msk [vmem:[#allocation2 + $0xc1] sm:$0xff] %vm1282_vm0, %v1227_v26  ;;  %v1095_v30 = vmul.f32 %v5582_v39, %v869_v29  ;;  %v4299_v31 = vpop.f32.mrb[14].mxu0 }
 0x15b   : > { %v1168_v32 = vadd.f32 %v5587_v41, %v1097_v28  ;;  %v1098_v33 = vmul.f32 %v4299_v31, %v5582_v39  ;;  %v872_v34 = vpop.f32.mrb[15].mxu0 }
 0x15c   : > { %v1166_v35 = vadd.f32 %v5587_v41, %v1095_v30  ;;  %v1096_v36 = vmul.f32 %v5582_v39, %v872_v34  ;;  %v2191_v30 = vld [vmem:[#allocation2 + $0x11] sm:$0xff] }
 0x15d   : > { %v1232_v40 = vmax.f32 %v1168_v32, 0.0  ;;  %v1169_v42 = vadd.f32 %v5587_v41, %v1098_v33 }
 0x15e   : > { %v1230_v43 = vmax.f32 %v1166_v35, 0.0  ;;  %v1167_v44 = vadd.f32 %v5587_v41, %v1096_v36 }
 0x15f   : > { %1459 = vst.msk [vmem:[#allocation2 + $0x111] sm:$0xff] %vm1282_vm0, %v1232_v40  ;;  %v1233_v45 = vmax.f32 %v1169_v42, 0.0 }
 0x160   : > { %1457 = vst.msk [vmem:[#allocation2 + $0xf1] sm:$0xff] %vm1282_vm0, %v1230_v43  ;;  %v1231_v47 = vmax.f32 %v1167_v44, 0.0  ;;  %v4302_v48 = vpop.f32.mrb[16].mxu0 }
 0x161   : > { %1460 = vst.msk [vmem:[#allocation2 + $0x121] sm:$0xff] %vm1282_vm0, %v1233_v45  ;;  %v1101_v49 = vmul.f32 %v4302_v48, %v5582_v39  ;;  %v885_v50 = vpop.f32.mrb[17].mxu0 }
 0x162   : > { %1458 = vst.msk [vmem:[#allocation2 + $0x101] sm:$0xff] %vm1282_vm0, %v1231_v47  ;;  %v1099_v51 = vmul.f32 %v5582_v39, %v885_v50  ;;  %v4303_v52 = vpop.f32.mrb[18].mxu0 }
 0x163   : > { %v1172_v53 = vadd.f32 %v5587_v41, %v1101_v49  ;;  %v1102_v54 = vmul.f32 %v4303_v52, %v5582_v39  ;;  %v888_v55 = vpop.f32.mrb[19].mxu0 }
 0x164   : > { %v1170_v56 = vadd.f32 %v5587_v41, %v1099_v51  ;;  %v1100_v57 = vmul.f32 %v5582_v39, %v888_v55 }
 0x165   : > { %v1236_v58 = vmax.f32 %v1172_v53, 0.0  ;;  %v1173_v59 = vadd.f32 %v5587_v41, %v1102_v54 }
 0x166   : > { %v1234_v60 = vmax.f32 %v1170_v56, 0.0  ;;  %v1171_v61 = vadd.f32 %v5587_v41, %v1100_v57 }
 0x167   : > { %1463 = vst.msk [vmem:[#allocation2 + $0x171] sm:$0xff] %vm1282_vm0, %v1236_v58  ;;  %v1237_v62 = vmax.f32 %v1173_v59, 0.0 }
 0x168   : > { %1461 = vst.msk [vmem:[#allocation2 + $0x151] sm:$0xff] %vm1282_vm0, %v1234_v60  ;;  %v1235_v63 = vmax.f32 %v1171_v61, 0.0  ;;  %v4306_v1 = vpop.f32.mrb[20].mxu0  ;;  %v2020_v56 = vld [vmem:[#allocation2 + $0x120] sm:$0xff] }
 0x169   : > { %1464 = vst.msk [vmem:[#allocation2 + $0x181] sm:$0xff] %vm1282_vm0, %v1237_v62  ;;  %v1105_v2 = vmul.f32 %v4306_v1, %v5582_v39  ;;  %v901_v3 = vpop.f32.mrb[21].mxu0 }
 0x16a   : > { %1462 = vst.msk [vmem:[#allocation2 + $0x161] sm:$0xff] %vm1282_vm0, %v1235_v63  ;;  %v1103_v4 = vmul.f32 %v5582_v39, %v901_v3  ;;  %v4307_v5 = vpop.f32.mrb[22].mxu0 }
 0x16b   : > { %v1176_v6 = vadd.f32 %v5587_v41, %v1105_v2  ;;  %v1106_v7 = vmul.f32 %v4307_v5, %v5582_v39  ;;  %v904_v8 = vpop.f32.mrb[23].mxu0 }
 0x16c   : > { %v1174_v9 = vadd.f32 %v5587_v41, %v1103_v4  ;;  %v1104_v10 = vmul.f32 %v5582_v39, %v904_v8 }
 0x16d   : > { %v1240_v11 = vmax.f32 %v1176_v6, 0.0  ;;  %v1177_v12 = vadd.f32 %v5587_v41, %v1106_v7 }
 0x16e   : > { %v1238_v14 = vmax.f32 %v1174_v9, 0.0  ;;  %v1175_v15 = vadd.f32 %v5587_v41, %v1104_v10  ;;  %v5665_v21 = vld [vmem:[#allocation2 + $0x171] sm:$0xff] }
 0x16f   : > { %1467 = vst.msk [vmem:[#allocation2 + $0x1b1] sm:$0xff] %vm1282_vm0, %v1240_v11  ;;  %v1241_v16 = vmax.f32 %v1177_v12, 0.0  ;;  %v5661_v17 = vld [vmem:[#allocation2 + $0x151] sm:$0xff] }
 0x170   : > { %1465 = vst.msk [vmem:[#allocation2 + $0x191] sm:$0xff] %vm1282_vm0, %v1238_v14  ;;  %v1239_v18 = vmax.f32 %v1175_v15, 0.0  ;;  %v4310_v19 = vpop.f32.mrb[24].mxu0  ;;  %v1555_v20 = vpack.c.bf16 %v5661_v17, %v1539_v13  ;;  %v5667_v22 = vld [vmem:[#allocation2 + $0x181] sm:$0xff] }
 0x171   : > { %1468 = vst.msk [vmem:[#allocation2 + $0x1c1] sm:$0xff] %vm1282_vm0, %v1241_v16  ;;  %v1109_v23 = vmul.f32 %v4310_v19, %v5582_v39  ;;  %v917_v24 = vpop.f32.mrb[25].mxu0  ;;  %v5671_v25 = vld [vmem:[#allocation2 + $0x161] sm:$0xff] }
 0x172   : > { %1466 = vst.msk [vmem:[#allocation2 + $0x1a1] sm:$0xff] %vm1282_vm0, %v1239_v18  ;;  %v1107_v27 = vmul.f32 %v5582_v39, %v917_v24  ;;  %v4311_v28 = vpop.f32.mrb[26].mxu0  ;;  %4352 = vmatprep.mubr.msk.bf16.mxu0 %vm1282_vm0, %v1555_v20  ;;  %v1556_v29 = vpack.c.bf16 %v5665_v21, %v5671_v25  ;;  %v2018_v15 = vld [vmem:[#allocation2 + $0x100] sm:$0xff] }
 0x173   : > { %v1180_v31 = vadd.f32 %v5587_v41, %v1109_v23  ;;  %v1110_v32 = vmul.f32 %v4311_v28, %v5582_v39  ;;  %v920_v33 = vpop.f32.mrb[27].mxu0  ;;  %v2015_v28 = vld [vmem:[#allocation2 + $0xd0] sm:$0xff] }
 0x174   : > { %v1178_v34 = vadd.f32 %v5587_v41, %v1107_v27  ;;  %v1108_v35 = vmul.f32 %v5582_v39, %v920_v33  ;;  %4353 = vmatmul.mubr.msk.bf16.vlgmr.msra.gmra.mrb[64].mxu0 %vm1282_vm0, %v1556_v29 }
 0x175   : > { %v1244_v36 = vmax.f32 %v1180_v31, 0.0  ;;  %v1181_v40 = vadd.f32 %v5587_v41, %v1110_v32  ;;  %4369 = vmatpush3.bf16.msra.mxu0 %v5570_v37 }
 0x176   : > { %v1242_v42 = vmax.f32 %v1178_v34, 0.0  ;;  %v1179_v43 = vadd.f32 %v5587_v41, %v1108_v35  ;;  %4370 = vmatprep.subr.bf16.mxu0 %v5575_v38  ;;  %v5701_v52 = vld [vmem:[#allocation2 + $0x1b1] sm:$0xff] }
 0x177   : > { %1471 = vst.msk [vmem:[#allocation2 + $0x211] sm:$0xff] %vm1282_vm0, %v1244_v36  ;;  %v1245_v44 = vmax.f32 %v1181_v40, 0.0  ;;  %v5692_v45 = vld [vmem:[#allocation2 + $0x191] sm:$0xff] }
 0x178   : > { %1469 = vst.msk [vmem:[#allocation2 + $0x1f1] sm:$0xff] %vm1282_vm0, %v1242_v42  ;;  %v1243_v47 = vmax.f32 %v1179_v43, 0.0  ;;  %v4314_v48 = vpop.f32.mrb[28].mxu0  ;;  %v1557_v49 = vpack.c.bf16 %v5692_v45, %v5667_v22 }
 0x179   : > { %1472 = vst.msk [vmem:[#allocation2 + $0x221] sm:$0xff] %vm1282_vm0, %v1245_v44  ;;  %v1113_v37 = vmul.f32 %v4314_v48, %v5582_v39  ;;  %v933_v50 = vpop.f32.mrb[29].mxu0  ;;  %v5699_v51 = vld [vmem:[#allocation2 + $0x1a1] sm:$0xff]  ;;  %4371 = vmatpush3.bf16.msra.mxu0 %v5575_v38 }
 0x17a   : > { %1470 = vst.msk [vmem:[#allocation2 + $0x201] sm:$0xff] %vm1282_vm0, %v1243_v47  ;;  %v1111_v53 = vmul.f32 %v5582_v39, %v933_v50  ;;  %v4315_v54 = vpop.f32.mrb[30].mxu0  ;;  %4356 = vmatprep.mubr.msk.bf16.mxu0 %vm1282_vm0, %v1557_v49  ;;  %v1558_v55 = vpack.c.bf16 %v5701_v52, %v5699_v51 }
 0x17b   : > { %v1184_v57 = vadd.f32 %v5587_v41, %v1113_v37  ;;  %v1114_v58 = vmul.f32 %v4315_v54, %v5582_v39  ;;  %v936_v59 = vpop.f32.mrb[31].mxu0 }
 0x17c   : > { %v1182_v38 = vadd.f32 %v5587_v41, %v1111_v53  ;;  %v1112_v60 = vmul.f32 %v5582_v39, %v936_v59  ;;  %4357 = vmatmul.mubr.msk.bf16.gmra.mrb[68].mxu0 %vm1282_vm0, %v1558_v55 }
 0x17d   : > { %v1248_v61 = vmax.f32 %v1184_v57, 0.0  ;;  %v1185_v62 = vadd.f32 %v5587_v41, %v1114_v58  ;;  %v4793_v57 = vld [vmem:[#allocation6 + $0x28] sm:$0xff]  }
 0x17e   : > { %v1246_v63 = vmax.f32 %v1182_v38, 0.0  ;;  %v1183_v1 = vadd.f32 %v5587_v41, %v1112_v60  ;;  %v5719_v3 = vld [vmem:[#allocation2 + $0x210] sm:$0xff] }
 0x17f   : > { %1475 = vst.msk [vmem:[#allocation2 + $0x251] sm:$0xff] %vm1282_vm0, %v1248_v61  ;;  %v1249_v2 = vmax.f32 %v1185_v62, 0.0  ;;  %v5724_v7 = vld [vmem:[#allocation2 + $0x211] sm:$0xff] }
 0x180   : > { %1473 = vst.msk [vmem:[#allocation2 + $0x231] sm:$0xff] %vm1282_vm0, %v1246_v63  ;;  %v1247_v4 = vmax.f32 %v1183_v1, 0.0  ;;  %v4318_v5 = vpop.f32.mrb[32].mxu0  ;;  %v5722_v6 = vld [vmem:[#allocation2 + $0x220] sm:$0xff]  ;;  %v5730_v11 = vld [vmem:[#allocation2 + $0x1f0] sm:$0xff] }
 0x181   : > { %v5726_v8 = vld [vmem:[#allocation2 + $0x221] sm:$0xff]  ;;  %1476 = vst.msk [vmem:[#allocation2 + $0x261] sm:$0xff] %vm1282_vm0, %v1249_v2  ;;  %v1117_v9 = vmul.f32 %v4318_v5, %v5582_v39  ;;  %v949_v10 = vpop.f32.mrb[33].mxu0  ;;  %v2565_v14 = vpack.c.bf16 %v5722_v6, %v5719_v3  ;;  %v5742_v19 = vld [vmem:[#allocation2 + $0x1f1] sm:$0xff] }
 0x182   : > { %v5732_v12 = vld [vmem:[#allocation2 + $0x200] sm:$0xff]  ;;  %1474 = vst.msk [vmem:[#allocation2 + $0x241] sm:$0xff] %vm1282_vm0, %v1247_v4  ;;  %v1115_v16 = vmul.f32 %v5582_v39, %v949_v10  ;;  %v4319_v18 = vpop.f32.mrb[34].mxu0  ;;  %v5787_v10 = vld [vmem:[#allocation6 + $0x30] sm:$0xff]  }
 0x183   : > { %v5734_v13 = vld [vmem:[#allocation2 + $0x201] sm:$0xff]  ;;  %v2564_v20 = vpack.c.bf16 %v5732_v12, %v5730_v11  ;;  %v1188_v23 = vadd.f32 %v5587_v41, %v1117_v9  ;;  %v1118_v24 = vmul.f32 %v4319_v18, %v5582_v39  ;;  %v952_v27 = vpop.f32.mrb[35].mxu0  ;;  %v2013_v62 = vld [vmem:[#allocation2 + $0xb0] sm:$0xff] }
 0x184   : > { %v1186_v29 = vadd.f32 %v5587_v41, %v1115_v16  ;;  %v1116_v31 = vmul.f32 %v5582_v39, %v952_v27  ;;  %v1851_v0 = vpack.c.bf16 %v5724_v7, %v5734_v13 }
 0x185   : > { %v1252_v32 = vmax.f32 %v1188_v23, 0.0  ;;  %v1189_v33 = vadd.f32 %v5587_v41, %v1118_v24 }
 0x186   : > { %v1250_v34 = vmax.f32 %v1186_v29, 0.0  ;;  %v1187_v35 = vadd.f32 %v5587_v41, %v1116_v31  ;;  %v5764_v37 = vld [vmem:[#allocation2 + $0x250] sm:$0xff] }
 0x187   : > { %1479 = vst.msk [vmem:[#allocation2 + $0x2b1] sm:$0xff] %vm1282_vm0, %v1252_v32  ;;  %v1253_v36 = vmax.f32 %v1189_v33, 0.0  ;;  %v5755_v40 = vld [vmem:[#allocation2 + $0x230] sm:$0xff] }
 0x188   : > { %1477 = vst.msk [vmem:[#allocation2 + $0x291] sm:$0xff] %vm1282_vm0, %v1250_v34  ;;  %v1251_v42 = vmax.f32 %v1187_v35, 0.0  ;;  %v4322_v43 = vpop.f32.mrb[36].mxu0  ;;  %v1528_v44 = vpack.c.bf16 %v5755_v40, %v5722_v6  ;;  %v5773_v58 = vld [vmem:[#allocation2 + $0x231] sm:$0xff] }
 0x189   : > { %1480 = vst.msk [vmem:[#allocation2 + $0x2c1] sm:$0xff] %vm1282_vm0, %v1253_v36  ;;  %v1121_v47 = vmul.f32 %v4322_v43, %v5582_v39  ;;  %v965_v48 = vpop.f32.mrb[37].mxu0  ;;  %v5762_v49 = vld [vmem:[#allocation2 + $0x240] sm:$0xff] }
 0x18a   : > { %v5766_v50 = vld [vmem:[#allocation2 + $0x241] sm:$0xff]  ;;  %1478 = vst.msk [vmem:[#allocation2 + $0x2a1] sm:$0xff] %vm1282_vm0, %v1251_v42  ;;  %v1119_v53 = vmul.f32 %v5582_v39, %v965_v48  ;;  %v4323_v54 = vpop.f32.mrb[38].mxu0  ;;  %4376 = vmatprep.mubr.msk.bf16.mxu1 %vm1282_vm0, %v1528_v44  ;;  %v1529_v55 = vpack.c.bf16 %v5764_v37, %v5762_v49  ;;  %v2566_v59 = vpack.c.bf16 %v5762_v49, %v5755_v40 }
 0x18b   : > { %v1192_v38 = vadd.f32 %v5587_v41, %v1121_v47  ;;  %v1122_v60 = vmul.f32 %v4323_v54, %v5582_v39  ;;  %v968_v61 = vpop.f32.mrb[39].mxu0  ;;  %v4805_v40 = vld [vmem:[#allocation6 + $0x88] sm:$0xff]   ;;  %v6608_v49 = vpack.c.bf16 %v5667_v22, %v5665_v21 }
 0x18c   : > { %v1190_v63 = vadd.f32 %v5587_v41, %v1119_v53  ;;  %v1120_v1 = vmul.f32 %v5582_v39, %v968_v61  ;;  %4377 = vmatmul.mubr.msk.bf16.vlgmr.msra.gmra.mrb[0].mxu1 %vm1282_vm0, %v1529_v55 }
 0x18d   : > { %v1256_v2 = vmax.f32 %v1192_v38, 0.0  ;;  %v1193_v4 = vadd.f32 %v5587_v41, %v1122_v60  ;;  %4389 = vmatpush3.bf16.msra.mxu1 %v5591_v46 }
 0x18e   : > { %v1254_v5 = vmax.f32 %v1190_v63, 0.0  ;;  %v1191_v9 = vadd.f32 %v5587_v41, %v1120_v1  ;;  %4390 = vmatprep.subr.bf16.mxu1 %v4793_v57 }
 0x18f   : > { %1483 = vst.msk [vmem:[#allocation2 + $0x2f1] sm:$0xff] %vm1282_vm0, %v1256_v2  ;;  %v1257_v16 = vmax.f32 %v1193_v4, 0.0 }
 0x190   : > { %1481 = vst.msk [vmem:[#allocation2 + $0x2d1] sm:$0xff] %vm1282_vm0, %v1254_v5  ;;  %v1255_v18 = vmax.f32 %v1191_v9, 0.0  ;;  %v4326_v23 = vpop.f32.mrb[40].mxu0 }
 0x191   : > { %1484 = vst.msk [vmem:[#allocation2 + $0x301] sm:$0xff] %vm1282_vm0, %v1257_v16  ;;  %v1125_v24 = vmul.f32 %v4326_v23, %v5582_v39  ;;  %v981_v27 = vpop.f32.mrb[41].mxu0  ;;  %4391 = vmatpush3.bf16.msra.mxu1 %v4793_v57 }
 0x192   : > { %1482 = vst.msk [vmem:[#allocation2 + $0x2e1] sm:$0xff] %vm1282_vm0, %v1255_v18  ;;  %v1123_v46 = vmul.f32 %v5582_v39, %v981_v27  ;;  %v4327_v29 = vpop.f32.mrb[42].mxu0  ;;  %4408 = vmatprep.subr.bf16.mxu1 %v5787_v10 }
 0x193   : > { %v1196_v31 = vadd.f32 %v5587_v41, %v1125_v24  ;;  %v1126_v32 = vmul.f32 %v4327_v29, %v5582_v39  ;;  %v984_v33 = vpop.f32.mrb[43].mxu0 }
 0x194   : > { %v1194_v34 = vadd.f32 %v5587_v41, %v1123_v46  ;;  %v1124_v35 = vmul.f32 %v5582_v39, %v984_v33 }
 0x195   : > { %v1260_v36 = vmax.f32 %v1196_v31, 0.0  ;;  %v1197_v42 = vadd.f32 %v5587_v41, %v1126_v32 }
 0x196   : > { %v1258_v43 = vmax.f32 %v1194_v34, 0.0  ;;  %v1195_v44 = vadd.f32 %v5587_v41, %v1124_v35 }
 0x197   : > { %1487 = vst.msk [vmem:[#allocation2 + $0x351] sm:$0xff] %vm1282_vm0, %v1260_v36  ;;  %v1261_v47 = vmax.f32 %v1197_v42, 0.0 }
 0x198   : > { %1485 = vst.msk [vmem:[#allocation2 + $0x331] sm:$0xff] %vm1282_vm0, %v1258_v43  ;;  %v1259_v48 = vmax.f32 %v1195_v44, 0.0  ;;  %v4330_v53 = vpop.f32.mrb[44].mxu0 }
 0x199   : > { %1488 = vst.msk [vmem:[#allocation2 + $0x361] sm:$0xff] %vm1282_vm0, %v1261_v47  ;;  %v1129_v54 = vmul.f32 %v4330_v53, %v5582_v39  ;;  %v997_v55 = vpop.f32.mrb[45].mxu0 }
 0x19a   : > { %1486 = vst.msk [vmem:[#allocation2 + $0x341] sm:$0xff] %vm1282_vm0, %v1259_v48  ;;  %v1127_v57 = vmul.f32 %v5582_v39, %v997_v55  ;;  %v4331_v38 = vpop.f32.mrb[46].mxu0 }
 0x19b   : > { %v1200_v60 = vadd.f32 %v5587_v41, %v1129_v54  ;;  %v1130_v61 = vmul.f32 %v4331_v38, %v5582_v39  ;;  %v1000_v63 = vpop.f32.mrb[47].mxu0 }
 0x19c   : > { %v1198_v1 = vadd.f32 %v5587_v41, %v1127_v57  ;;  %v1128_v2 = vmul.f32 %v5582_v39, %v1000_v63 }
 0x19d   : > { %v1264_v4 = vmax.f32 %v1200_v60, 0.0  ;;  %v1201_v5 = vadd.f32 %v5587_v41, %v1130_v61 }
 0x19e   : > { %v1262_v9 = vmax.f32 %v1198_v1, 0.0  ;;  %v1199_v16 = vadd.f32 %v5587_v41, %v1128_v2 }
 0x19f   : > { %1491 = vst.msk [vmem:[#allocation2 + $0x391] sm:$0xff] %vm1282_vm0, %v1264_v4  ;;  %v1265_v18 = vmax.f32 %v1201_v5, 0.0 }
 0x1a0   : > { %1489 = vst.msk [vmem:[#allocation2 + $0x371] sm:$0xff] %vm1282_vm0, %v1262_v9  ;;  %v1263_v23 = vmax.f32 %v1199_v16, 0.0  ;;  %v4334_v24 = vpop.f32.mrb[48].mxu0  ;;  %v1547_v16 = vld [vmem:[#allocation2 + $0x3c1] sm:$0xff] }
 0x1a1   : > { %1492 = vst.msk [vmem:[#allocation2 + $0x3a1] sm:$0xff] %vm1282_vm0, %v1265_v18  ;;  %v1133_v27 = vmul.f32 %v4334_v24, %v5582_v39  ;;  %v1013_v46 = vpop.f32.mrb[49].mxu0 }
 0x1a2   : > { %1490 = vst.msk [vmem:[#allocation2 + $0x381] sm:$0xff] %vm1282_vm0, %v1263_v23  ;;  %v1131_v29 = vmul.f32 %v5582_v39, %v1013_v46  ;;  %v4335_v31 = vpop.f32.mrb[50].mxu0 }
 0x1a3   : > { %v1204_v32 = vadd.f32 %v5587_v41, %v1133_v27  ;;  %v1134_v33 = vmul.f32 %v4335_v31, %v5582_v39  ;;  %v1016_v34 = vpop.f32.mrb[51].mxu0 }
 0x1a4   : > { %v1202_v35 = vadd.f32 %v5587_v41, %v1131_v29  ;;  %v1132_v36 = vmul.f32 %v5582_v39, %v1016_v34 }
 0x1a5   : > { %v1268_v42 = vmax.f32 %v1204_v32, 0.0  ;;  %v1205_v43 = vadd.f32 %v5587_v41, %v1134_v33 }
 0x1a6   : > { %v1266_v44 = vmax.f32 %v1202_v35, 0.0  ;;  %v1203_v47 = vadd.f32 %v5587_v41, %v1132_v36 }
 0x1a7   : > { %1495 = vst.msk [vmem:[#allocation2 + $0x3f1] sm:$0xff] %vm1282_vm0, %v1268_v42  ;;  %v1269_v48 = vmax.f32 %v1205_v43, 0.0  ;;  %v2017_v42 = vld [vmem:[#allocation2 + $0xf0] sm:$0xff] }
 0x1a8   : > { %1493 = vst.msk [vmem:[#allocation2 + $0x3d1] sm:$0xff] %vm1282_vm0, %v1266_v44  ;;  %v1267_v53 = vmax.f32 %v1203_v47, 0.0  ;;  %v4338_v54 = vpop.f32.mrb[52].mxu0 }
 0x1a9   : > { %1496 = vst.msk [vmem:[#allocation2 + $0x401] sm:$0xff] %vm1282_vm0, %v1269_v48  ;;  %v1137_v55 = vmul.f32 %v4338_v54, %v5582_v39  ;;  %v1029_v57 = vpop.f32.mrb[53].mxu0  ;;  %v2031_v48 = vpack.c.bf16 %v2018_v15, %v2017_v42  ;;  %v2024_v15 = vld [vmem:[#allocation2 + $0x360] sm:$0xff]  ;;  %v2023_v42 = vld [vmem:[#allocation2 + $0x350] sm:$0xff] }
 0x1aa   : > { %1494 = vst.msk [vmem:[#allocation2 + $0x3e1] sm:$0xff] %vm1282_vm0, %v1267_v53  ;;  %v1135_v38 = vmul.f32 %v5582_v39, %v1029_v57  ;;  %v4339_v60 = vpop.f32.mrb[54].mxu0 }
 0x1ab   : > { %v1208_v61 = vadd.f32 %v5587_v41, %v1137_v55  ;;  %v1138_v63 = vmul.f32 %v4339_v60, %v5582_v39  ;;  %v1032_v1 = vpop.f32.mrb[55].mxu0 }
 0x1ac   : > { %v1206_v2 = vadd.f32 %v5587_v41, %v1135_v38  ;;  %v1136_v4 = vmul.f32 %v5582_v39, %v1032_v1 }
 0x1ad   : > { %v1272_v5 = vmax.f32 %v1208_v61, 0.0  ;;  %v1209_v9 = vadd.f32 %v5587_v41, %v1138_v63 }
 0x1ae   : > { %v1270_v18 = vmax.f32 %v1206_v2, 0.0  ;;  %v1207_v23 = vadd.f32 %v5587_v41, %v1136_v4  ;;  %v5843_v32 = vld [vmem:[#allocation2 + $0x3f1] sm:$0xff] }
 0x1af   : > { %1499 = vst.msk [vmem:[#allocation2 + $0x431] sm:$0xff] %vm1282_vm0, %v1272_v5  ;;  %v1273_v24 = vmax.f32 %v1209_v9, 0.0  ;;  %v5839_v27 = vld [vmem:[#allocation2 + $0x3d1] sm:$0xff] }
 0x1b0   : > { %1497 = vst.msk [vmem:[#allocation2 + $0x411] sm:$0xff] %vm1282_vm0, %v1270_v18  ;;  %v1271_v46 = vmax.f32 %v1207_v23, 0.0  ;;  %v4342_v29 = vpop.f32.mrb[56].mxu0  ;;  %v1559_v31 = vpack.c.bf16 %v5839_v27, %v1547_v16  ;;  %v5845_v33 = vld [vmem:[#allocation2 + $0x401] sm:$0xff] }
 0x1b1   : > { %1500 = vst.msk [vmem:[#allocation2 + $0x441] sm:$0xff] %vm1282_vm0, %v1273_v24  ;;  %v1141_v34 = vmul.f32 %v4342_v29, %v5582_v39  ;;  %v1045_v35 = vpop.f32.mrb[57].mxu0  ;;  %v5849_v36 = vld [vmem:[#allocation2 + $0x3e1] sm:$0xff]  ;;  %v6611_v21 = vpack.c.bf16 %v5845_v33, %v5843_v32 }
 0x1b2   : > { %1498 = vst.msk [vmem:[#allocation2 + $0x421] sm:$0xff] %vm1282_vm0, %v1271_v46  ;;  %v1139_v43 = vmul.f32 %v5582_v39, %v1045_v35  ;;  %v4343_v44 = vpop.f32.mrb[58].mxu0  ;;  %4360 = vmatprep.mubr.msk.bf16.mxu0 %vm1282_vm0, %v1559_v31  ;;  %v1560_v47 = vpack.c.bf16 %v5843_v32, %v5849_v36  ;;  %v1510_v18 = vld [vmem:[#allocation2 + $0x1e0] sm:$0xff]  ;;  %v6613_v32 = vpack.c.bf16 %v5734_v13, %v5742_v19 }
 0x1b3   : > { %v1212_v53 = vadd.f32 %v5587_v41, %v1141_v34  ;;  %v1142_v54 = vmul.f32 %v4343_v44, %v5582_v39  ;;  %v1048_v55 = vpop.f32.mrb[59].mxu0 }
 0x1b4   : > { %v1210_v57 = vadd.f32 %v5587_v41, %v1139_v43  ;;  %v1140_v38 = vmul.f32 %v5582_v39, %v1048_v55  ;;  %4361 = vmatmul.mubr.msk.bf16.gmra.mrb[72].mxu0 %vm1282_vm0, %v1560_v47 }
 0x1b5   : > { %v1276_v60 = vmax.f32 %v1212_v53, 0.0  ;;  %v1213_v61 = vadd.f32 %v5587_v41, %v1142_v54  ;;  %v1526_v54 = vpack.c.bf16 %v5730_v11, %v1510_v18  ;;  %v4804_v11 = vld [vmem:[#allocation6 + $0x80] sm:$0xff]  }
 0x1b6   : > { %v1274_v63 = vmax.f32 %v1210_v57, 0.0  ;;  %v1211_v1 = vadd.f32 %v5587_v41, %v1140_v38  ;;  %v5877_v29 = vld [vmem:[#allocation2 + $0x431] sm:$0xff] }
 0x1b7   : > { %1503 = vst.msk [vmem:[#allocation2 + $0x491] sm:$0xff] %vm1282_vm0, %v1276_v60  ;;  %v1277_v2 = vmax.f32 %v1213_v61, 0.0  ;;  %v5868_v4 = vld [vmem:[#allocation2 + $0x411] sm:$0xff]  ;;  %v1518_v61 = vld [vmem:[#allocation2 + $0x460] sm:$0xff] }
 0x1b8   : > { %1501 = vst.msk [vmem:[#allocation2 + $0x471] sm:$0xff] %vm1282_vm0, %v1274_v63  ;;  %v1275_v5 = vmax.f32 %v1211_v1, 0.0  ;;  %v4346_v9 = vpop.f32.mrb[60].mxu0  ;;  %v1561_v16 = vpack.c.bf16 %v5868_v4, %v5845_v33 }
 0x1b9   : > { %1504 = vst.msk [vmem:[#allocation2 + $0x4a1] sm:$0xff] %vm1282_vm0, %v1277_v2  ;;  %v1145_v23 = vmul.f32 %v4346_v9, %v5582_v39  ;;  %v1061_v24 = vpop.f32.mrb[61].mxu0  ;;  %v5875_v46 = vld [vmem:[#allocation2 + $0x421] sm:$0xff] }
 0x1ba   : > { %1502 = vst.msk [vmem:[#allocation2 + $0x481] sm:$0xff] %vm1282_vm0, %v1275_v5  ;;  %v1143_v31 = vmul.f32 %v5582_v39, %v1061_v24  ;;  %v4347_v34 = vpop.f32.mrb[62].mxu0  ;;  %4364 = vmatprep.mubr.msk.bf16.mxu0 %vm1282_vm0, %v1561_v16  ;;  %v1562_v35 = vpack.c.bf16 %v5877_v29, %v5875_v46  ;;  %v6612_v22 = vpack.c.bf16 %v5875_v46, %v5868_v4 }
 0x1bb   : > { %v1216_v44 = vadd.f32 %v5587_v41, %v1145_v23  ;;  %v1146_v47 = vmul.f32 %v4347_v34, %v5582_v39  ;;  %v1064_v53 = vpop.f32.mrb[63].mxu0 }
 0x1bc   : > { %v1214_v55 = vadd.f32 %v5587_v41, %v1143_v31  ;;  %v1144_v57 = vmul.f32 %v5582_v39, %v1064_v53  ;;  %4365 = vmatmul.mubr.msk.bf16.gmra.mrb[76].mxu0 %vm1282_vm0, %v1562_v35 }
 0x1bd   : > { %v1280_v38 = vmax.f32 %v1216_v44, 0.0  ;;  %v1217_v60 = vadd.f32 %v5587_v41, %v1146_v47  ;;  %4372 = vmatprep.mubr.msk.bf16.mxu0 %vm1282_vm0, %v1526_v54  ;;  %v1527_v47 = vpack.c.bf16 %v5719_v3, %v5732_v12  ;;  %v4795_v44 = vld [vmem:[#allocation6 + $0x38] sm:$0xff]   ;;  %v2555_v12 = vld [vmem:[#allocation2 + $0x260] sm:$0xff] }
 0x1be   : > { %v1278_v63 = vmax.f32 %v1214_v55, 0.0  ;;  %v1215_v1 = vadd.f32 %v5587_v41, %v1144_v57  ;;  %v5898_v9 = vld [vmem:[#allocation2 + $0x490] sm:$0xff] }
 0x1bf   : > { %1507 = vst.msk [vmem:[#allocation2 + $0x4d1] sm:$0xff] %vm1282_vm0, %v1280_v38  ;;  %v1281_v2 = vmax.f32 %v1217_v60, 0.0  ;;  %v5896_v5 = vld [vmem:[#allocation2 + $0x470] sm:$0xff] }
 0x1c0   : > { %1505 = vst.msk [vmem:[#allocation2 + $0x4b1] sm:$0xff] %vm1282_vm0, %v1278_v63  ;;  %v1279_v39 = vmax.f32 %v1215_v1, 0.0  ;;  %v1530_v16 = vpack.c.bf16 %v5896_v5, %v1518_v61  ;;  %v5902_v18 = vld [vmem:[#allocation2 + $0x4a0] sm:$0xff]  ;;  %v5904_v23 = vld [vmem:[#allocation2 + $0x491] sm:$0xff] }
 0x1c1   : > { %v5906_v24 = vld [vmem:[#allocation2 + $0x4a1] sm:$0xff]  ;;  %1508 = vst.msk [vmem:[#allocation2 + $0x4e1] sm:$0xff] %vm1282_vm0, %v1281_v2  ;;  %v5911_v31 = vld [vmem:[#allocation2 + $0x471] sm:$0xff]  ;;  %v2569_v35 = vpack.c.bf16 %v5902_v18, %v5898_v9 }
 0x1c2   : > { %v5909_v41 = vld [vmem:[#allocation2 + $0x480] sm:$0xff]  ;;  %1506 = vst.msk [vmem:[#allocation2 + $0x4c1] sm:$0xff] %vm1282_vm0, %v1279_v39  ;;  %4380 = vmatprep.mubr.msk.bf16.mxu1 %vm1282_vm0, %v1530_v16  ;;  %v5960_v55 = vld [vmem:[#allocation2 + $0x251] sm:$0xff] }
 0x1c3   : > { %v5913_v34 = vld [vmem:[#allocation2 + $0x481] sm:$0xff]  ;;  %v1531_v53 = vpack.c.bf16 %v5898_v9, %v5909_v41  ;;  %v2568_v54 = vpack.c.bf16 %v5909_v41, %v5896_v5 }
 0x1c4   : > { %4373 = vmatmul.mubr.msk.bf16.vlgmr.msra.gmra.mrb[64].mxu0 %vm1282_vm0, %v1527_v47  ;;  %v1834_v61 = vld [vmem:[#allocation2 + $0x1e1] sm:$0xff] }
 0x1c5   : > { %4381 = vmatmul.mubr.msk.bf16.gmra.mrb[4].mxu1 %vm1282_vm0, %v1531_v53  ;;  %v1850_v53 = vpack.c.bf16 %v5742_v19, %v1834_v61  ;;  %v4796_v47 = vld [vmem:[#allocation6 + $0x40] sm:$0xff]  }
 0x1c6   : > { %v5935_v60 = vld [vmem:[#allocation2 + $0x4d0] sm:$0xff]  ;;  %v1842_v61 = vld [vmem:[#allocation2 + $0x461] sm:$0xff] }
 0x1c7   : > { %v5931_v57 = vld [vmem:[#allocation2 + $0x4b0] sm:$0xff]  ;;  %v2912_v19 = vld [vmem:[#allocation2 + $0x261] sm:$0xff] }
 0x1c8   : > { %v1532_v38 = vpack.c.bf16 %v5931_v57, %v5902_v18  ;;  %v5939_v1 = vld [vmem:[#allocation2 + $0x4b1] sm:$0xff]  ;;  %v2563_v3 = vld [vmem:[#allocation2 + $0x4e0] sm:$0xff]  ;;  %v6614_v18 = vpack.c.bf16 %v5726_v8, %v5724_v7  ;;  %v6617_v7 = vpack.c.bf16 %v5906_v24, %v5904_v23 }
 0x1c9   : > { %v5937_v63 = vld [vmem:[#allocation2 + $0x4c0] sm:$0xff]  ;;  %v2571_v6 = vpack.c.bf16 %v2563_v3, %v5935_v60 }
 0x1ca   : > { %v5941_v2 = vld [vmem:[#allocation2 + $0x4c1] sm:$0xff]  ;;  %4384 = vmatprep.mubr.msk.bf16.mxu1 %vm1282_vm0, %v1532_v38  ;;  %v1533_v39 = vpack.c.bf16 %v5935_v60, %v5937_v63  ;;  %v2570_v16 = vpack.c.bf16 %v5937_v63, %v5931_v57  ;;  %v1852_v38 = vpack.c.bf16 %v5773_v58, %v5726_v8  ;;  %v2924_v57 = vpack.c.bf16 %v2912_v19, %v5960_v55  ;;  %v3193_v63 = vld [vmem:[%s6561_s7 + $0x18] sm:$0xff] }
 0x1cb   : > { %v6616_v60 = vpack.c.bf16 %v5913_v34, %v5911_v31  ;;  %v6618_v8 = vpack.c.bf16 %v5941_v2, %v5939_v1 }
 0x1cd   : > { %4385 = vmatmul.mubr.msk.bf16.gmra.mrb[8].mxu1 %vm1282_vm0, %v1533_v39  ;;  %v1853_v39 = vpack.c.bf16 %v5960_v55, %v5766_v50 }
 0x1ce   : > { %4392 = vmatprep.mubr.msk.bf16.mxu1 %vm1282_vm0, %v1850_v53  ;;  %v1854_v53 = vpack.c.bf16 %v5911_v31, %v1842_v61  ;;  %v3190_v31 = vld [vmem:[%s6561_s7] sm:$0xff] }
 0x1d5   : > { %4393 = vmatmul.mubr.msk.bf16.vlgmr.msra.gmra.mrb[12].mxu1 %vm1282_vm0, %v1851_v0  ;;  %v1855_v0 = vpack.c.bf16 %v5904_v23, %v5913_v34  ;;  %v3191_v23 = vld [vmem:[%s6561_s7 + $0x8] sm:$0xff]  ;;  %v4950_v34 = vmov 0.0|0.0  }
 0x1d6   : > { %4409 = vmatpush3.bf16.msra.mxu1 %v5787_v10  ;;  %4396 = vmatprep.mubr.msk.bf16.mxu1 %vm1282_vm0, %v1852_v38  ;;  %v1856_v10 = vpack.c.bf16 %v5939_v1, %v5906_v24  ;;  %v5973_v38 = vld [vmem:[#allocation2 + $0x4d1] sm:$0xff]  ;;  %v4583_v55 = vpack.c.bf16 %v3191_v23, %v3190_v31  ;;  %v6619_v1 = vmov 0.0  }
 0x1d7   : > { %4410 = vmatprep.subr.bf16.mxu1 %v4795_v44  ;;  %v1857_v61 = vpack.c.bf16 %v5973_v38, %v5941_v2  ;;  %v3192_v24 = vld [vmem:[%s6561_s7 + $0x10] sm:$0xff]  ;;  %4582 = vmatprep.subr.bf16.mxu0 %v4950_v34 }
 0x1d8   : > { %4536 = vmatprep.mubr.msk.f32.mxu0 %vm4951_vm3, %v6619_v1  ;;  %4584 = vmatpush3.bf16.msra.mxu0 %v4583_v55  ;;  %v4586_v2 = vpack.c.bf16 %v3193_v63, %v3192_v24 }
 0x1d9   : > { %4585 = vmatprep.subr.bf16.mxu0 %v4950_v34 }
 0x1da   : > { %4411 = vmatpush3.bf16.msra.mxu1 %v4795_v44  ;;  %v2014_v44 = vld [vmem:[#allocation2 + $0xc0] sm:$0xff] }
 0x1db   : > { %4428 = vmatprep.subr.bf16.mxu1 %v4796_v47 }
 0x1dc   : > { %4587 = vmatpush3.bf16.msra.mxu0 %v4586_v2 }
 0x1dd   : > { %4397 = vmatmul.mubr.msk.bf16.gmra.mrb[0].mxu1 %vm1282_vm0, %v1853_v39  ;;  %v2029_v39 = vpack.c.bf16 %v2014_v44, %v2013_v62  ;;  %v2022_v62 = vld [vmem:[#allocation2 + $0x340] sm:$0xff]  ;;  %v2019_v44 = vld [vmem:[#allocation2 + $0x110] sm:$0xff]  ;;  %4539 = vmatprep.subr.mxu0 %v6619_v1 }
 0x1de   : > { %4400 = vmatprep.mubr.msk.bf16.mxu1 %vm1282_vm0, %v1854_v53  ;;  %v2016_v53 = vld [vmem:[#allocation2 + $0xe0] sm:$0xff] }
 0x1df   : > { %v2030_v43 = vpack.c.bf16 %v2016_v53, %v2015_v28  ;;  %v2026_v28 = vld [vmem:[#allocation2 + $0x380] sm:$0xff] }
 0x1e0   : > { %v2028_v53 = vld [vmem:[#allocation2 + $0x3a0] sm:$0xff] }
 0x1e5   : > { %4401 = vmatmul.mubr.msk.bf16.gmra.mrb[4].mxu1 %vm1282_vm0, %v1855_v0  ;;  %v4797_v0 = vld [vmem:[#allocation6 + $0x48] sm:$0xff]  }
 0x1e6   : > { %4404 = vmatprep.mubr.msk.bf16.mxu1 %vm1282_vm0, %v1856_v10  ;;  %v4798_v10 = vld [vmem:[#allocation6 + $0x50] sm:$0xff]  }
 0x1ed   : > { %4405 = vmatmul.mubr.msk.bf16.gmra.mrb[8].mxu1 %vm1282_vm0, %v1857_v61  ;;  %v2032_v61 = vpack.c.bf16 %v2020_v56, %v2019_v44  ;;  %v2027_v56 = vld [vmem:[#allocation2 + $0x390] sm:$0xff] }
 0x1ee   : > { %4412 = vmatprep.mubr.msk.bf16.mxu1 %vm1282_vm0, %v2029_v39  ;;  %v2021_v39 = vld [vmem:[#allocation2 + $0x330] sm:$0xff]  ;;  %v2036_v44 = vpack.c.bf16 %v2028_v53, %v2027_v56 }
 0x1ef   : > { %v2033_v26 = vpack.c.bf16 %v2022_v62, %v2021_v39  ;;  %v2193_v39 = vld [vmem:[#allocation2 + $0x31] sm:$0xff] }
 0x1f0   : > { %v2197_v53 = vld [vmem:[#allocation2 + $0x71] sm:$0xff] }
 0x1f1   : > { %v2199_v56 = vld [vmem:[#allocation2 + $0x291] sm:$0xff] }
 0x1f5   : > { %4413 = vmatmul.mubr.msk.bf16.vlgmr.msra.gmra.mrb[12].mxu1 %vm1282_vm0, %v2030_v43  ;;  %v2034_v43 = vpack.c.bf16 %v2024_v15, %v2023_v42  ;;  %v2195_v42 = vld [vmem:[#allocation2 + $0x51] sm:$0xff] }
 0x1f6   : > { %4429 = vmatpush3.bf16.msra.mxu1 %v4796_v47  ;;  %4416 = vmatprep.mubr.msk.bf16.mxu1 %vm1282_vm0, %v2031_v48  ;;  %v2025_v47 = vld [vmem:[#allocation2 + $0x370] sm:$0xff] }
 0x1f7   : > { %4430 = vmatprep.subr.bf16.mxu1 %v4797_v0  ;;  %v2035_v48 = vpack.c.bf16 %v2026_v28, %v2025_v47  ;;  %v4799_v28 = vld [vmem:[#allocation6 + $0x58] sm:$0xff]  }
 0x1fa   : > { %4431 = vmatpush3.bf16.msra.mxu1 %v4797_v0  ;;  %v2192_v0 = vld [vmem:[#allocation2 + $0x21] sm:$0xff] }
 0x1fb   : > { %4448 = vmatprep.subr.bf16.mxu1 %v4798_v10  ;;  %v2207_v62 = vpack.c.bf16 %v2192_v0, %v2191_v30  ;;  %v2200_v30 = vld [vmem:[#allocation2 + $0x2a1] sm:$0xff] }
 0x1fd   : > { %4417 = vmatmul.mubr.msk.bf16.gmra.mrb[0].mxu1 %vm1282_vm0, %v2032_v61  ;;  %v2196_v61 = vld [vmem:[#allocation2 + $0x61] sm:$0xff] }
 0x1fe   : > { %4420 = vmatprep.mubr.msk.bf16.mxu1 %vm1282_vm0, %v2033_v26  ;;  %v2194_v26 = vld [vmem:[#allocation2 + $0x41] sm:$0xff]  ;;  %v2209_v47 = vpack.c.bf16 %v2196_v61, %v2195_v42  ;;  %v2201_v61 = vld [vmem:[#allocation2 + $0x2b1] sm:$0xff] }
 0x1ff   : > { %v2208_v15 = vpack.c.bf16 %v2194_v26, %v2193_v39  ;;  %v2204_v26 = vld [vmem:[#allocation2 + $0x2e1] sm:$0xff]  ;;  %v2203_v39 = vld [vmem:[#allocation2 + $0x2d1] sm:$0xff] }
 0x200   : > { %v2206_v42 = vld [vmem:[#allocation2 + $0x301] sm:$0xff] }
 0x205   : > { %4421 = vmatmul.mubr.msk.bf16.gmra.mrb[4].mxu1 %vm1282_vm0, %v2034_v43  ;;  %v4800_v43 = vld [vmem:[#allocation6 + $0x60] sm:$0xff]  }
 0x206   : > { %4424 = vmatprep.mubr.msk.bf16.mxu1 %vm1282_vm0, %v2035_v48  ;;  %v2198_v48 = vld [vmem:[#allocation2 + $0x81] sm:$0xff] }
 0x207   : > { %v2210_v0 = vpack.c.bf16 %v2198_v48, %v2197_v53  ;;  %v2369_v53 = vld [vmem:[#allocation2 + $0xb1] sm:$0xff] }
 0x20d   : > { %4425 = vmatmul.mubr.msk.bf16.gmra.mrb[8].mxu1 %vm1282_vm0, %v2036_v44  ;;  %v2211_v44 = vpack.c.bf16 %v2200_v30, %v2199_v56  ;;  %v2374_v56 = vld [vmem:[#allocation2 + $0x101] sm:$0xff] }
 0x20e   : > { %4432 = vmatprep.mubr.msk.bf16.mxu1 %vm1282_vm0, %v2207_v62  ;;  %v2202_v62 = vld [vmem:[#allocation2 + $0x2c1] sm:$0xff] }
 0x215   : > { %4433 = vmatmul.mubr.msk.bf16.vlgmr.msra.gmra.mrb[12].mxu1 %vm1282_vm0, %v2208_v15  ;;  %v2213_v15 = vpack.c.bf16 %v2204_v26, %v2203_v39  ;;  %v4801_v26 = vld [vmem:[#allocation6 + $0x68] sm:$0xff]  }
 0x216   : > { %4449 = vmatpush3.bf16.msra.mxu1 %v4798_v10  ;;  %4436 = vmatprep.mubr.msk.bf16.mxu1 %vm1282_vm0, %v2209_v47  ;;  %v2212_v10 = vpack.c.bf16 %v2202_v62, %v2201_v61  ;;  %v2205_v47 = vld [vmem:[#allocation2 + $0x2f1] sm:$0xff] }
 0x217   : > { %4450 = vmatprep.subr.bf16.mxu1 %v4799_v28  ;;  %v2214_v48 = vpack.c.bf16 %v2206_v42, %v2205_v47  ;;  %v2373_v61 = vld [vmem:[#allocation2 + $0xf1] sm:$0xff]  ;;  %v2378_v42 = vld [vmem:[#allocation2 + $0x341] sm:$0xff] }
 0x218   : > { %v2387_v39 = vpack.c.bf16 %v2374_v56, %v2373_v61  ;;  %v2379_v56 = vld [vmem:[#allocation2 + $0x351] sm:$0xff]  ;;  %v2384_v61 = vld [vmem:[#allocation2 + $0x3a1] sm:$0xff] }
 0x21a   : > { %4451 = vmatpush3.bf16.msra.mxu1 %v4799_v28  ;;  %v2370_v28 = vld [vmem:[#allocation2 + $0xc1] sm:$0xff] }
 0x21b   : > { %4468 = vmatprep.subr.bf16.mxu1 %v4800_v43  ;;  %v2385_v30 = vpack.c.bf16 %v2370_v28, %v2369_v53  ;;  %v2375_v28 = vld [vmem:[#allocation2 + $0x111] sm:$0xff] }
 0x21d   : > { %4437 = vmatmul.mubr.msk.bf16.gmra.mrb[0].mxu1 %vm1282_vm0, %v2210_v0  ;;  %v2372_v0 = vld [vmem:[#allocation2 + $0xe1] sm:$0xff] }
 0x21e   : > { %4440 = vmatprep.mubr.msk.bf16.mxu1 %vm1282_vm0, %v2211_v44  ;;  %v2371_v44 = vld [vmem:[#allocation2 + $0xd1] sm:$0xff] }
 0x21f   : > { %v2386_v62 = vpack.c.bf16 %v2372_v0, %v2371_v44  ;;  %v2382_v0 = vld [vmem:[#allocation2 + $0x381] sm:$0xff]  ;;  %v2381_v44 = vld [vmem:[#allocation2 + $0x371] sm:$0xff] }
 0x225   : > { %4441 = vmatmul.mubr.msk.bf16.gmra.mrb[4].mxu1 %vm1282_vm0, %v2212_v10  ;;  %v4802_v10 = vld [vmem:[#allocation6 + $0x70] sm:$0xff]  }
 0x226   : > { %4444 = vmatprep.mubr.msk.bf16.mxu1 %vm1282_vm0, %v2213_v15  ;;  %v2376_v15 = vld [vmem:[#allocation2 + $0x121] sm:$0xff] }
 0x227   : > { %v2388_v47 = vpack.c.bf16 %v2376_v15, %v2375_v28 }
 0x22d   : > { %4445 = vmatmul.mubr.msk.bf16.gmra.mrb[8].mxu1 %vm1282_vm0, %v2214_v48  ;;  %v2377_v48 = vld [vmem:[#allocation2 + $0x331] sm:$0xff] }
 0x22e   : > { %4452 = vmatprep.mubr.msk.bf16.mxu1 %vm1282_vm0, %v2385_v30  ;;  %v2389_v53 = vpack.c.bf16 %v2378_v42, %v2377_v48  ;;  %v2380_v30 = vld [vmem:[#allocation2 + $0x361] sm:$0xff]  ;;  %v4803_v48 = vld [vmem:[#allocation6 + $0x78] sm:$0xff]  }
 0x235   : > { %4453 = vmatmul.mubr.msk.bf16.vlgmr.msra.gmra.mrb[12].mxu1 %vm1282_vm0, %v2386_v62  ;;  %v2391_v62 = vpack.c.bf16 %v2382_v0, %v2381_v44 }
 0x236   : > { %4469 = vmatpush3.bf16.msra.mxu1 %v4800_v43  ;;  %4456 = vmatprep.mubr.msk.bf16.mxu1 %vm1282_vm0, %v2387_v39  ;;  %v2390_v43 = vpack.c.bf16 %v2380_v30, %v2379_v56 }
 0x237   : > { %4470 = vmatprep.subr.bf16.mxu1 %v4801_v26 }
 0x23a   : > { %4471 = vmatpush3.bf16.msra.mxu1 %v4801_v26  ;;  %v2383_v26 = vld [vmem:[#allocation2 + $0x391] sm:$0xff] }
 0x23b   : > { %4488 = vmatprep.subr.bf16.mxu1 %v4802_v10  ;;  %v2392_v39 = vpack.c.bf16 %v2384_v61, %v2383_v26 }
 0x23d   : > { %4457 = vmatmul.mubr.msk.bf16.gmra.mrb[0].mxu1 %vm1282_vm0, %v2388_v47 }
 0x23e   : > { %4460 = vmatprep.mubr.msk.bf16.mxu1 %vm1282_vm0, %v2389_v53 }
 0x245   : > { %4461 = vmatmul.mubr.msk.bf16.gmra.mrb[4].mxu1 %vm1282_vm0, %v2390_v43  ;;  %v6134_v43 = vld [vmem:[%s6560_s6] ss:$0 sm:$0xff] }
 0x246   : > { %4464 = vmatprep.mubr.msk.bf16.mxu1 %vm1282_vm0, %v2391_v62 }
 0x24d   : > { %4465 = vmatmul.mubr.msk.bf16.gmra.mrb[8].mxu1 %vm1282_vm0, %v2392_v39 }
 0x24e   : > { %4472 = vmatprep.mubr.msk.bf16.mxu1 %vm1282_vm0, %v2564_v20  ;;  %v2567_v20 = vpack.c.bf16 %v2555_v12, %v5764_v37  ;;  %v6609_v37 = vpack.c.bf16 %v5699_v51, %v5692_v45  ;;  %v2742_v45 = vld [vmem:[#allocation2 + $0x441] sm:$0xff] }
 0x24f   : > { %v6006_v15 = vpop.f32.mrb[68].mxu0 }
 0x250   : > { %v6008_v42 = vpop.f32.mrb[69].mxu0 }
 0x251   : > { %v6010_v28 = vpop.f32.mrb[70].mxu0 }
 0x252   : > { %v6012_v47 = vpop.f32.mrb[71].mxu0 }
 0x255   : > { %4473 = vmatmul.mubr.msk.bf16.vlgmr.msra.gmra.mrb[12].mxu1 %vm1282_vm0, %v2565_v14  ;;  %v6607_v14 = vpack.c.bf16 %v5671_v25, %v5661_v17  ;;  %v6610_v17 = vpack.c.bf16 %v5849_v36, %v5839_v27  ;;  %v2750_v36 = vpack.c.bf16 %v2742_v45, %v5877_v29  ;;  %v6615_v29 = vpack.c.bf16 %v5766_v50, %v5773_v58  ;;  %v2920_v50 = vld [vmem:[#allocation2 + $0x4e1] sm:$0xff] }
 0x256   : > { %4489 = vmatpush3.bf16.msra.mxu1 %v4802_v10  ;;  %4476 = vmatprep.mubr.msk.bf16.mxu1 %vm1282_vm0, %v2566_v59  ;;  %v2734_v59 = vld [vmem:[#allocation2 + $0x1c1] sm:$0xff]  ;;  %v2928_v58 = vpack.c.bf16 %v2920_v50, %v5973_v38  ;;  %v6128_v38 = vld [vmem:[%s6559_s5] ss:$0 sm:$0xff] }
 0x257   : > { %4490 = vmatprep.subr.bf16.mxu1 %v4803_v48  ;;  %v2746_v5 = vpack.c.bf16 %v2734_v59, %v5701_v52 }
 0x25a   : > { %4491 = vmatpush3.bf16.msra.mxu1 %v4803_v48 }
 0x25b   : > { %4508 = vmatprep.subr.bf16.mxu1 %v4804_v11 }
 0x25d   : > { %4477 = vmatmul.mubr.msk.bf16.gmra.mrb[0].mxu1 %vm1282_vm0, %v2567_v20 }
 0x25e   : > { %4480 = vmatprep.mubr.msk.bf16.mxu1 %vm1282_vm0, %v2568_v54 }
 0x265   : > { %4481 = vmatmul.mubr.msk.bf16.gmra.mrb[4].mxu1 %vm1282_vm0, %v2569_v35 }
 0x266   : > { %4484 = vmatprep.mubr.msk.bf16.mxu1 %vm1282_vm0, %v2570_v16 }
 0x26d   : > { %4485 = vmatmul.mubr.msk.bf16.gmra.mrb[8].mxu1 %vm1282_vm0, %v2571_v6 }
 0x26e   : > { %4492 = vmatprep.mubr.msk.bf16.mxu1 %vm1282_vm0, %v6607_v14 }
 0x275   : > { %4493 = vmatmul.mubr.msk.bf16.vlgmr.msra.gmra.mrb[12].mxu1 %vm1282_vm0, %v6608_v49 }
 0x276   : > { %4509 = vmatpush3.bf16.msra.mxu1 %v4804_v11  ;;  %4496 = vmatprep.mubr.msk.bf16.mxu1 %vm1282_vm0, %v6609_v37 }
 0x277   : > { %4510 = vmatprep.subr.bf16.mxu1 %v4805_v40 }
 0x27a   : > { %4511 = vmatpush3.bf16.msra.mxu1 %v4805_v40 }
 0x27d   : > { %4497 = vmatmul.mubr.msk.bf16.gmra.mrb[0].mxu1 %vm1282_vm0, %v2746_v5 }
 0x27e   : > { %4500 = vmatprep.mubr.msk.bf16.mxu1 %vm1282_vm0, %v6610_v17 }
 0x285   : > { %4501 = vmatmul.mubr.msk.bf16.gmra.mrb[4].mxu1 %vm1282_vm0, %v6611_v21 }
 0x286   : > { %4504 = vmatprep.mubr.msk.bf16.mxu1 %vm1282_vm0, %v6612_v22 }
 0x287   : > { %v6064_v25 = vpop.f32.mrb[72].mxu0 }
 0x288   : > { %v6066_v51 = vpop.f32.mrb[73].mxu0 }
 0x289   : > { %v6068_v52 = vpop.f32.mrb[74].mxu0 }
 0x28a   : > { %v6070_v27 = vpop.f32.mrb[75].mxu0 }
 0x28d   : > { %4505 = vmatmul.mubr.msk.bf16.gmra.mrb[8].mxu1 %vm1282_vm0, %v2750_v36 }
 0x28e   : > { %4512 = vmatprep.mubr.msk.bf16.mxu1 %vm1282_vm0, %v6613_v32 }
 0x28f   : > { %v6078_v33 = vpop.f32.mrb[76].mxu0 }
 0x290   : > { %v6080_v4 = vpop.f32.mrb[77].mxu0 }
 0x291   : > { %v6082_v46 = vpop.f32.mrb[78].mxu0 }
 0x292   : > { %v6084_v9 = vpop.f32.mrb[79].mxu0 }
 0x295   : > { %4513 = vmatmul.mubr.msk.bf16.vlgmr.msra.gmra.mrb[12].mxu1 %vm1282_vm0, %v6614_v18 }
 0x296   : > { %4516 = vmatprep.mubr.msk.bf16.mxu1 %vm1282_vm0, %v6615_v29 }
 0x297   : > { %v4374_v13 = vpop.f32.mrb[64].mxu0 }
 0x298   : > { %v1771_v41 = vpop.f32.mrb[65].mxu0 }
 0x299   : > { %v4375_v35 = vpop.f32.mrb[66].mxu0 }
 0x29a   : > { %v1774_v54 = vpop.f32.mrb[67].mxu0 }
 0x29d   : > { %4517 = vmatmul.mubr.msk.bf16.gmra.mrb[0].mxu1 %vm1282_vm0, %v2924_v57 }
 0x29e   : > { %4520 = vmatprep.mubr.msk.bf16.mxu1 %vm1282_vm0, %v6616_v60 }
 0x2a5   : > { %4521 = vmatmul.mubr.msk.bf16.gmra.mrb[4].mxu1 %vm1282_vm0, %v6617_v7 }
 0x2a6   : > { %4524 = vmatprep.mubr.msk.bf16.mxu1 %vm1282_vm0, %v6618_v8 }
 0x2ad   : > { %4525 = vmatmul.mubr.msk.bf16.gmra.mrb[8].mxu1 %vm1282_vm0, %v2928_v58 }
 0x368   : > { %v4514_v16 = vpop.f32.mrb[12].mxu1 }
 0x369   : > { %v4592_v10 = vadd.f32 %v4514_v16, %v4374_v13  ;;  %v3004_v53 = vpop.f32.mrb[13].mxu1 }
 0x36a   : > { %v4593_v30 = vadd.f32 %v3004_v53, %v1771_v41  ;;  %v4515_v0 = vpop.f32.mrb[14].mxu1 }
 0x36b   : > { %v3092_v56 = vmul.f32 %v4592_v10, %v6128_v38  ;;  %v4594_v44 = vadd.f32 %v4515_v0, %v4375_v35  ;;  %v3007_v62 = vpop.f32.mrb[15].mxu1 }
 0x36c   : > { %v3090_v61 = vmul.f32 %v4593_v30, %v6128_v38  ;;  %v4595_v26 = vadd.f32 %v3007_v62, %v1774_v54 }
 0x36d   : > { %v3093_v39 = vmul.f32 %v4594_v44, %v6128_v38  ;;  %v6139_v48 = vadd.f32 %v6134_v43, %v3092_v56 }
 0x36e   : > { %v6142_v11 = vadd.f32 %v6134_v43, %v3090_v61  ;;  %v3091_v12 = vmul.f32 %v4595_v26, %v6128_v38 }
 0x36f   : > { %v6146_v20 = vadd.f32 %v6134_v43, %v3093_v39  ;;  %v3131_v37 = vmax.f32 %v6139_v48, 0.0 }
 0x370   : > { %v3129_v3 = vmax.f32 %v6142_v11, 0.0  ;;  %v6150_v6 = vadd.f32 %v6134_v43, %v3091_v12  ;;  %v4518_v14 = vpop.f32.mrb[0].mxu1 }
 0x371   : > { %v4596_v40 = vadd.f32 %v4518_v14, %v6006_v15  ;;  %v3020_v49 = vpop.f32.mrb[1].mxu1  ;;  %v3132_v21 = vmax.f32 %v6146_v20, 0.0 }
 0x372   : > { %v3130_v59 = vmax.f32 %v6150_v6, 0.0  ;;  %v4597_v5 = vadd.f32 %v3020_v49, %v6008_v42  ;;  %v4519_v17 = vpop.f32.mrb[2].mxu1  ;;  %v3145_v32 = vsel %vm1282_vm0, %v3129_v3, 0.0 }
 0x373   : > { %v3096_v22 = vmul.f32 %v4596_v40, %v6128_v38  ;;  %v4598_v45 = vadd.f32 %v4519_v17, %v6010_v28  ;;  %v3023_v36 = vpop.f32.mrb[3].mxu1  ;;  %v3148_v28 = vsel %vm1282_vm0, %v3131_v37, 0.0 }
 0x374   : > { %v3146_v15 = vsel %vm1282_vm0, %v3130_v59, 0.0  ;;  %v3094_v18 = vmul.f32 %v4597_v5, %v6128_v38  ;;  %v4599_v42 = vadd.f32 %v3023_v36, %v6012_v47  ;;  %v3150_v47 = vsel %vm1282_vm0, %v3132_v21, 0.0 }
 0x375   : > { %v3147_v29 = vadd.f32 %v3146_v15, %v3145_v32  ;;  %v6168_v13 = vadd.f32 %v6134_v43, %v3096_v22  ;;  %v3097_v41 = vmul.f32 %v4598_v45, %v6128_v38 }
 0x376   : > { %v6174_v19 = vadd.f32 %v6134_v43, %v3094_v18  ;;  %v3095_v35 = vmul.f32 %v4599_v42, %v6128_v38 }
 0x377   : > { %v3149_v54 = vadd.f32 %v3148_v28, %v3147_v29  ;;  %v3135_v8 = vmax.f32 %v6168_v13, 0.0  ;;  %v6191_v24 = vadd.f32 %v6134_v43, %v3097_v41 }
 0x378   : > { %v3133_v57 = vmax.f32 %v6174_v19, 0.0  ;;  %v6183_v60 = vadd.f32 %v6134_v43, %v3095_v35  ;;  %v4522_v7 = vpop.f32.mrb[4].mxu1 }
 0x379   : > { %v3151_v50 = vadd.f32 %v3150_v47, %v3149_v54  ;;  %v4600_v58 = vadd.f32 %v4522_v7, %v6064_v25  ;;  %v3036_v31 = vpop.f32.mrb[5].mxu1  ;;  %v3156_v56 = vsel %vm1282_vm0, %v3135_v8, 0.0  ;;  %v3136_v62 = vmax.f32 %v6191_v24, 0.0 }
 0x37a   : > { %v3152_v23 = vsel %vm1282_vm0, %v3133_v57, 0.0  ;;  %v3134_v34 = vmax.f32 %v6183_v60, 0.0  ;;  %v4601_v55 = vadd.f32 %v3036_v31, %v6066_v51  ;;  %v4523_v63 = vpop.f32.mrb[6].mxu1 }
 0x37b   : > { %v3153_v2 = vadd.f32 %v3152_v23, %v3151_v50  ;;  %v3100_v16 = vmul.f32 %v4600_v58, %v6128_v38  ;;  %v4602_v10 = vadd.f32 %v4523_v63, %v6068_v52  ;;  %v3039_v53 = vpop.f32.mrb[7].mxu1  ;;  %v3158_v17 = vsel %vm1282_vm0, %v3136_v62, 0.0 }
 0x37c   : > { %v3154_v25 = vsel %vm1282_vm0, %v3134_v34, 0.0  ;;  %v3098_v30 = vmul.f32 %v4601_v55, %v6128_v38  ;;  %v4603_v0 = vadd.f32 %v3039_v53, %v6070_v27 }
 0x37d   : > { %v3155_v51 = vadd.f32 %v3154_v25, %v3153_v2  ;;  %v3101_v44 = vmul.f32 %v4602_v10, %v6128_v38  ;;  %v6208_v52 = vadd.f32 %v6134_v43, %v3100_v16 }
 0x37e   : > { %v6211_v61 = vadd.f32 %v6134_v43, %v3098_v30  ;;  %v3099_v26 = vmul.f32 %v4603_v0, %v6128_v38 }
 0x37f   : > { %v3157_v39 = vadd.f32 %v3156_v56, %v3155_v51  ;;  %v6215_v27 = vadd.f32 %v6134_v43, %v3101_v44  ;;  %v3139_v22 = vmax.f32 %v6208_v52, 0.0  ;;  %v3611_v52 = vld [vmem:[%s5189_s1 + $0x8] sm:$0xff] }
 0x380   : > { %v3137_v12 = vmax.f32 %v6211_v61, 0.0  ;;  %v6219_v14 = vadd.f32 %v6134_v43, %v3099_v26  ;;  %v4526_v40 = vpop.f32.mrb[8].mxu1 }
 0x381   : > { %v4604_v49 = vadd.f32 %v4526_v40, %v6078_v33  ;;  %v3052_v5 = vpop.f32.mrb[9].mxu1  ;;  %v3159_v15 = vadd.f32 %v3158_v17, %v3157_v39  ;;  %v3140_v18 = vmax.f32 %v6215_v27, 0.0 }
 0x382   : > { %v3138_v45 = vmax.f32 %v6219_v14, 0.0  ;;  %v4605_v36 = vadd.f32 %v3052_v5, %v6080_v4  ;;  %v4527_v32 = vpop.f32.mrb[10].mxu1  ;;  %v3166_v28 = vsel %vm1282_vm0, %v3137_v12, 0.0  ;;  %v3613_v14 = vld [vmem:[%s5189_s1 + $0x18] sm:$0xff] }
 0x383   : > { %v3104_v42 = vmul.f32 %v4604_v49, %v6128_v38  ;;  %v4606_v29 = vadd.f32 %v4527_v32, %v6082_v46  ;;  %v3055_v33 = vpop.f32.mrb[11].mxu1  ;;  %v3169_v46 = vsel %vm1282_vm0, %v3139_v22, 0.0  ;;  %v3160_v31 = vrot.slane %v3159_v15, 4 }
 0x384   : > { %v3167_v41 = vsel %vm1282_vm0, %v3138_v45, 0.0  ;;  %v3102_v35 = vmul.f32 %v4605_v36, %v6128_v38  ;;  %v4607_v4 = vadd.f32 %v3055_v33, %v6084_v9  ;;  %v3171_v9 = vsel %vm1282_vm0, %v3140_v18, 0.0 }
 0x385   : > { %v3168_v54 = vadd.f32 %v3167_v41, %v3166_v28  ;;  %v3105_v47 = vmul.f32 %v4606_v29, %v6128_v38  ;;  %v6244_v7 = vadd.f32 %v6134_v43, %v3104_v42  ;;  %v3161_v25 = vadd.f32 %v3160_v31, %v3159_v15 }
 0x386   : > { %v6247_v50 = vadd.f32 %v6134_v43, %v3102_v35  ;;  %v3103_v58 = vmul.f32 %v4607_v4, %v6128_v38  ;;  %v3278_v4 = vld [vmem:[%s6563_s9] sm:$0xf] }
 0x387   : > { %v3170_v23 = vadd.f32 %v3169_v46, %v3168_v54  ;;  %v6255_v63 = vadd.f32 %v6134_v43, %v3105_v47  ;;  %v3143_v10 = vmax.f32 %v6244_v7, 0.0  ;;  %v3162_v26 = vrot.slane %v3161_v25, 2  ;;  %v4094_v54 = vld [vmem:[%s6562_s8] ss:$0 sm:$0xff] }
 0x388   : > { %v3141_v55 = vmax.f32 %v6247_v50, 0.0  ;;  %v6258_v2 = vadd.f32 %v6134_v43, %v3103_v58  ;;  %v3616_v50 = vld [vmem:[%s5189_s1 + $0x30] sm:$0xff] }
 0x389   : > { %v3172_v16 = vadd.f32 %v3171_v9, %v3170_v23  ;;  %v3144_v0 = vmax.f32 %v6255_v63, 0.0  ;;  %v3177_v43 = vsel %vm1282_vm0, %v3143_v10, 0.0  ;;  %v3163_v5 = vadd.f32 %v3162_v26, %v3161_v25  ;;  %v4807_v23 = vld [vmem:[%s6565_s11 + $0x8] sm:$0xff]   ;;  %v4808_v9 = vld [vmem:[%s6568_s14] sm:$0xff]  }
 0x38a   : > { %v3173_v38 = vsel %vm1282_vm0, %v3141_v55, 0.0  ;;  %v3142_v53 = vmax.f32 %v6258_v2, 0.0  ;;  %v3618_v63 = vld [vmem:[%s5189_s1 + $0x100] sm:$0xff]  ;;  %v3619_v2 = vld [vmem:[%s5189_s1 + $0x108] sm:$0xff] }
 0x38b   : > { %v3174_v30 = vadd.f32 %v3173_v38, %v3172_v16  ;;  %v3179_v39 = vsel %vm1282_vm0, %v3144_v0, 0.0  ;;  %v3164_v36 = vrot.slane %v3163_v5, 1  ;;  %v4096_v16 = vld [vmem:[%s6620_s15] ss:$0 sm:$0xff]  ;;  %s3966_s15 = sshll.u32 %s5185_s19, 7 }
 0x38c   : > { %v3175_v56 = vsel %vm1282_vm0, %v3142_v53, 0.0 }
 0x38d   : > { %v3176_v51 = vadd.f32 %v3175_v56, %v3174_v30  ;;  %v3165_v42 = vadd.f32 %v3164_v36, %v3163_v5 }
 0x38f   : > { %v3178_v44 = vadd.f32 %v3177_v43, %v3176_v51  ;;  %v3188_v28 = vmul.f32 0.015625, %v3165_v42 }
 0x391   : > { %v3180_v40 = vadd.f32 %v3179_v39, %v3178_v44  ;;  %v4952_v44 = vmov 1966171168   ;;  %v3374_v39 = vlaneseq }
 0x392   : > { %v3372_v26 = vunpack.c.l.s4 %v4952_v44 }
 0x393   : > { %v3181_v49 = vrot.slane %v3180_v40, 4 }
 0x395   : > { %v3182_v17 = vadd.f32 %v3181_v49, %v3180_v40  ;;  %v3373_v40 = vunpack.c.0.s8 %v3372_v26  ;;  %v3375_v49 = vshrl.u32 %v3374_v39, 7 }
 0x397   : > { %v3183_v32 = vrot.slane %v3182_v17, 2  ;;  %v3376_v5 = vsub.s32 %v3373_v40, %v3375_v49 }
 0x399   : > { %v3184_v15 = vadd.f32 %v3183_v32, %v3182_v17  ;;  %v3395_v32 = vsub.s32 0, %v3375_v49 }
 0x39b   : > { %v3185_v29 = vrot.slane %v3184_v15, 1 }
 0x39d   : > { %v3186_v33 = vadd.f32 %v3185_v29, %v3184_v15 }
 0x39f   : > { %v3189_v41 = vmul.f32 0.015625, %v3186_v33 }
 0x3a1   : > { %v3204_v35 = vsel %vm3203_vm4, %v3189_v41, %v3188_v28 }
 0x3a2   : > { %4537 = vmatmul.mubr.msk.f32.vlgmr.msra.gmra.mrb[80].mxu0 %vm1282_vm0, %v3204_v35 }
 0x3a3   : > { %4541 = vmatprep.mubr.msk.f32.mxu0 %vm4951_vm3, %v6619_v1  ;;  %4540 = vmatpush3.msk.msra.mxu0 %vm3290_vm5, %v3278_v4  ;;  %v4806_v1 = vld [vmem:[%s6565_s11] sm:$0xff]  }
 0x3a4   : > { %4544 = vmatprep.subr.bf16.mxu0 %v4806_v1 }
 0x475   : > { %v3273_v47 = vpop.f32.mrb[80].mxu0 }
 0x476   : > { %v3274_v46 = vadd.f32 %v4094_v54, %v3273_v47  ;;  %v4538_v58 = vpop.f32.mrb[81].mxu0 }
 0x478   : > { %v3277_v31 = vmax.f32 %v3274_v46, 0.0 }
 0x47a   : > { %4542 = vmatmul.mubr.msk.f32.vlgmr.msra.gmra.mrb[82].mxu0 %vm3286_vm6, %v3277_v31 }
 0x47b   : > { %4545 = vmatpush3.bf16.msra.mxu0 %v4806_v1  ;;  %v3621_v1 = vld [vmem:[%s5189_s1 + $0x118] sm:$0xff] }
 0x47c   : > { %4546 = vmatprep.subr.bf16.mxu0 %v4807_v23 }
 0x47f   : > { %4547 = vmatpush3.bf16.msra.mxu0 %v4807_v23  ;;  %v3622_v23 = vld [vmem:[%s5189_s1 + $0x120] sm:$0xff] }
 0x480   : > { %4564 = vmatprep.subr.bf16.mxu0 %v4808_v9 }
 0x54d   : > { %v3360_v38 = vpop.f32.mrb[82].mxu0 }
 0x54e   : > { %v3361_v25 = vadd.f32 %v4096_v16, %v3360_v38  ;;  %v4543_v30 = vpop.f32.mrb[83].mxu0 }
 0x54f   : > { %v3625_v30 = vld [vmem:[%s5189_s1 + $0x138] sm:$0xff] }
 0x550   : > { %v4099_v56 = vmul.f32 -1.442695, %v3361_v25  ;;  %v3624_v25 = vld [vmem:[%s5189_s1 + $0x130] sm:$0xff] }
 0x552   : > { %4809 = vpow2.f32 %v4099_v56  ;;  %v3633_v56 = vpack.c.bf16 %v3625_v30, %v3624_v25 }
 0x55c   : > { %v4810_v51 = vpop.eup %4809 }
 0x55d   : > { %v3367_v43 = vadd.f32 1.0, %v4810_v51 }
 0x55f   : > { %4811 = vrcp.f32 %v3367_v43 }
 0x569   : > { %v4812_v17 = vpop.eup %4811 }
 0x56a   : > { %v3377_v36 = vrot.slane %v4812_v17, %v3376_v5 }
 0x56c   : > { %v3378_v15 = vcombine.high %v3377_v36, %v3377_v36  ;;  %v3385_v42 = vrot.slane %v3377_v36, %v3376_v5 }
 0x56e   : > { %v3396_v29 = vrot.slane %v3385_v42, %v3395_v32  ;;  %v3392_v33 = vrot.slane %v3378_v15, %v3376_v5 }
 0x570   : > { %v3403_v28 = vmul.f32 %v3396_v29, %v3129_v3  ;;  %v3404_v41 = vmul.f32 %v3396_v29, %v3130_v59  ;;  %v3405_v35 = vmul.f32 %v3396_v29, %v3131_v37  ;;  %v3406_v4 = vmul.f32 %v3396_v29, %v3132_v21 }
 0x571   : > { %v3407_v54 = vmul.f32 %v3396_v29, %v3133_v57  ;;  %v3408_v47 = vmul.f32 %v3396_v29, %v3134_v34  ;;  %v3400_v31 = vrot.slane %v3392_v33, %v3395_v32  ;;  %v3409_v48 = vmul.f32 %v3396_v29, %v3135_v8 }
 0x572   : > { %v3419_v46 = vpack.c.bf16 %v3404_v41, %v3403_v28  ;;  %v3420_v58 = vpack.c.bf16 %v3406_v4, %v3405_v35  ;;  %v3410_v20 = vmul.f32 %v3396_v29, %v3136_v62  ;;  %v3610_v62 = vld [vmem:[%s5189_s1] sm:$0xff] }
 0x573   : > { %v3421_v11 = vpack.c.bf16 %v3408_v47, %v3407_v54  ;;  %v3411_v3 = vmul.f32 %v3400_v31, %v3137_v12  ;;  %v3412_v6 = vmul.f32 %v3400_v31, %v3138_v45  ;;  %v3413_v21 = vmul.f32 %v3400_v31, %v3139_v22  ;;  %v3612_v12 = vld [vmem:[%s5189_s1 + $0x10] sm:$0xff]  ;;  %v3614_v22 = vld [vmem:[%s5189_s1 + $0x20] sm:$0xff]  ;;  %v3615_v45 = vld [vmem:[%s5189_s1 + $0x28] sm:$0xff] }
 0x574   : > { %4548 = vmatprep.mubr.msk.bf16.mxu0 %vm1282_vm0, %v3419_v46  ;;  %v3422_v37 = vpack.c.bf16 %v3410_v20, %v3409_v48  ;;  %v3414_v13 = vmul.f32 %v3400_v31, %v3140_v18  ;;  %v3415_v19 = vmul.f32 %v3400_v31, %v3141_v55  ;;  %v3416_v57 = vmul.f32 %v3400_v31, %v3142_v53  ;;  %v3617_v55 = vld [vmem:[%s5189_s1 + $0x38] sm:$0xff]  ;;  %v6379_v41 = vld [vmem:[%s6621_s24] ss:$0 sm:$0xff] }
 0x575   : > { %4549 = vmatmul.mubr.msk.bf16.vlgmr.msra.gmra.mrb[84].mxu0 %vm1282_vm0, %v3420_v58  ;;  %v3423_v59 = vpack.c.bf16 %v3412_v6, %v3411_v3  ;;  %v3417_v24 = vmul.f32 %v3400_v31, %v3143_v10  ;;  %v3418_v34 = vmul.f32 %v3400_v31, %v3144_v0  ;;  %v3626_v61 = vpack.c.bf16 %v3611_v52, %v3610_v62  ;;  %v3620_v0 = vld [vmem:[%s5189_s1 + $0x110] sm:$0xff]  ;;  %v6384_v35 = vld [vmem:[%s6622_s0] ss:$0 sm:$0xff]  ;;  %s6625_s0 = sld [smem:[#allocation22_spill]] }
 0x576   : > { %4565 = vmatpush3.bf16.msra.mxu0 %v4808_v9  ;;  %4552 = vmatprep.mubr.msk.bf16.mxu0 %vm1282_vm0, %v3421_v11  ;;  %v3424_v60 = vpack.c.bf16 %v3414_v13, %v3413_v21  ;;  %v3425_v8 = vpack.c.bf16 %v3416_v57, %v3415_v19  ;;  %v3627_v18 = vpack.c.bf16 %v3613_v14, %v3612_v12  ;;  %v3623_v9 = vld [vmem:[%s5189_s1 + $0x128] sm:$0xff]  ;;  %v6390_v54 = vld [vmem:[%s6623_s22] ss:$0 sm:$0xff]  ;;  %s6416_s1 = scalar_lea.vmem [#allocation8], %s3966_s15  ;;  %s4953_s22 = smov [#allocation8]  }
 0x577   : > { %v3426_v27 = vpack.c.bf16 %v3418_v34, %v3417_v24  ;;  %v3628_v7 = vpack.c.bf16 %v3615_v45, %v3614_v22  ;;  %v3629_v10 = vpack.c.bf16 %v3617_v55, %v3616_v50  ;;  %v3630_v53 = vpack.c.bf16 %v3619_v2, %v3618_v63  ;;  %v6396_v58 = vld [vmem:[%s6624_s12] ss:$0 sm:$0xff]  ;;  %s3872_s24 = sshll.u32 %s6416_s1, 4  ;;  %s4875_s23 = sshll.u32 %s4953_s22, 4  ;;  %s6504_s24 = int_to_ptr.vmem [resolvable:$true] %s3872_s24  ;;  %s4876_s23 = int_to_ptr.vmem [resolvable:$false] %s4875_s23 }
 0x578   : > { %v3631_v16 = vpack.c.bf16 %v3621_v1, %v3620_v0  ;;  %v3632_v38 = vpack.c.bf16 %v3623_v9, %v3622_v23  ;;  %s4871_s16 = scalar_lea.vmem %s6504_s24, 2048  ;;  %s4877_s17 = scalar_lea.vmem %s4876_s23, 4096 }
 0x579   : > { %p4872_p4 = scmp.ne.s32.totalorder %s6504_s24, %s4871_s16  ;;  %p4878_p10 = scmp.lt.s32.totalorder %s6504_s24, %s4876_s23 }
 0x57a   : > { %p4879_p13 = scmp.lt.s32.totalorder %s4877_s17, %s4871_s16 }
 0x57b   : > { %s6502_s18 = scalar_lea.hbm %s6625_s0, %s4132_s13  ;;  %p4873_p6 = pnand %p4872_p4, %p5137_p12 }
 0x57c   : > { %p4880_p3 = por %p4879_p13, %p4878_p10 }
 0x57d   : > { %4553 = vmatmul.mubr.msk.bf16.gmra.mrb[88].mxu0 %vm1282_vm0, %v3422_v37  ;;  %p4874_p8 = pneg %p4873_p6 }
 0x57e   : > { %4556 = vmatprep.mubr.msk.bf16.mxu0 %vm1282_vm0, %v3423_v59 }
 0x57f   : > { %p4881_p7 = pnand %p4880_p3, %p4874_p8 }
 0x585   : > { %4557 = vmatmul.mubr.msk.bf16.gmra.mrb[92].mxu0 %vm1282_vm0, %v3424_v60 }
 0x586   : > { %4560 = vmatprep.mubr.msk.bf16.mxu0 %vm1282_vm0, %v3425_v8 }
 0x58d   : > { %4561 = vmatmul.mubr.msk.bf16.gmra.mrb[96].mxu0 %vm1282_vm0, %v3426_v27 }
 0x58e   : > { %4566 = vmatprep.mubr.msk.bf16.mxu0 %vm690_vm2, %v3626_v61 }
 0x595   : > { %4567 = vmatmul.mubr.msk.bf16.vlgmr.msra.gmra.mrb[100].mxu0 %vm690_vm2, %v3627_v18 }
 0x596   : > { %4570 = vmatprep.mubr.msk.bf16.mxu0 %vm690_vm2, %v3628_v7 }
 0x59d   : > { %4571 = vmatmul.mubr.msk.bf16.gmra.mrb[104].mxu0 %vm690_vm2, %v3629_v10 }
 0x59e   : > { %4574 = vmatprep.mubr.msk.bf16.mxu0 %vm690_vm2, %v3630_v53 }
 0x5a5   : > { %4575 = vmatmul.mubr.msk.bf16.gmra.mrb[108].mxu0 %vm690_vm2, %v3631_v16 }
 0x5a6   : > { %4578 = vmatprep.mubr.msk.bf16.mxu0 %vm690_vm2, %v3632_v38 }
 0x5ad   : > { %4579 = vmatmul.mubr.msk.bf16.gmra.mrb[112].mxu0 %vm690_vm2, %v3633_v56 }
 0x648   : > { %v4550_v51 = vpop.f32.mrb[84].mxu0 }
 0x649   : > { %v3501_v43 = vpop.f32.mrb[85].mxu0  ;;  %v3573_v4 = vmul.f32 %v4550_v51, %v6379_v41 }
 0x64a   : > { %v4551_v44 = vpop.f32.mrb[86].mxu0  ;;  %v3571_v47 = vmul.f32 %v6379_v41, %v3501_v43 }
 0x64b   : > { %v3504_v26 = vpop.f32.mrb[87].mxu0  ;;  %v3574_v31 = vmul.f32 %v4551_v44, %v6379_v41  ;;  %v3596_v37 = vadd.f32 %v6390_v54, %v3573_v4 }
 0x64c   : > { %v3572_v20 = vmul.f32 %v6379_v41, %v3504_v26  ;;  %v3594_v19 = vadd.f32 %v6390_v54, %v3571_v47 }
 0x64d   : > { %v3597_v8 = vadd.f32 %v6390_v54, %v3574_v31 }
 0x64e   : > { %v3595_v62 = vadd.f32 %v6390_v54, %v3572_v20 }
 0x650   : > { %v4554_v39 = vpop.f32.mrb[88].mxu0 }
 0x651   : > { %v3517_v40 = vpop.f32.mrb[89].mxu0  ;;  %v3577_v27 = vmul.f32 %v4554_v39, %v6379_v41 }
 0x652   : > { %v4555_v49 = vpop.f32.mrb[90].mxu0  ;;  %v3575_v22 = vmul.f32 %v6379_v41, %v3517_v40 }
 0x653   : > { %v3520_v5 = vpop.f32.mrb[91].mxu0  ;;  %v3578_v50 = vmul.f32 %v4555_v49, %v6379_v41  ;;  %v3600_v23 = vadd.f32 %v6390_v54, %v3577_v27 }
 0x654   : > { %v3576_v10 = vmul.f32 %v6379_v41, %v3520_v5  ;;  %v3598_v25 = vadd.f32 %v6390_v54, %v3575_v22 }
 0x655   : > { %v3601_v51 = vadd.f32 %v6390_v54, %v3578_v50 }
 0x656   : > { %v3599_v26 = vadd.f32 %v6390_v54, %v3576_v10 }
 0x658   : > { %v6360_v17 = vpop.f32.mrb[92].mxu0 }
 0x659   : > { %v6362_v36 = vpop.f32.mrb[93].mxu0  ;;  %v3581_v49 = vmul.f32 %v6360_v17, %v6379_v41 }
 0x65a   : > { %v6364_v32 = vpop.f32.mrb[94].mxu0  ;;  %v3579_v47 = vmul.f32 %v6379_v41, %v6362_v36 }
 0x65b   : > { %v6366_v15 = vpop.f32.mrb[95].mxu0 }
 0x65c   : > { %v3580_v17 = vmul.f32 %v6379_v41, %v6366_v15 }
 0x660   : > { %v6368_v42 = vpop.f32.mrb[96].mxu0 }
 0x661   : > { %v6370_v29 = vpop.f32.mrb[97].mxu0  ;;  %v3585_v27 = vmul.f32 %v6368_v42, %v6379_v41 }
 0x662   : > { %v6372_v33 = vpop.f32.mrb[98].mxu0  ;;  %v3583_v22 = vmul.f32 %v6379_v41, %v6370_v29 }
 0x663   : > { %v6374_v28 = vpop.f32.mrb[99].mxu0  ;;  %v3586_v50 = vmul.f32 %v6372_v33, %v6379_v41 }
 0x664   : > { %v3584_v42 = vmul.f32 %v6379_v41, %v6374_v28 }
 0x668   : > { %v4568_v46 = vpop.f32.mrb[100].mxu0 }
 0x669   : > { %v3772_v11 = vmul.f32 %v4568_v46, %v6384_v35  ;;  %v3700_v48 = vpop.f32.mrb[101].mxu0 }
 0x66a   : > { %v3770_v3 = vmul.f32 %v6384_v35, %v3700_v48  ;;  %v4569_v6 = vpop.f32.mrb[102].mxu0  ;;  %v3582_v48 = vmul.f32 %v6364_v32, %v6379_v41 }
 0x66b   : > { %v3795_v59 = vadd.f32 %v6396_v58, %v3772_v11  ;;  %v3773_v21 = vmul.f32 %v4569_v6, %v6384_v35  ;;  %v3703_v13 = vpop.f32.mrb[103].mxu0 }
 0x66c   : > { %v3793_v57 = vadd.f32 %v6396_v58, %v3770_v3  ;;  %v3771_v60 = vmul.f32 %v6384_v35, %v3703_v13 }
 0x66d   : > { %v3811_v24 = vadd.f32 %v3795_v59, %v3596_v37  ;;  %v3796_v34 = vadd.f32 %v6396_v58, %v3773_v21  ;;  %v3604_v21 = vadd.f32 %v6390_v54, %v3581_v49 }
 0x66e   : > { %v3809_v52 = vadd.f32 %v3793_v57, %v3594_v19  ;;  %v3794_v61 = vadd.f32 %v6396_v58, %v3771_v60  ;;  %v3602_v57 = vadd.f32 %v6390_v54, %v3579_v47 }
 0x66f   : > { %v3827_v12 = vmax.f32 %v3811_v24, 0.0  ;;  %v3812_v14 = vadd.f32 %v3796_v34, %v3597_v8  ;;  %v3605_v8 = vadd.f32 %v6390_v54, %v3582_v48 }
 0x670   : > { %v3825_v45 = vmax.f32 %v3809_v52, 0.0  ;;  %v3810_v18 = vadd.f32 %v3794_v61, %v3595_v62  ;;  %v4572_v7 = vpop.f32.mrb[104].mxu0  ;;  %v3603_v62 = vadd.f32 %v6390_v54, %v3580_v17 }
 0x671   : > { %3843 = vst.msk [vmem:[%s6416_s1 + $0x10] sm:$0xff] %vm1282_vm0, %v3827_v12  ;;  %v3828_v55 = vmax.f32 %v3812_v14, 0.0  ;;  %v3776_v63 = vmul.f32 %v4572_v7, %v6384_v35  ;;  %v3716_v2 = vpop.f32.mrb[105].mxu0 }
 0x672   : > { %3841 = vst.msk [vmem:[%s6416_s1] sm:$0xff] %vm1282_vm0, %v3825_v45  ;;  %v3826_v53 = vmax.f32 %v3810_v18, 0.0  ;;  %v3774_v0 = vmul.f32 %v6384_v35, %v3716_v2  ;;  %v4573_v1 = vpop.f32.mrb[106].mxu0 }
 0x673   : > { %3844 = vst.msk [vmem:[%s6416_s1 + $0x18] sm:$0xff] %vm1282_vm0, %v3828_v55  ;;  %v3799_v9 = vadd.f32 %v6396_v58, %v3776_v63  ;;  %v3777_v16 = vmul.f32 %v4573_v1, %v6384_v35  ;;  %v3719_v38 = vpop.f32.mrb[107].mxu0 }
 0x674   : > { %3842 = vst.msk [vmem:[%s6416_s1 + $0x8] sm:$0xff] %vm1282_vm0, %v3826_v53  ;;  %v3797_v30 = vadd.f32 %v6396_v58, %v3774_v0  ;;  %v3775_v56 = vmul.f32 %v6384_v35, %v3719_v38  ;;  %v3608_v0 = vadd.f32 %v6390_v54, %v3585_v27 }
 0x675   : > { %v3815_v43 = vadd.f32 %v3799_v9, %v3600_v23  ;;  %v3800_v44 = vadd.f32 %v6396_v58, %v3777_v16  ;;  %v3606_v9 = vadd.f32 %v6390_v54, %v3583_v22  ;;  %v3609_v16 = vadd.f32 %v6390_v54, %v3586_v50 }
 0x676   : > { %v3813_v39 = vadd.f32 %v3797_v30, %v3598_v25  ;;  %v3798_v40 = vadd.f32 %v6396_v58, %v3775_v56  ;;  %v3607_v30 = vadd.f32 %v6390_v54, %v3584_v42 }
 0x677   : > { %v3831_v5 = vmax.f32 %v3815_v43, 0.0  ;;  %v3816_v4 = vadd.f32 %v3800_v44, %v3601_v51 }
 0x678   : > { %v3829_v46 = vmax.f32 %v3813_v39, 0.0  ;;  %v3814_v31 = vadd.f32 %v3798_v40, %v3599_v26  ;;  %v4576_v11 = vpop.f32.mrb[108].mxu0 }
 0x679   : > { %3847 = vst.msk [vmem:[%s6416_s1 + $0x30] sm:$0xff] %vm1282_vm0, %v3831_v5  ;;  %v3832_v20 = vmax.f32 %v3816_v4, 0.0  ;;  %v3780_v3 = vmul.f32 %v4576_v11, %v6384_v35  ;;  %v3732_v6 = vpop.f32.mrb[109].mxu0 }
 0x67a   : > { %3845 = vst.msk [vmem:[%s6416_s1 + $0x20] sm:$0xff] %vm1282_vm0, %v3829_v46  ;;  %v3830_v37 = vmax.f32 %v3814_v31, 0.0  ;;  %v3778_v36 = vmul.f32 %v6384_v35, %v3732_v6  ;;  %v4577_v59 = vpop.f32.mrb[110].mxu0 }
 0x67b   : > { %3848 = vst.msk [vmem:[%s6416_s1 + $0x38] sm:$0xff] %vm1282_vm0, %v3832_v20  ;;  %v3803_v32 = vadd.f32 %v6396_v58, %v3780_v3  ;;  %v3781_v13 = vmul.f32 %v4577_v59, %v6384_v35  ;;  %v3735_v19 = vpop.f32.mrb[111].mxu0 }
 0x67c   : > { %3846 = vst.msk [vmem:[%s6416_s1 + $0x28] sm:$0xff] %vm1282_vm0, %v3830_v37  ;;  %v3801_v15 = vadd.f32 %v6396_v58, %v3778_v36  ;;  %v3779_v60 = vmul.f32 %v6384_v35, %v3735_v19 }
 0x67d   : > { %v3819_v24 = vadd.f32 %v3803_v32, %v3604_v21  ;;  %v3804_v34 = vadd.f32 %v6396_v58, %v3781_v13 }
 0x67e   : > { %v3817_v52 = vadd.f32 %v3801_v15, %v3602_v57  ;;  %v3802_v61 = vadd.f32 %v6396_v58, %v3779_v60 }
 0x67f   : > { %v3835_v12 = vmax.f32 %v3819_v24, 0.0  ;;  %v3820_v14 = vadd.f32 %v3804_v34, %v3605_v8 }
 0x680   : > { %v3833_v45 = vmax.f32 %v3817_v52, 0.0  ;;  %v3818_v18 = vadd.f32 %v3802_v61, %v3603_v62  ;;  %v4580_v7 = vpop.f32.mrb[112].mxu0 }
 0x681   : > { %3851 = vst.msk [vmem:[%s6416_s1 + $0x50] sm:$0xff] %vm1282_vm0, %v3835_v12  ;;  %v3836_v55 = vmax.f32 %v3820_v14, 0.0  ;;  %v3784_v63 = vmul.f32 %v4580_v7, %v6384_v35  ;;  %v3748_v2 = vpop.f32.mrb[113].mxu0 }
 0x682   : > { %3849 = vst.msk [vmem:[%s6416_s1 + $0x40] sm:$0xff] %vm1282_vm0, %v3833_v45  ;;  %v3834_v10 = vmax.f32 %v3818_v18, 0.0  ;;  %v3782_v29 = vmul.f32 %v6384_v35, %v3748_v2  ;;  %v4581_v53 = vpop.f32.mrb[114].mxu0 }
 0x683   : > { %3852 = vst.msk [vmem:[%s6416_s1 + $0x58] sm:$0xff] %vm1282_vm0, %v3836_v55  ;;  %v3807_v33 = vadd.f32 %v6396_v58, %v3784_v63  ;;  %v3785_v1 = vmul.f32 %v4581_v53, %v6384_v35  ;;  %v3751_v23 = vpop.f32.mrb[115].mxu0 }
 0x684   : > { %3850 = vst.msk [vmem:[%s6416_s1 + $0x48] sm:$0xff] %vm1282_vm0, %v3834_v10  ;;  %v3805_v28 = vadd.f32 %v6396_v58, %v3782_v29  ;;  %v3783_v41 = vmul.f32 %v6384_v35, %v3751_v23 }
 0x685   : > { %v3823_v38 = vadd.f32 %v3807_v33, %v3608_v0  ;;  %v3808_v25 = vadd.f32 %v6396_v58, %v3785_v1 }
 0x686   : > { %v3821_v56 = vadd.f32 %v3805_v28, %v3606_v9  ;;  %v3806_v51 = vadd.f32 %v6396_v58, %v3783_v41 }
 0x687   : > { %v3839_v43 = vmax.f32 %v3823_v38, 0.0  ;;  %v3824_v44 = vadd.f32 %v3808_v25, %v3609_v16 }
 0x688   : > { %v3837_v35 = vmax.f32 %v3821_v56, 0.0  ;;  %v3822_v26 = vadd.f32 %v3806_v51, %v3607_v30 }
 0x689   : > { %3855 = vst.msk [vmem:[%s6416_s1 + $0x70] sm:$0xff] %vm1282_vm0, %v3839_v43  ;;  %v3840_v39 = vmax.f32 %v3824_v44, 0.0 }
 0x68a   : > { %3853 = vst.msk [vmem:[%s6416_s1 + $0x60] sm:$0xff] %vm1282_vm0, %v3837_v35  ;;  %v3838_v54 = vmax.f32 %v3822_v26, 0.0 }
 0x68b   : > { %3856 = vst.msk [vmem:[%s6416_s1 + $0x78] sm:$0xff] %vm1282_vm0, %v3840_v39 }
 0x68c   : > { %3854 = vst.msk [vmem:[%s6416_s1 + $0x68] sm:$0xff] %vm1282_vm0, %v3838_v54 }
 0x68d   : > { %4884 = shalt.err (!%p4881_p7)
}
 0x68e   : > { %s4885_s12 = scalar_lea.hbm %s6502_s18, 2048  ;;  %s4889_s13 = scalar_lea.hbm %s6625_s0, 4096 }
 0x68f   : > { %p4886_p9 = scmp.ne.s32.totalorder %s6502_s18, %s4885_s12  ;;  %p4890_p5 = scmp.lt.u32.totalorder %s6502_s18, %s6625_s0 }
 0x690   : > { %p4891_p11 = scmp.lt.u32.totalorder %s4889_s13, %s4885_s12  ;;  %p4893_p4 = scmp.lt.u32.totalorder %s4885_s12, %s6502_s18 }
 0x691   : > { %p4887_p2 = pnand %p4886_p9, %p5137_p12 }
 0x692   : > { %p4892_p1 = por %p4891_p11, %p4890_p5 }
 0x693   : > { %p4888_p0 = pneg %p4887_p2 }
 0x694   : > { %p4894_p6 = por %p4893_p4, %p4892_p1 }
 0x696   : > { %p4895_p8 = pnand %p4894_p6, %p4888_p0 }
 0x698   : > { %4898 = shalt.err (!%p4895_p8)
}
 0x699   : > { %s4954_s16 = smov 128   ;;  %s4955_s22 = smov 8  }
 0x69a   : > { %4726 = dma.vmem_to_hbm [thread:$0]  (%p5137_p12), %s6504_s24, 2048, %s6502_s18, %s3858_s28, %s4954_s16, %s4954_s16, %s4955_s22  }
 0x69b PF: > { %s6626_s23 = sld [smem:[#allocation12_spill]]  ;;  %s6627_s17 = sld [smem:[#allocation13_spill]] }
 0x69c   : > { %p6629_p13 = scmp.ge.s32.totalorder %s4941_s27, 2 }
 0x6a1   : > { %s3887_s15 = sand.u32 1, %s6626_s23   ;;  %p6628_p10 = scmp.ne.s32.totalorder %s6627_s17, 0 }
 0x6a2   : > { %s3888_s12 = scalar_lea.sflag [#allocation5], %s3887_s15 }
 0x6a3   : > { %p4737_p3 = pnand %p6629_p13, %p6628_p10 }
 0x6a5   : > { %4924 = dma.done.wait (!%p4737_p3), %s3888_s12, 2048  }
 0x6a6   : > { %4926 = vsyncadd (!%p4737_p3), %s3888_s12, 4294965248  ;;  %s6630_s27 = sld [smem:[#allocation14_spill]]  ;;  %s6631_s24 = smov %s4933_s25 }
 0x6a7   : > { %s6632_s25 = smov %s4937_s26  ;;  %s6633_s26 = smov %s5133_s30 }
 0x6ac   : > { %p31_p7 = scmp.ge.s32.totalorder %s6630_s27, 4  }
 0x6ae   :  { %33 = sbr.rel (!%p31_p7) target bundleno = 15 (0xf), region = 151 }
 0x6b5   :  { %3893 = vsyncpa [#allocation4], 1 }
 0x6b6   :  { %3895 = vsyncpa [#allocation4 + $0x1], 1 }
 0x6b7   :  { %3896 = vsyncpa [#allocation7], 1 }
 0x6b8   :  { %3897 = vsyncpa [#allocation5], 1 }
 0x6b9   :  { %3899 = vsyncpa [#allocation5 + $0x1], 1 }

</bundles_post_ra>
